<compile_context>
chip_gen: v6e
topology: v6e:2x2x1
jax: 0.10.0
libtpu: 0.0.40
codegen_flags: <defaults>
</compile_context>

<pallas_src>
import functools

import numpy as np
import jax
import jax.numpy as jnp
from jax.experimental import pallas as pl
from jax.experimental.pallas import tpu as pltpu

_LN_EPS = 1e-5              # PyTorch LayerNorm default eps
_BN_EPS = 1e-5              # PyTorch BatchNorm2d default eps
_LANES = 128                # TPU lane width; stage-1 (64ch) zero-padded to this
_MM_DTYPE = jnp.bfloat16    # MXU operand dtype (f32 accumulation); jnp.float32 for exact parity


# ----------------------------------------------------------------------------
# Host-side constant builders (shift / gather matrices for the convolutions)
# ----------------------------------------------------------------------------

def _shift_matrices_3x3(H, W):
    """S[t] (N,N) 0/1 matrices with t=(di+1)*3+(dj+1): S[t] @ tokens == shift by (di,dj)
    with zero padding.  Lets depthwise 3x3 convs run as 9 tiny MXU matmuls instead of
    unaligned sublane-axis slices."""
    N = H * W
    S = np.zeros((9, N, N), np.float32)
    for di in (-1, 0, 1):
        for dj in (-1, 0, 1):
            t = (di + 1) * 3 + (dj + 1)
            for y in range(H):
                for x in range(W):
                    yy, xx = y + di, x + dj
                    if 0 <= yy < H and 0 <= xx < W:
                        S[t, y * W + x, yy * W + xx] = 1.0
    return jnp.asarray(S)


def _gather_matrices(H1, W1, kh, kw):
    """G[t] (N2,N1) 0/1 matrices selecting the source pixel of kernel position (i,j)
    for every output patch of a kernel=stride=(kh,kw) conv; t = i*kw + j."""
    H2, W2 = (H1 - kh) // kh + 1, (W1 - kw) // kw + 1
    G = np.zeros((kh * kw, H2 * W2, H1 * W1), np.float32)
    for i in range(kh):
        for j in range(kw):
            t = i * kw + j
            for Y in range(H2):
                for X in range(W2):
                    G[t, Y * W2 + X, (Y * kh + i) * W1 + (X * kw + j)] = 1.0
    return jnp.asarray(G)


# ----------------------------------------------------------------------------
# The fused whole-network kernel (one batch element per grid step)
# ----------------------------------------------------------------------------

_CONST_ORDER = (
    'pe1_w', 'pe1_b', 'pe1_g', 'pe1_be',
    's1', 'cb_pos_w', 'cb_pos_b', 'cb_bn1_s', 'cb_bn1_t', 'cb_conv1_w', 'cb_conv1_b',
    'cb_sa_w', 'cb_sa_b', 'cb_bn2_s', 'cb_bn2_t',
    'cb_fc1_w', 'cb_fc1_b', 'cb_fc2_w', 'cb_fc2_b',
    'g2', 'pe2_w', 'pe2_b', 'pe2_g', 'pe2_be',
    's2', 'sa_pos_w', 'sa_pos_b', 'sa_ln1_g', 'sa_ln1_b',
    'sa_qkv_w', 'sa_qkv_b', 'sa_proj_w', 'sa_proj_b',
    'sa_ln2_g', 'sa_ln2_b', 'sa_fc1_w', 'sa_fc1_b', 'sa_fc2_w', 'sa_fc2_b',
    'head_w', 'head_b',
)


def _uniformer_kernel(patches_ref, *refs, c1_valid, num_heads):
    """Whole Uniformer forward for ONE batch element; everything VMEM/vreg resident."""
    assert len(refs) == len(_CONST_ORDER) + 1
    out_ref = refs[-1]
    c = dict(zip(_CONST_ORDER, refs[:-1]))
    f32 = jnp.float32

    def mm(a, w):                       # bf16 (or f32) MXU operands, f32 accumulation
        return jnp.dot(a.astype(w.dtype), w, preferred_element_type=f32)

    def dwconv3x3(x, s_ref, w_ref, b_ref):
        # depthwise 3x3 (padding=1) over flattened tokens:
        #   out = sum_tap S_tap @ (x * w_tap) + b   (pure MXU + VPU, no sublane slices)
        acc = None
        for t in range(s_ref.shape[0]):
            term = jnp.dot(s_ref[t], x * w_ref[t], preferred_element_type=f32)
            acc = term if acc is None else acc + term
        return acc + b_ref[...]

    def layernorm(y, g_ref, b_ref, n_valid):
        # E[x^2]-mu^2 form (divisor = #valid channels) so zero-padded lanes never
        # perturb the statistics; padded gamma/beta are zero so padded lanes stay 0.
        inv = 1.0 / float(n_valid)
        mu = jnp.sum(y, axis=-1, keepdims=True) * inv
        var = jnp.maximum(jnp.sum(y * y, axis=-1, keepdims=True) * inv - mu * mu, 0.0)
        return (y - mu) * jax.lax.rsqrt(var + _LN_EPS) * g_ref[...] + b_ref[...]

    # --------------- Stage 1: PatchEmbed1 + CBlock (64 ch zero-padded to 128 lanes) ---
    patches = patches_ref[0]                                         # (N1, K1p) f32
    tok = mm(patches, c['pe1_w'][...]) + c['pe1_b'][...]
    tok = layernorm(tok, c['pe1_g'], c['pe1_be'], c1_valid)

    # x = x + pos_embed(x)
    tok = tok + dwconv3x3(tok, c['s1'], c['cb_pos_w'], c['cb_pos_b'])
    # x = x + shallow_sa(conv1(norm1(x)))      (norm1 = eval BatchNorm, pre-folded)
    xn = tok * c['cb_bn1_s'][...] + c['cb_bn1_t'][...]
    t1 = mm(xn, c['cb_conv1_w'][...]) + c['cb_conv1_b'][...]
    tok = tok + dwconv3x3(t1, c['s1'], c['cb_sa_w'], c['cb_sa_b'])
    # x = x + mlp(norm2(x))
    xn = tok * c['cb_bn2_s'][...] + c['cb_bn2_t'][...]
    h = mm(xn, c['cb_fc1_w'][...]) + c['cb_fc1_b'][...]
    # TODO(synk): tanh-approx GELU (EUP) instead of PyTorch's exact erf GELU (~1e-3 dev).
    h = jax.nn.gelu(h, approximate=True)
    tok = tok + mm(h, c['cb_fc2_w'][...]) + c['cb_fc2_b'][...]

    # --------------- PatchEmbed2: kernel=stride conv as per-tap gather + matmul, + LN --
    acc = None
    for t in range(c['g2'].shape[0]):
        gathered = jnp.dot(c['g2'][t], tok, preferred_element_type=f32)   # (N2, 128)
        term = mm(gathered, c['pe2_w'][t])
        acc = term if acc is None else acc + term
    tok = layernorm(acc + c['pe2_b'][...], c['pe2_g'], c['pe2_be'], acc.shape[-1])

    # --------------- Stage 2: SABlock (dim = 128) --------------------------------------
    tok = tok + dwconv3x3(tok, c['s2'], c['sa_pos_w'], c['sa_pos_b'])

    # x = x + proj(multi_head_attention(qkv(LN1(x))))   (qk scale pre-folded into q)
    t2 = layernorm(tok, c['sa_ln1_g'], c['sa_ln1_b'], tok.shape[-1])
    qkv = mm(t2, c['sa_qkv_w'][...]) + c['sa_qkv_b'][...]            # (N2, 3C)
    C = qkv.shape[-1] // 3
    D = C // num_heads
    wp = c['sa_proj_w'][...]
    attn = None
    for hh in range(num_heads):
        qh = qkv[:, hh * D:(hh + 1) * D]
        kh = qkv[:, C + hh * D:C + (hh + 1) * D]
        vh = qkv[:, 2 * C + hh * D:2 * C + (hh + 1) * D]
        s = jax.lax.dot_general(qh, kh, (((1,), (1,)), ((), ())),
                                preferred_element_type=f32)           # (N2, N2)
        s = s - jnp.max(s, axis=-1, keepdims=True)
        pr = jnp.exp(s)
        pr = pr * pl.reciprocal(jnp.sum(pr, axis=-1, keepdims=True), approx=True)
        oh = jnp.dot(pr, vh, preferred_element_type=f32)              # (N2, D)
        # proj of the concatenated heads == sum_h o_h @ Wp[h*D:(h+1)*D, :]
        term = mm(oh, wp[hh * D:(hh + 1) * D, :])
        attn = term if attn is None else attn + term
    tok = tok + attn + c['sa_proj_b'][...]

    # x = x + mlp(LN2(x))
    t2 = layernorm(tok, c['sa_ln2_g'], c['sa_ln2_b'], tok.shape[-1])
    h = mm(t2, c['sa_fc1_w'][...]) + c['sa_fc1_b'][...]
    h = jax.nn.gelu(h, approximate=True)
    tok = tok + mm(h, c['sa_fc2_w'][...]) + c['sa_fc2_b'][...]

    # --------------- Head: average pool over tokens + classifier (lane-padded output) --
    pooled = jnp.mean(tok, axis=0, keepdims=True)                     # (1, C)
    out_ref[0] = mm(pooled, c['head_w'][...]) + c['head_b'][...]


# ----------------------------------------------------------------------------
# Wrapper: ONE pallas_call for the whole network, grid over batch
# ----------------------------------------------------------------------------

def _zero_index_map(i, *, ndim):
    return (0,) * ndim


def _im2col_pe1(x_nchw, patch, k_pad):
    """im2col for the kernel=stride=patch PatchEmbed1 conv; K zero-padded to k_pad."""
    B, Cin, H, W = x_nchw.shape
    kh, kw = patch
    Ho, Wo = H // kh, W // kw
    x = x_nchw[:, :, :Ho * kh, :Wo * kw].astype(jnp.float32)
    pm = x.reshape(B, Cin, Ho, kh, Wo, kw).transpose(0, 2, 4, 1, 3, 5)
    pm = pm.reshape(B, Ho * Wo, Cin * kh * kw)                 # k ordered (C, kh, kw)
    K = Cin * kh * kw
    if K < k_pad:
        pm = jnp.pad(pm, ((0, 0), (0, 0), (0, k_pad - K)))
    return pm


def uniformer_forward(x_nchw, q, *, patchs=((4, 4), (2, 2)), num_heads=2,
                      num_classes=10, stage1_channels=64):
    B = x_nchw.shape[0]
    patches = _im2col_pe1(x_nchw, patchs[0], q['pe1_w'].shape[0])    # (B, N1, K1p)
    consts = [q[name] for name in _CONST_ORDER]
    n1, k1p = patches.shape[1], patches.shape[2]
    hp = q['head_w'].shape[1]

    in_specs = [pl.BlockSpec((1, n1, k1p), lambda b: (b, 0, 0))]
    for a in consts:   # weights: full-array blocks, constant index -> DMA'd once
        in_specs.append(
            pl.BlockSpec(a.shape, functools.partial(_zero_index_map, ndim=a.ndim)))

    kern = functools.partial(_uniformer_kernel, c1_valid=stage1_channels,
                             num_heads=num_heads)
    out = pl.pallas_call(
        kern,
        grid=(B,),
        in_specs=in_specs,
        out_specs=pl.BlockSpec((1, 1, hp), lambda b: (b, 0, 0)),
        out_shape=jax.ShapeDtypeStruct((B, 1, hp), jnp.float32),
        compiler_params=pltpu.CompilerParams(dimension_semantics=("parallel",)),
    )(patches, *consts)
    return out[:, 0, :num_classes]


# ----------------------------------------------------------------------------
# Parameters: raw (torch-shaped) init + one-time preparation (outside jit)
# ----------------------------------------------------------------------------

def init_params(key, in_channels=3, num_classes=10, patchs=((4, 4), (2, 2))):
    keys = iter(jax.random.split(key, 64))

    def nrm(shape, scale=0.05):
        return (scale * jax.random.normal(next(keys), shape)).astype(jnp.float32)

    kh1, kw1 = patchs[0]
    kh2, kw2 = patchs[1]
    p = {}
    # PatchEmbed1: Conv2d(in,64,patch,stride=patch) + LayerNorm(64)
    p['pe1_w'] = nrm((64, in_channels, kh1, kw1)); p['pe1_b'] = nrm((64,))
    p['pe1_ln_g'] = 1.0 + nrm((64,));              p['pe1_ln_b'] = nrm((64,))
    # CBlock(64)
    p['cb_pos_w'] = nrm((64, 1, 3, 3));            p['cb_pos_b'] = nrm((64,))
    p['cb_bn1_g'] = 1.0 + nrm((64,));              p['cb_bn1_b'] = nrm((64,))
    p['cb_bn1_mean'] = nrm((64,));                 p['cb_bn1_var'] = 1.0 + jnp.abs(nrm((64,)))
    p['cb_conv1_w'] = nrm((64, 64, 1, 1));         p['cb_conv1_b'] = nrm((64,))
    p['cb_sa_w'] = nrm((64, 1, 3, 3));             p['cb_sa_b'] = nrm((64,))
    p['cb_bn2_g'] = 1.0 + nrm((64,));              p['cb_bn2_b'] = nrm((64,))
    p['cb_bn2_mean'] = nrm((64,));                 p['cb_bn2_var'] = 1.0 + jnp.abs(nrm((64,)))
    p['cb_fc1_w'] = nrm((64, 64, 1, 1));           p['cb_fc1_b'] = nrm((64,))
    p['cb_fc2_w'] = nrm((64, 64, 1, 1));           p['cb_fc2_b'] = nrm((64,))
    # PatchEmbed2: Conv2d(64,128,patch2,stride=patch2) + LayerNorm(128)
    p['pe2_w'] = nrm((128, 64, kh2, kw2));         p['pe2_b'] = nrm((128,))
    p['pe2_ln_g'] = 1.0 + nrm((128,));             p['pe2_ln_b'] = nrm((128,))
    # SABlock(128, heads=2, qkv_bias=True)
    p['sa_pos_w'] = nrm((128, 1, 3, 3));           p['sa_pos_b'] = nrm((128,))
    p['sa_ln1_g'] = 1.0 + nrm((128,));             p['sa_ln1_b'] = nrm((128,))
    p['sa_qkv_w'] = nrm((384, 128));               p['sa_qkv_b'] = nrm((384,))
    p['sa_proj_w'] = nrm((128, 128));              p['sa_proj_b'] = nrm((128,))
    p['sa_ln2_g'] = 1.0 + nrm((128,));             p['sa_ln2_b'] = nrm((128,))
    p['sa_fc1_w'] = nrm((128, 128));               p['sa_fc1_b'] = nrm((128,))
    p['sa_fc2_w'] = nrm((128, 128));               p['sa_fc2_b'] = nrm((128,))
    # classify head
    p['head_w'] = nrm((num_classes, 128));         p['head_b'] = nrm((num_classes,))
    return p


def prepare_params(p, *, frames=16, joints=8, patchs=((4, 4), (2, 2)),
                   num_heads=2, mm_dtype=_MM_DTYPE):
    """One-time (outside jit) transforms: transposes, conv->matmul reshapes, eval-BN
    folding, qk-scale folding, lane padding (64->128 and K/head dims), shift/gather
    matrix construction, and bf16 cast of the MXU weight operands."""
    f32 = lambda a: jnp.asarray(a, jnp.float32)
    CP = _LANES

    def ceil_to(n, m):
        return ((n + m - 1) // m) * m

    def padmat(w, rows, cols, dtype=jnp.float32):
        w = f32(w)
        out = jnp.zeros((rows, cols), jnp.float32).at[:w.shape[0], :w.shape[1]].set(w)
        return out.astype(dtype)

    def padvec(v, cols=CP):
        v = f32(v).reshape(-1)
        return jnp.zeros((1, cols), jnp.float32).at[0, :v.shape[0]].set(v)

    def dw_taps(w, cols=CP):                      # (C,1,3,3) -> (9, 1, cols), tap = i*3+j
        w = f32(w)
        C = w.shape[0]
        wt = jnp.transpose(w.reshape(C, 9), (1, 0))
        return jnp.zeros((9, 1, cols), jnp.float32).at[:, 0, :C].set(wt)

    def bn_fold(g, b, mean, var):
        s = f32(g) / jnp.sqrt(f32(var) + _BN_EPS)
        return padvec(s), padvec(f32(b) - f32(mean) * s)

    kh1, kw1 = patchs[0]
    kh2, kw2 = patchs[1]
    H1, W1 = frames // kh1, joints // kw1
    H2, W2 = (H1 - kh2) // kh2 + 1, (W1 - kw2) // kw2 + 1
    del H2, W2  # only needed inside the matrix builders

    q = {}
    # PatchEmbed1: conv (64, Cin, kh1, kw1) -> (K1, 64), K and out padded to 128 lanes
    w = f32(p['pe1_w'])
    K1 = w.shape[1] * kh1 * kw1
    q['pe1_w'] = padmat(w.reshape(w.shape[0], -1).T, ceil_to(K1, CP), CP, mm_dtype)
    q['pe1_b'] = padvec(p['pe1_b'])
    q['pe1_g'] = padvec(p['pe1_ln_g'])
    q['pe1_be'] = padvec(p['pe1_ln_b'])

    # CBlock (stage-1), channels zero-padded 64 -> 128
    q['s1'] = _shift_matrices_3x3(H1, W1)
    q['cb_pos_w'] = dw_taps(p['cb_pos_w']); q['cb_pos_b'] = padvec(p['cb_pos_b'])
    q['cb_bn1_s'], q['cb_bn1_t'] = bn_fold(p['cb_bn1_g'], p['cb_bn1_b'],
                                           p['cb_bn1_mean'], p['cb_bn1_var'])
    cw = f32(p['cb_conv1_w'])
    q['cb_conv1_w'] = padmat(cw.reshape(cw.shape[0], cw.shape[1]).T, CP, CP, mm_dtype)
    q['cb_conv1_b'] = padvec(p['cb_conv1_b'])
    q['cb_sa_w'] = dw_taps(p['cb_sa_w']); q['cb_sa_b'] = padvec(p['cb_sa_b'])
    q['cb_bn2_s'], q['cb_bn2_t'] = bn_fold(p['cb_bn2_g'], p['cb_bn2_b'],
                                           p['cb_bn2_mean'], p['cb_bn2_var'])
    cw = f32(p['cb_fc1_w'])
    q['cb_fc1_w'] = padmat(cw.reshape(cw.shape[0], cw.shape[1]).T, CP, CP, mm_dtype)
    q['cb_fc1_b'] = padvec(p['cb_fc1_b'])
    cw = f32(p['cb_fc2_w'])
    q['cb_fc2_w'] = padmat(cw.reshape(cw.shape[0], cw.shape[1]).T, CP, CP, mm_dtype)
    q['cb_fc2_b'] = padvec(p['cb_fc2_b'])

    # PatchEmbed2: kernel=stride=(kh2,kw2) conv as per-kernel-position weight slabs
    q['g2'] = _gather_matrices(H1, W1, kh2, kw2)
    w2 = f32(p['pe2_w'])                                             # (128, 64, kh2, kw2)
    mats = [padmat(w2[:, :, i, j].T, CP, w2.shape[0], jnp.float32)
            for i in range(kh2) for j in range(kw2)]
    q['pe2_w'] = jnp.stack(mats).astype(mm_dtype)                    # (kh2*kw2, 128, 128)
    q['pe2_b'] = padvec(p['pe2_b'], cols=w2.shape[0])
    q['pe2_g'] = padvec(p['pe2_ln_g'], cols=w2.shape[0])
    q['pe2_be'] = padvec(p['pe2_ln_b'], cols=w2.shape[0])

    # SABlock (stage-2, dim = 128)
    H2b, W2b = (H1 - kh2) // kh2 + 1, (W1 - kw2) // kw2 + 1
    q['s2'] = _shift_matrices_3x3(H2b, W2b)
    q['sa_pos_w'] = dw_taps(p['sa_pos_w']); q['sa_pos_b'] = padvec(p['sa_pos_b'])
    q['sa_ln1_g'] = padvec(p['sa_ln1_g']); q['sa_ln1_b'] = padvec(p['sa_ln1_b'])
    wqkv = f32(p['sa_qkv_w']).T                                      # (C, 3C)
    bqkv = f32(p['sa_qkv_b'])
    C2 = wqkv.shape[0]
    scale = float(C2 // num_heads) ** (-0.5)
    wqkv = wqkv.at[:, :C2].multiply(scale)       # fold q.k^T scale into the q projection
    bqkv = bqkv.at[:C2].multiply(scale)
    q['sa_qkv_w'] = wqkv.astype(mm_dtype)
    q['sa_qkv_b'] = bqkv.reshape(1, -1)
    q['sa_proj_w'] = f32(p['sa_proj_w']).T.astype(mm_dtype)
    q['sa_proj_b'] = padvec(p['sa_proj_b'])
    q['sa_ln2_g'] = padvec(p['sa_ln2_g']); q['sa_ln2_b'] = padvec(p['sa_ln2_b'])
    q['sa_fc1_w'] = f32(p['sa_fc1_w']).T.astype(mm_dtype); q['sa_fc1_b'] = padvec(p['sa_fc1_b'])
    q['sa_fc2_w'] = f32(p['sa_fc2_w']).T.astype(mm_dtype); q['sa_fc2_b'] = padvec(p['sa_fc2_b'])

    # Classifier head: output dim lane-padded to 128 (sliced back on the host)
    wh = f32(p['head_w']).T                                          # (128, num_classes)
    hp = ceil_to(max(wh.shape[1], _LANES), _LANES)
    q['head_w'] = padmat(wh, wh.shape[0], hp, mm_dtype)
    q['head_b'] = padvec(p['head_b'], cols=hp)
    return q


# ----------------------------------------------------------------------------

if __name__ == "__main__":
    # Small shapes consistent with the module: frames=16, joints=8, in_channels=3.
    B, Cin, frames, joints = 2, 3, 16, 8
    num_classes = 10
    num_heads = 2

    raw_params = init_params(jax.random.PRNGKey(1), in_channels=Cin,
                             num_classes=num_classes)
    params = prepare_params(raw_params, frames=frames, joints=joints,
                            num_heads=num_heads)                     # one-time, outside jit

    x = jax.random.normal(jax.random.PRNGKey(0), (B, Cin, frames, joints),
                          dtype=jnp.float32)

    fwd = jax.jit(functools.partial(uniformer_forward,
                                    num_heads=num_heads, num_classes=num_classes))
    out = jax.block_until_ready(fwd(x, params))
    assert out.shape == (B, num_classes), out.shape
    assert bool(jnp.all(jnp.isfinite(out)))
    print("KERNEL_OK")
</pallas_src>

<mosaic_0001>
module attributes {stable_mosaic.version = 11 : i64} {
  func.func @_uniformer_kernel(%arg0: i32, %arg1: memref<1x8x128xf32, #tpu.memory_space<vmem>>, %arg2: memref<128x128xbf16, #tpu.memory_space<vmem>>, %arg3: memref<1x128xf32, #tpu.memory_space<vmem>>, %arg4: memref<1x128xf32, #tpu.memory_space<vmem>>, %arg5: memref<1x128xf32, #tpu.memory_space<vmem>>, %arg6: memref<9x8x8xf32, #tpu.memory_space<vmem>>, %arg7: memref<9x1x128xf32, #tpu.memory_space<vmem>>, %arg8: memref<1x128xf32, #tpu.memory_space<vmem>>, %arg9: memref<1x128xf32, #tpu.memory_space<vmem>>, %arg10: memref<1x128xf32, #tpu.memory_space<vmem>>, %arg11: memref<128x128xbf16, #tpu.memory_space<vmem>>, %arg12: memref<1x128xf32, #tpu.memory_space<vmem>>, %arg13: memref<9x1x128xf32, #tpu.memory_space<vmem>>, %arg14: memref<1x128xf32, #tpu.memory_space<vmem>>, %arg15: memref<1x128xf32, #tpu.memory_space<vmem>>, %arg16: memref<1x128xf32, #tpu.memory_space<vmem>>, %arg17: memref<128x128xbf16, #tpu.memory_space<vmem>>, %arg18: memref<1x128xf32, #tpu.memory_space<vmem>>, %arg19: memref<128x128xbf16, #tpu.memory_space<vmem>>, %arg20: memref<1x128xf32, #tpu.memory_space<vmem>>, %arg21: memref<4x2x8xf32, #tpu.memory_space<vmem>>, %arg22: memref<4x128x128xbf16, #tpu.memory_space<vmem>>, %arg23: memref<1x128xf32, #tpu.memory_space<vmem>>, %arg24: memref<1x128xf32, #tpu.memory_space<vmem>>, %arg25: memref<1x128xf32, #tpu.memory_space<vmem>>, %arg26: memref<9x2x2xf32, #tpu.memory_space<vmem>>, %arg27: memref<9x1x128xf32, #tpu.memory_space<vmem>>, %arg28: memref<1x128xf32, #tpu.memory_space<vmem>>, %arg29: memref<1x128xf32, #tpu.memory_space<vmem>>, %arg30: memref<1x128xf32, #tpu.memory_space<vmem>>, %arg31: memref<128x384xbf16, #tpu.memory_space<vmem>>, %arg32: memref<1x384xf32, #tpu.memory_space<vmem>>, %arg33: memref<128x128xbf16, #tpu.memory_space<vmem>>, %arg34: memref<1x128xf32, #tpu.memory_space<vmem>>, %arg35: memref<1x128xf32, #tpu.memory_space<vmem>>, %arg36: memref<1x128xf32, #tpu.memory_space<vmem>>, %arg37: memref<128x128xbf16, #tpu.memory_space<vmem>>, %arg38: memref<1x128xf32, #tpu.memory_space<vmem>>, %arg39: memref<128x128xbf16, #tpu.memory_space<vmem>>, %arg40: memref<1x128xf32, #tpu.memory_space<vmem>>, %arg41: memref<128x128xbf16, #tpu.memory_space<vmem>>, %arg42: memref<1x128xf32, #tpu.memory_space<vmem>>, %arg43: memref<1x1x128xf32, #tpu.memory_space<vmem>>) attributes {dimension_semantics = [#tpu.dimension_semantics<parallel>], iteration_bounds = array<i64: 2>, scalar_prefetch = 0 : i64, scratch_operands = 0 : i64, tpu.core_type = #tpu.core_type<tc>, window_params = [{transform_indices = @transform_0, window_bounds = array<i64: 1, 8, 128>}, {pipeline_mode = #tpu.pipeline_mode<synchronous>, transform_indices = @transform_1, window_bounds = array<i64: 128, 128>}, {pipeline_mode = #tpu.pipeline_mode<synchronous>, transform_indices = @transform_2, window_bounds = array<i64: 1, 128>}, {pipeline_mode = #tpu.pipeline_mode<synchronous>, transform_indices = @transform_3, window_bounds = array<i64: 1, 128>}, {pipeline_mode = #tpu.pipeline_mode<synchronous>, transform_indices = @transform_4, window_bounds = array<i64: 1, 128>}, {pipeline_mode = #tpu.pipeline_mode<synchronous>, transform_indices = @transform_5, window_bounds = array<i64: 9, 8, 8>}, {pipeline_mode = #tpu.pipeline_mode<synchronous>, transform_indices = @transform_6, window_bounds = array<i64: 9, 1, 128>}, {pipeline_mode = #tpu.pipeline_mode<synchronous>, transform_indices = @transform_7, window_bounds = array<i64: 1, 128>}, {pipeline_mode = #tpu.pipeline_mode<synchronous>, transform_indices = @transform_8, window_bounds = array<i64: 1, 128>}, {pipeline_mode = #tpu.pipeline_mode<synchronous>, transform_indices = @transform_9, window_bounds = array<i64: 1, 128>}, {pipeline_mode = #tpu.pipeline_mode<synchronous>, transform_indices = @transform_10, window_bounds = array<i64: 128, 128>}, {pipeline_mode = #tpu.pipeline_mode<synchronous>, transform_indices = @transform_11, window_bounds = array<i64: 1, 128>}, {pipeline_mode = #tpu.pipeline_mode<synchronous>, transform_indices = @transform_12, window_bounds = array<i64: 9, 1, 128>}, {pipeline_mode = #tpu.pipeline_mode<synchronous>, transform_indices = @transform_13, window_bounds = array<i64: 1, 128>}, {pipeline_mode = #tpu.pipeline_mode<synchronous>, transform_indices = @transform_14, window_bounds = array<i64: 1, 128>}, {pipeline_mode = #tpu.pipeline_mode<synchronous>, transform_indices = @transform_15, window_bounds = array<i64: 1, 128>}, {pipeline_mode = #tpu.pipeline_mode<synchronous>, transform_indices = @transform_16, window_bounds = array<i64: 128, 128>}, {pipeline_mode = #tpu.pipeline_mode<synchronous>, transform_indices = @transform_17, window_bounds = array<i64: 1, 128>}, {pipeline_mode = #tpu.pipeline_mode<synchronous>, transform_indices = @transform_18, window_bounds = array<i64: 128, 128>}, {pipeline_mode = #tpu.pipeline_mode<synchronous>, transform_indices = @transform_19, window_bounds = array<i64: 1, 128>}, {pipeline_mode = #tpu.pipeline_mode<synchronous>, transform_indices = @transform_20, window_bounds = array<i64: 4, 2, 8>}, {pipeline_mode = #tpu.pipeline_mode<synchronous>, transform_indices = @transform_21, window_bounds = array<i64: 4, 128, 128>}, {pipeline_mode = #tpu.pipeline_mode<synchronous>, transform_indices = @transform_22, window_bounds = array<i64: 1, 128>}, {pipeline_mode = #tpu.pipeline_mode<synchronous>, transform_indices = @transform_23, window_bounds = array<i64: 1, 128>}, {pipeline_mode = #tpu.pipeline_mode<synchronous>, transform_indices = @transform_24, window_bounds = array<i64: 1, 128>}, {pipeline_mode = #tpu.pipeline_mode<synchronous>, transform_indices = @transform_25, window_bounds = array<i64: 9, 2, 2>}, {pipeline_mode = #tpu.pipeline_mode<synchronous>, transform_indices = @transform_26, window_bounds = array<i64: 9, 1, 128>}, {pipeline_mode = #tpu.pipeline_mode<synchronous>, transform_indices = @transform_27, window_bounds = array<i64: 1, 128>}, {pipeline_mode = #tpu.pipeline_mode<synchronous>, transform_indices = @transform_28, window_bounds = array<i64: 1, 128>}, {pipeline_mode = #tpu.pipeline_mode<synchronous>, transform_indices = @transform_29, window_bounds = array<i64: 1, 128>}, {pipeline_mode = #tpu.pipeline_mode<synchronous>, transform_indices = @transform_30, window_bounds = array<i64: 128, 384>}, {pipeline_mode = #tpu.pipeline_mode<synchronous>, transform_indices = @transform_31, window_bounds = array<i64: 1, 384>}, {pipeline_mode = #tpu.pipeline_mode<synchronous>, transform_indices = @transform_32, window_bounds = array<i64: 128, 128>}, {pipeline_mode = #tpu.pipeline_mode<synchronous>, transform_indices = @transform_33, window_bounds = array<i64: 1, 128>}, {pipeline_mode = #tpu.pipeline_mode<synchronous>, transform_indices = @transform_34, window_bounds = array<i64: 1, 128>}, {pipeline_mode = #tpu.pipeline_mode<synchronous>, transform_indices = @transform_35, window_bounds = array<i64: 1, 128>}, {pipeline_mode = #tpu.pipeline_mode<synchronous>, transform_indices = @transform_36, window_bounds = array<i64: 128, 128>}, {pipeline_mode = #tpu.pipeline_mode<synchronous>, transform_indices = @transform_37, window_bounds = array<i64: 1, 128>}, {pipeline_mode = #tpu.pipeline_mode<synchronous>, transform_indices = @transform_38, window_bounds = array<i64: 128, 128>}, {pipeline_mode = #tpu.pipeline_mode<synchronous>, transform_indices = @transform_39, window_bounds = array<i64: 1, 128>}, {pipeline_mode = #tpu.pipeline_mode<synchronous>, transform_indices = @transform_40, window_bounds = array<i64: 128, 128>}, {pipeline_mode = #tpu.pipeline_mode<synchronous>, transform_indices = @transform_41, window_bounds = array<i64: 1, 128>}, {transform_indices = @transform_42, window_bounds = array<i64: 1, 1, 128>}]} {
    %c0 = arith.constant 0 : index
    %c0_0 = arith.constant 0 : index
    %c0_1 = arith.constant 0 : index
    %0 = vector.load %arg1[%c0, %c0_0, %c0_1] : memref<1x8x128xf32, #tpu.memory_space<vmem>>, vector<1x8x128xf32>
    %1 = vector.shape_cast %0 : vector<1x8x128xf32> to vector<8x128xf32>
    %c0_2 = arith.constant 0 : index
    %c0_3 = arith.constant 0 : index
    %2 = vector.load %arg2[%c0_2, %c0_3] : memref<128x128xbf16, #tpu.memory_space<vmem>>, vector<128x128xbf16>
    %3 = arith.truncf %1 : vector<8x128xf32> to vector<8x128xbf16>
    %cst = arith.constant dense<0.000000e+00> : vector<8x128xf32>
    %4 = tpu.matmul %3, %2, %cst {dimension_numbers = #tpu.dot_dimension_numbers<[1], [0], [0], [1], [0, 0, 1, 1], [], []>} : vector<8x128xbf16>, vector<128x128xbf16>, vector<8x128xf32> -> vector<8x128xf32>
    %c0_4 = arith.constant 0 : index
    %c0_5 = arith.constant 0 : index
    %5 = vector.load %arg3[%c0_4, %c0_5] : memref<1x128xf32, #tpu.memory_space<vmem>>, vector<1x128xf32>
    %6 = vector.broadcast %5 : vector<1x128xf32> to vector<8x128xf32>
    %7 = arith.addf %4, %6 : vector<8x128xf32>
    %cst_6 = arith.constant dense<0.000000e+00> : vector<8xf32>
    %8 = vector.multi_reduction <add>, %7, %cst_6 [1] : vector<8x128xf32> to vector<8xf32>
    %9 = vector.shape_cast %8 : vector<8xf32> to vector<8x1xf32>
    %cst_7 = arith.constant 1.562500e-02 : f32
    %10 = vector.broadcast %cst_7 : f32 to vector<8x1xf32>
    %11 = arith.mulf %9, %10 : vector<8x1xf32>
    %12 = arith.mulf %7, %7 : vector<8x128xf32>
    %cst_8 = arith.constant dense<0.000000e+00> : vector<8xf32>
    %13 = vector.multi_reduction <add>, %12, %cst_8 [1] : vector<8x128xf32> to vector<8xf32>
    %14 = vector.shape_cast %13 : vector<8xf32> to vector<8x1xf32>
    %cst_9 = arith.constant 1.562500e-02 : f32
    %15 = vector.broadcast %cst_9 : f32 to vector<8x1xf32>
    %16 = arith.mulf %14, %15 : vector<8x1xf32>
    %17 = arith.mulf %11, %11 : vector<8x1xf32>
    %18 = arith.subf %16, %17 : vector<8x1xf32>
    %cst_10 = arith.constant 0.000000e+00 : f32
    %19 = vector.broadcast %cst_10 : f32 to vector<8x1xf32>
    %20 = arith.maximumf %18, %19 : vector<8x1xf32>
    %21 = vector.broadcast %11 : vector<8x1xf32> to vector<8x128xf32>
    %22 = arith.subf %7, %21 : vector<8x128xf32>
    %cst_11 = arith.constant 9.99999974E-6 : f32
    %23 = vector.broadcast %cst_11 : f32 to vector<8x1xf32>
    %24 = arith.addf %20, %23 : vector<8x1xf32>
    %25 = math.rsqrt %24 : vector<8x1xf32>
    %26 = vector.broadcast %25 : vector<8x1xf32> to vector<8x128xf32>
    %27 = arith.mulf %22, %26 : vector<8x128xf32>
    %c0_12 = arith.constant 0 : index
    %c0_13 = arith.constant 0 : index
    %28 = vector.load %arg4[%c0_12, %c0_13] : memref<1x128xf32, #tpu.memory_space<vmem>>, vector<1x128xf32>
    %29 = vector.broadcast %28 : vector<1x128xf32> to vector<8x128xf32>
    %30 = arith.mulf %27, %29 : vector<8x128xf32>
    %c0_14 = arith.constant 0 : index
    %c0_15 = arith.constant 0 : index
    %31 = vector.load %arg5[%c0_14, %c0_15] : memref<1x128xf32, #tpu.memory_space<vmem>>, vector<1x128xf32>
    %32 = vector.broadcast %31 : vector<1x128xf32> to vector<8x128xf32>
    %33 = arith.addf %30, %32 : vector<8x128xf32>
    %c0_16 = arith.constant 0 : index
    %c0_17 = arith.constant 0 : index
    %c0_18 = arith.constant 0 : index
    %34 = vector.load %arg6[%c0_16, %c0_17, %c0_18] : memref<9x8x8xf32, #tpu.memory_space<vmem>>, vector<1x8x8xf32>
    %35 = vector.shape_cast %34 : vector<1x8x8xf32> to vector<8x8xf32>
    %c0_19 = arith.constant 0 : index
    %c0_20 = arith.constant 0 : index
    %c0_21 = arith.constant 0 : index
    %36 = vector.load %arg7[%c0_19, %c0_20, %c0_21] : memref<9x1x128xf32, #tpu.memory_space<vmem>>, vector<1x1x128xf32>
    %37 = vector.shape_cast %36 : vector<1x1x128xf32> to vector<1x128xf32>
    %38 = vector.broadcast %37 : vector<1x128xf32> to vector<8x128xf32>
    %39 = arith.mulf %33, %38 : vector<8x128xf32>
    %cst_22 = arith.constant dense<0.000000e+00> : vector<8x128xf32>
    %40 = tpu.matmul %35, %39, %cst_22 {dimension_numbers = #tpu.dot_dimension_numbers<[1], [0], [0], [1], [0, 0, 1, 1], [], []>} : vector<8x8xf32>, vector<8x128xf32>, vector<8x128xf32> -> vector<8x128xf32>
    %c1 = arith.constant 1 : index
    %c0_23 = arith.constant 0 : index
    %c0_24 = arith.constant 0 : index
    %41 = vector.load %arg6[%c1, %c0_23, %c0_24] : memref<9x8x8xf32, #tpu.memory_space<vmem>>, vector<1x8x8xf32>
    %42 = vector.shape_cast %41 : vector<1x8x8xf32> to vector<8x8xf32>
    %c1_25 = arith.constant 1 : index
    %c0_26 = arith.constant 0 : index
    %c0_27 = arith.constant 0 : index
    %43 = vector.load %arg7[%c1_25, %c0_26, %c0_27] : memref<9x1x128xf32, #tpu.memory_space<vmem>>, vector<1x1x128xf32>
    %44 = vector.shape_cast %43 : vector<1x1x128xf32> to vector<1x128xf32>
    %45 = vector.broadcast %44 : vector<1x128xf32> to vector<8x128xf32>
    %46 = arith.mulf %33, %45 : vector<8x128xf32>
    %cst_28 = arith.constant dense<0.000000e+00> : vector<8x128xf32>
    %47 = tpu.matmul %42, %46, %cst_28 {dimension_numbers = #tpu.dot_dimension_numbers<[1], [0], [0], [1], [0, 0, 1, 1], [], []>} : vector<8x8xf32>, vector<8x128xf32>, vector<8x128xf32> -> vector<8x128xf32>
    %48 = arith.addf %40, %47 : vector<8x128xf32>
    %c2 = arith.constant 2 : index
    %c0_29 = arith.constant 0 : index
    %c0_30 = arith.constant 0 : index
    %49 = vector.load %arg6[%c2, %c0_29, %c0_30] : memref<9x8x8xf32, #tpu.memory_space<vmem>>, vector<1x8x8xf32>
    %50 = vector.shape_cast %49 : vector<1x8x8xf32> to vector<8x8xf32>
    %c2_31 = arith.constant 2 : index
    %c0_32 = arith.constant 0 : index
    %c0_33 = arith.constant 0 : index
    %51 = vector.load %arg7[%c2_31, %c0_32, %c0_33] : memref<9x1x128xf32, #tpu.memory_space<vmem>>, vector<1x1x128xf32>
    %52 = vector.shape_cast %51 : vector<1x1x128xf32> to vector<1x128xf32>
    %53 = vector.broadcast %52 : vector<1x128xf32> to vector<8x128xf32>
    %54 = arith.mulf %33, %53 : vector<8x128xf32>
    %cst_34 = arith.constant dense<0.000000e+00> : vector<8x128xf32>
    %55 = tpu.matmul %50, %54, %cst_34 {dimension_numbers = #tpu.dot_dimension_numbers<[1], [0], [0], [1], [0, 0, 1, 1], [], []>} : vector<8x8xf32>, vector<8x128xf32>, vector<8x128xf32> -> vector<8x128xf32>
    %56 = arith.addf %48, %55 : vector<8x128xf32>
    %c3 = arith.constant 3 : index
    %c0_35 = arith.constant 0 : index
    %c0_36 = arith.constant 0 : index
    %57 = vector.load %arg6[%c3, %c0_35, %c0_36] : memref<9x8x8xf32, #tpu.memory_space<vmem>>, vector<1x8x8xf32>
    %58 = vector.shape_cast %57 : vector<1x8x8xf32> to vector<8x8xf32>
    %c3_37 = arith.constant 3 : index
    %c0_38 = arith.constant 0 : index
    %c0_39 = arith.constant 0 : index
    %59 = vector.load %arg7[%c3_37, %c0_38, %c0_39] : memref<9x1x128xf32, #tpu.memory_space<vmem>>, vector<1x1x128xf32>
    %60 = vector.shape_cast %59 : vector<1x1x128xf32> to vector<1x128xf32>
    %61 = vector.broadcast %60 : vector<1x128xf32> to vector<8x128xf32>
    %62 = arith.mulf %33, %61 : vector<8x128xf32>
    %cst_40 = arith.constant dense<0.000000e+00> : vector<8x128xf32>
    %63 = tpu.matmul %58, %62, %cst_40 {dimension_numbers = #tpu.dot_dimension_numbers<[1], [0], [0], [1], [0, 0, 1, 1], [], []>} : vector<8x8xf32>, vector<8x128xf32>, vector<8x128xf32> -> vector<8x128xf32>
    %64 = arith.addf %56, %63 : vector<8x128xf32>
    %c4 = arith.constant 4 : index
    %c0_41 = arith.constant 0 : index
    %c0_42 = arith.constant 0 : index
    %65 = vector.load %arg6[%c4, %c0_41, %c0_42] : memref<9x8x8xf32, #tpu.memory_space<vmem>>, vector<1x8x8xf32>
    %66 = vector.shape_cast %65 : vector<1x8x8xf32> to vector<8x8xf32>
    %c4_43 = arith.constant 4 : index
    %c0_44 = arith.constant 0 : index
    %c0_45 = arith.constant 0 : index
    %67 = vector.load %arg7[%c4_43, %c0_44, %c0_45] : memref<9x1x128xf32, #tpu.memory_space<vmem>>, vector<1x1x128xf32>
    %68 = vector.shape_cast %67 : vector<1x1x128xf32> to vector<1x128xf32>
    %69 = vector.broadcast %68 : vector<1x128xf32> to vector<8x128xf32>
    %70 = arith.mulf %33, %69 : vector<8x128xf32>
    %cst_46 = arith.constant dense<0.000000e+00> : vector<8x128xf32>
    %71 = tpu.matmul %66, %70, %cst_46 {dimension_numbers = #tpu.dot_dimension_numbers<[1], [0], [0], [1], [0, 0, 1, 1], [], []>} : vector<8x8xf32>, vector<8x128xf32>, vector<8x128xf32> -> vector<8x128xf32>
    %72 = arith.addf %64, %71 : vector<8x128xf32>
    %c5 = arith.constant 5 : index
    %c0_47 = arith.constant 0 : index
    %c0_48 = arith.constant 0 : index
    %73 = vector.load %arg6[%c5, %c0_47, %c0_48] : memref<9x8x8xf32, #tpu.memory_space<vmem>>, vector<1x8x8xf32>
    %74 = vector.shape_cast %73 : vector<1x8x8xf32> to vector<8x8xf32>
    %c5_49 = arith.constant 5 : index
    %c0_50 = arith.constant 0 : index
    %c0_51 = arith.constant 0 : index
    %75 = vector.load %arg7[%c5_49, %c0_50, %c0_51] : memref<9x1x128xf32, #tpu.memory_space<vmem>>, vector<1x1x128xf32>
    %76 = vector.shape_cast %75 : vector<1x1x128xf32> to vector<1x128xf32>
    %77 = vector.broadcast %76 : vector<1x128xf32> to vector<8x128xf32>
    %78 = arith.mulf %33, %77 : vector<8x128xf32>
    %cst_52 = arith.constant dense<0.000000e+00> : vector<8x128xf32>
    %79 = tpu.matmul %74, %78, %cst_52 {dimension_numbers = #tpu.dot_dimension_numbers<[1], [0], [0], [1], [0, 0, 1, 1], [], []>} : vector<8x8xf32>, vector<8x128xf32>, vector<8x128xf32> -> vector<8x128xf32>
    %80 = arith.addf %72, %79 : vector<8x128xf32>
    %c6 = arith.constant 6 : index
    %c0_53 = arith.constant 0 : index
    %c0_54 = arith.constant 0 : index
    %81 = vector.load %arg6[%c6, %c0_53, %c0_54] : memref<9x8x8xf32, #tpu.memory_space<vmem>>, vector<1x8x8xf32>
    %82 = vector.shape_cast %81 : vector<1x8x8xf32> to vector<8x8xf32>
    %c6_55 = arith.constant 6 : index
    %c0_56 = arith.constant 0 : index
    %c0_57 = arith.constant 0 : index
    %83 = vector.load %arg7[%c6_55, %c0_56, %c0_57] : memref<9x1x128xf32, #tpu.memory_space<vmem>>, vector<1x1x128xf32>
    %84 = vector.shape_cast %83 : vector<1x1x128xf32> to vector<1x128xf32>
    %85 = vector.broadcast %84 : vector<1x128xf32> to vector<8x128xf32>
    %86 = arith.mulf %33, %85 : vector<8x128xf32>
    %cst_58 = arith.constant dense<0.000000e+00> : vector<8x128xf32>
    %87 = tpu.matmul %82, %86, %cst_58 {dimension_numbers = #tpu.dot_dimension_numbers<[1], [0], [0], [1], [0, 0, 1, 1], [], []>} : vector<8x8xf32>, vector<8x128xf32>, vector<8x128xf32> -> vector<8x128xf32>
    %88 = arith.addf %80, %87 : vector<8x128xf32>
    %c7 = arith.constant 7 : index
    %c0_59 = arith.constant 0 : index
    %c0_60 = arith.constant 0 : index
    %89 = vector.load %arg6[%c7, %c0_59, %c0_60] : memref<9x8x8xf32, #tpu.memory_space<vmem>>, vector<1x8x8xf32>
    %90 = vector.shape_cast %89 : vector<1x8x8xf32> to vector<8x8xf32>
    %c7_61 = arith.constant 7 : index
    %c0_62 = arith.constant 0 : index
    %c0_63 = arith.constant 0 : index
    %91 = vector.load %arg7[%c7_61, %c0_62, %c0_63] : memref<9x1x128xf32, #tpu.memory_space<vmem>>, vector<1x1x128xf32>
    %92 = vector.shape_cast %91 : vector<1x1x128xf32> to vector<1x128xf32>
    %93 = vector.broadcast %92 : vector<1x128xf32> to vector<8x128xf32>
    %94 = arith.mulf %33, %93 : vector<8x128xf32>
    %cst_64 = arith.constant dense<0.000000e+00> : vector<8x128xf32>
    %95 = tpu.matmul %90, %94, %cst_64 {dimension_numbers = #tpu.dot_dimension_numbers<[1], [0], [0], [1], [0, 0, 1, 1], [], []>} : vector<8x8xf32>, vector<8x128xf32>, vector<8x128xf32> -> vector<8x128xf32>
    %96 = arith.addf %88, %95 : vector<8x128xf32>
    %c8 = arith.constant 8 : index
    %c0_65 = arith.constant 0 : index
    %c0_66 = arith.constant 0 : index
    %97 = vector.load %arg6[%c8, %c0_65, %c0_66] : memref<9x8x8xf32, #tpu.memory_space<vmem>>, vector<1x8x8xf32>
    %98 = vector.shape_cast %97 : vector<1x8x8xf32> to vector<8x8xf32>
    %c8_67 = arith.constant 8 : index
    %c0_68 = arith.constant 0 : index
    %c0_69 = arith.constant 0 : index
    %99 = vector.load %arg7[%c8_67, %c0_68, %c0_69] : memref<9x1x128xf32, #tpu.memory_space<vmem>>, vector<1x1x128xf32>
    %100 = vector.shape_cast %99 : vector<1x1x128xf32> to vector<1x128xf32>
    %101 = vector.broadcast %100 : vector<1x128xf32> to vector<8x128xf32>
    %102 = arith.mulf %33, %101 : vector<8x128xf32>
    %cst_70 = arith.constant dense<0.000000e+00> : vector<8x128xf32>
    %103 = tpu.matmul %98, %102, %cst_70 {dimension_numbers = #tpu.dot_dimension_numbers<[1], [0], [0], [1], [0, 0, 1, 1], [], []>} : vector<8x8xf32>, vector<8x128xf32>, vector<8x128xf32> -> vector<8x128xf32>
    %104 = arith.addf %96, %103 : vector<8x128xf32>
    %c0_71 = arith.constant 0 : index
    %c0_72 = arith.constant 0 : index
    %105 = vector.load %arg8[%c0_71, %c0_72] : memref<1x128xf32, #tpu.memory_space<vmem>>, vector<1x128xf32>
    %106 = vector.broadcast %105 : vector<1x128xf32> to vector<8x128xf32>
    %107 = arith.addf %104, %106 : vector<8x128xf32>
    %108 = arith.addf %33, %107 : vector<8x128xf32>
    %c0_73 = arith.constant 0 : index
    %c0_74 = arith.constant 0 : index
    %109 = vector.load %arg9[%c0_73, %c0_74] : memref<1x128xf32, #tpu.memory_space<vmem>>, vector<1x128xf32>
    %110 = vector.broadcast %109 : vector<1x128xf32> to vector<8x128xf32>
    %111 = arith.mulf %108, %110 : vector<8x128xf32>
    %c0_75 = arith.constant 0 : index
    %c0_76 = arith.constant 0 : index
    %112 = vector.load %arg10[%c0_75, %c0_76] : memref<1x128xf32, #tpu.memory_space<vmem>>, vector<1x128xf32>
    %113 = vector.broadcast %112 : vector<1x128xf32> to vector<8x128xf32>
    %114 = arith.addf %111, %113 : vector<8x128xf32>
    %c0_77 = arith.constant 0 : index
    %c0_78 = arith.constant 0 : index
    %115 = vector.load %arg11[%c0_77, %c0_78] : memref<128x128xbf16, #tpu.memory_space<vmem>>, vector<128x128xbf16>
    %116 = arith.truncf %114 : vector<8x128xf32> to vector<8x128xbf16>
    %cst_79 = arith.constant dense<0.000000e+00> : vector<8x128xf32>
    %117 = tpu.matmul %116, %115, %cst_79 {dimension_numbers = #tpu.dot_dimension_numbers<[1], [0], [0], [1], [0, 0, 1, 1], [], []>} : vector<8x128xbf16>, vector<128x128xbf16>, vector<8x128xf32> -> vector<8x128xf32>
    %c0_80 = arith.constant 0 : index
    %c0_81 = arith.constant 0 : index
    %118 = vector.load %arg12[%c0_80, %c0_81] : memref<1x128xf32, #tpu.memory_space<vmem>>, vector<1x128xf32>
    %119 = vector.broadcast %118 : vector<1x128xf32> to vector<8x128xf32>
    %120 = arith.addf %117, %119 : vector<8x128xf32>
    %c0_82 = arith.constant 0 : index
    %c0_83 = arith.constant 0 : index
    %c0_84 = arith.constant 0 : index
    %121 = vector.load %arg6[%c0_82, %c0_83, %c0_84] : memref<9x8x8xf32, #tpu.memory_space<vmem>>, vector<1x8x8xf32>
    %122 = vector.shape_cast %121 : vector<1x8x8xf32> to vector<8x8xf32>
    %c0_85 = arith.constant 0 : index
    %c0_86 = arith.constant 0 : index
    %c0_87 = arith.constant 0 : index
    %123 = vector.load %arg13[%c0_85, %c0_86, %c0_87] : memref<9x1x128xf32, #tpu.memory_space<vmem>>, vector<1x1x128xf32>
    %124 = vector.shape_cast %123 : vector<1x1x128xf32> to vector<1x128xf32>
    %125 = vector.broadcast %124 : vector<1x128xf32> to vector<8x128xf32>
    %126 = arith.mulf %120, %125 : vector<8x128xf32>
    %cst_88 = arith.constant dense<0.000000e+00> : vector<8x128xf32>
    %127 = tpu.matmul %122, %126, %cst_88 {dimension_numbers = #tpu.dot_dimension_numbers<[1], [0], [0], [1], [0, 0, 1, 1], [], []>} : vector<8x8xf32>, vector<8x128xf32>, vector<8x128xf32> -> vector<8x128xf32>
    %c1_89 = arith.constant 1 : index
    %c0_90 = arith.constant 0 : index
    %c0_91 = arith.constant 0 : index
    %128 = vector.load %arg6[%c1_89, %c0_90, %c0_91] : memref<9x8x8xf32, #tpu.memory_space<vmem>>, vector<1x8x8xf32>
    %129 = vector.shape_cast %128 : vector<1x8x8xf32> to vector<8x8xf32>
    %c1_92 = arith.constant 1 : index
    %c0_93 = arith.constant 0 : index
    %c0_94 = arith.constant 0 : index
    %130 = vector.load %arg13[%c1_92, %c0_93, %c0_94] : memref<9x1x128xf32, #tpu.memory_space<vmem>>, vector<1x1x128xf32>
    %131 = vector.shape_cast %130 : vector<1x1x128xf32> to vector<1x128xf32>
    %132 = vector.broadcast %131 : vector<1x128xf32> to vector<8x128xf32>
    %133 = arith.mulf %120, %132 : vector<8x128xf32>
    %cst_95 = arith.constant dense<0.000000e+00> : vector<8x128xf32>
    %134 = tpu.matmul %129, %133, %cst_95 {dimension_numbers = #tpu.dot_dimension_numbers<[1], [0], [0], [1], [0, 0, 1, 1], [], []>} : vector<8x8xf32>, vector<8x128xf32>, vector<8x128xf32> -> vector<8x128xf32>
    %135 = arith.addf %127, %134 : vector<8x128xf32>
    %c2_96 = arith.constant 2 : index
    %c0_97 = arith.constant 0 : index
    %c0_98 = arith.constant 0 : index
    %136 = vector.load %arg6[%c2_96, %c0_97, %c0_98] : memref<9x8x8xf32, #tpu.memory_space<vmem>>, vector<1x8x8xf32>
    %137 = vector.shape_cast %136 : vector<1x8x8xf32> to vector<8x8xf32>
    %c2_99 = arith.constant 2 : index
    %c0_100 = arith.constant 0 : index
    %c0_101 = arith.constant 0 : index
    %138 = vector.load %arg13[%c2_99, %c0_100, %c0_101] : memref<9x1x128xf32, #tpu.memory_space<vmem>>, vector<1x1x128xf32>
    %139 = vector.shape_cast %138 : vector<1x1x128xf32> to vector<1x128xf32>
    %140 = vector.broadcast %139 : vector<1x128xf32> to vector<8x128xf32>
    %141 = arith.mulf %120, %140 : vector<8x128xf32>
    %cst_102 = arith.constant dense<0.000000e+00> : vector<8x128xf32>
    %142 = tpu.matmul %137, %141, %cst_102 {dimension_numbers = #tpu.dot_dimension_numbers<[1], [0], [0], [1], [0, 0, 1, 1], [], []>} : vector<8x8xf32>, vector<8x128xf32>, vector<8x128xf32> -> vector<8x128xf32>
    %143 = arith.addf %135, %142 : vector<8x128xf32>
    %c3_103 = arith.constant 3 : index
    %c0_104 = arith.constant 0 : index
    %c0_105 = arith.constant 0 : index
    %144 = vector.load %arg6[%c3_103, %c0_104, %c0_105] : memref<9x8x8xf32, #tpu.memory_space<vmem>>, vector<1x8x8xf32>
    %145 = vector.shape_cast %144 : vector<1x8x8xf32> to vector<8x8xf32>
    %c3_106 = arith.constant 3 : index
    %c0_107 = arith.constant 0 : index
    %c0_108 = arith.constant 0 : index
    %146 = vector.load %arg13[%c3_106, %c0_107, %c0_108] : memref<9x1x128xf32, #tpu.memory_space<vmem>>, vector<1x1x128xf32>
    %147 = vector.shape_cast %146 : vector<1x1x128xf32> to vector<1x128xf32>
    %148 = vector.broadcast %147 : vector<1x128xf32> to vector<8x128xf32>
    %149 = arith.mulf %120, %148 : vector<8x128xf32>
    %cst_109 = arith.constant dense<0.000000e+00> : vector<8x128xf32>
    %150 = tpu.matmul %145, %149, %cst_109 {dimension_numbers = #tpu.dot_dimension_numbers<[1], [0], [0], [1], [0, 0, 1, 1], [], []>} : vector<8x8xf32>, vector<8x128xf32>, vector<8x128xf32> -> vector<8x128xf32>
    %151 = arith.addf %143, %150 : vector<8x128xf32>
    %c4_110 = arith.constant 4 : index
    %c0_111 = arith.constant 0 : index
    %c0_112 = arith.constant 0 : index
    %152 = vector.load %arg6[%c4_110, %c0_111, %c0_112] : memref<9x8x8xf32, #tpu.memory_space<vmem>>, vector<1x8x8xf32>
    %153 = vector.shape_cast %152 : vector<1x8x8xf32> to vector<8x8xf32>
    %c4_113 = arith.constant 4 : index
    %c0_114 = arith.constant 0 : index
    %c0_115 = arith.constant 0 : index
    %154 = vector.load %arg13[%c4_113, %c0_114, %c0_115] : memref<9x1x128xf32, #tpu.memory_space<vmem>>, vector<1x1x128xf32>
    %155 = vector.shape_cast %154 : vector<1x1x128xf32> to vector<1x128xf32>
    %156 = vector.broadcast %155 : vector<1x128xf32> to vector<8x128xf32>
    %157 = arith.mulf %120, %156 : vector<8x128xf32>
    %cst_116 = arith.constant dense<0.000000e+00> : vector<8x128xf32>
    %158 = tpu.matmul %153, %157, %cst_116 {dimension_numbers = #tpu.dot_dimension_numbers<[1], [0], [0], [1], [0, 0, 1, 1], [], []>} : vector<8x8xf32>, vector<8x128xf32>, vector<8x128xf32> -> vector<8x128xf32>
    %159 = arith.addf %151, %158 : vector<8x128xf32>
    %c5_117 = arith.constant 5 : index
    %c0_118 = arith.constant 0 : index
    %c0_119 = arith.constant 0 : index
    %160 = vector.load %arg6[%c5_117, %c0_118, %c0_119] : memref<9x8x8xf32, #tpu.memory_space<vmem>>, vector<1x8x8xf32>
    %161 = vector.shape_cast %160 : vector<1x8x8xf32> to vector<8x8xf32>
    %c5_120 = arith.constant 5 : index
    %c0_121 = arith.constant 0 : index
    %c0_122 = arith.constant 0 : index
    %162 = vector.load %arg13[%c5_120, %c0_121, %c0_122] : memref<9x1x128xf32, #tpu.memory_space<vmem>>, vector<1x1x128xf32>
    %163 = vector.shape_cast %162 : vector<1x1x128xf32> to vector<1x128xf32>
    %164 = vector.broadcast %163 : vector<1x128xf32> to vector<8x128xf32>
    %165 = arith.mulf %120, %164 : vector<8x128xf32>
    %cst_123 = arith.constant dense<0.000000e+00> : vector<8x128xf32>
    %166 = tpu.matmul %161, %165, %cst_123 {dimension_numbers = #tpu.dot_dimension_numbers<[1], [0], [0], [1], [0, 0, 1, 1], [], []>} : vector<8x8xf32>, vector<8x128xf32>, vector<8x128xf32> -> vector<8x128xf32>
    %167 = arith.addf %159, %166 : vector<8x128xf32>
    %c6_124 = arith.constant 6 : index
    %c0_125 = arith.constant 0 : index
    %c0_126 = arith.constant 0 : index
    %168 = vector.load %arg6[%c6_124, %c0_125, %c0_126] : memref<9x8x8xf32, #tpu.memory_space<vmem>>, vector<1x8x8xf32>
    %169 = vector.shape_cast %168 : vector<1x8x8xf32> to vector<8x8xf32>
    %c6_127 = arith.constant 6 : index
    %c0_128 = arith.constant 0 : index
    %c0_129 = arith.constant 0 : index
    %170 = vector.load %arg13[%c6_127, %c0_128, %c0_129] : memref<9x1x128xf32, #tpu.memory_space<vmem>>, vector<1x1x128xf32>
    %171 = vector.shape_cast %170 : vector<1x1x128xf32> to vector<1x128xf32>
    %172 = vector.broadcast %171 : vector<1x128xf32> to vector<8x128xf32>
    %173 = arith.mulf %120, %172 : vector<8x128xf32>
    %cst_130 = arith.constant dense<0.000000e+00> : vector<8x128xf32>
    %174 = tpu.matmul %169, %173, %cst_130 {dimension_numbers = #tpu.dot_dimension_numbers<[1], [0], [0], [1], [0, 0, 1, 1], [], []>} : vector<8x8xf32>, vector<8x128xf32>, vector<8x128xf32> -> vector<8x128xf32>
    %175 = arith.addf %167, %174 : vector<8x128xf32>
    %c7_131 = arith.constant 7 : index
    %c0_132 = arith.constant 0 : index
    %c0_133 = arith.constant 0 : index
    %176 = vector.load %arg6[%c7_131, %c0_132, %c0_133] : memref<9x8x8xf32, #tpu.memory_space<vmem>>, vector<1x8x8xf32>
    %177 = vector.shape_cast %176 : vector<1x8x8xf32> to vector<8x8xf32>
    %c7_134 = arith.constant 7 : index
    %c0_135 = arith.constant 0 : index
    %c0_136 = arith.constant 0 : index
    %178 = vector.load %arg13[%c7_134, %c0_135, %c0_136] : memref<9x1x128xf32, #tpu.memory_space<vmem>>, vector<1x1x128xf32>
    %179 = vector.shape_cast %178 : vector<1x1x128xf32> to vector<1x128xf32>
    %180 = vector.broadcast %179 : vector<1x128xf32> to vector<8x128xf32>
    %181 = arith.mulf %120, %180 : vector<8x128xf32>
    %cst_137 = arith.constant dense<0.000000e+00> : vector<8x128xf32>
    %182 = tpu.matmul %177, %181, %cst_137 {dimension_numbers = #tpu.dot_dimension_numbers<[1], [0], [0], [1], [0, 0, 1, 1], [], []>} : vector<8x8xf32>, vector<8x128xf32>, vector<8x128xf32> -> vector<8x128xf32>
    %183 = arith.addf %175, %182 : vector<8x128xf32>
    %c8_138 = arith.constant 8 : index
    %c0_139 = arith.constant 0 : index
    %c0_140 = arith.constant 0 : index
    %184 = vector.load %arg6[%c8_138, %c0_139, %c0_140] : memref<9x8x8xf32, #tpu.memory_space<vmem>>, vector<1x8x8xf32>
    %185 = vector.shape_cast %184 : vector<1x8x8xf32> to vector<8x8xf32>
    %c8_141 = arith.constant 8 : index
    %c0_142 = arith.constant 0 : index
    %c0_143 = arith.constant 0 : index
    %186 = vector.load %arg13[%c8_141, %c0_142, %c0_143] : memref<9x1x128xf32, #tpu.memory_space<vmem>>, vector<1x1x128xf32>
    %187 = vector.shape_cast %186 : vector<1x1x128xf32> to vector<1x128xf32>
    %188 = vector.broadcast %187 : vector<1x128xf32> to vector<8x128xf32>
    %189 = arith.mulf %120, %188 : vector<8x128xf32>
    %cst_144 = arith.constant dense<0.000000e+00> : vector<8x128xf32>
    %190 = tpu.matmul %185, %189, %cst_144 {dimension_numbers = #tpu.dot_dimension_numbers<[1], [0], [0], [1], [0, 0, 1, 1], [], []>} : vector<8x8xf32>, vector<8x128xf32>, vector<8x128xf32> -> vector<8x128xf32>
    %191 = arith.addf %183, %190 : vector<8x128xf32>
    %c0_145 = arith.constant 0 : index
    %c0_146 = arith.constant 0 : index
    %192 = vector.load %arg14[%c0_145, %c0_146] : memref<1x128xf32, #tpu.memory_space<vmem>>, vector<1x128xf32>
    %193 = vector.broadcast %192 : vector<1x128xf32> to vector<8x128xf32>
    %194 = arith.addf %191, %193 : vector<8x128xf32>
    %195 = arith.addf %108, %194 : vector<8x128xf32>
    %c0_147 = arith.constant 0 : index
    %c0_148 = arith.constant 0 : index
    %196 = vector.load %arg15[%c0_147, %c0_148] : memref<1x128xf32, #tpu.memory_space<vmem>>, vector<1x128xf32>
    %197 = vector.broadcast %196 : vector<1x128xf32> to vector<8x128xf32>
    %198 = arith.mulf %195, %197 : vector<8x128xf32>
    %c0_149 = arith.constant 0 : index
    %c0_150 = arith.constant 0 : index
    %199 = vector.load %arg16[%c0_149, %c0_150] : memref<1x128xf32, #tpu.memory_space<vmem>>, vector<1x128xf32>
    %200 = vector.broadcast %199 : vector<1x128xf32> to vector<8x128xf32>
    %201 = arith.addf %198, %200 : vector<8x128xf32>
    %c0_151 = arith.constant 0 : index
    %c0_152 = arith.constant 0 : index
    %202 = vector.load %arg17[%c0_151, %c0_152] : memref<128x128xbf16, #tpu.memory_space<vmem>>, vector<128x128xbf16>
    %203 = arith.truncf %201 : vector<8x128xf32> to vector<8x128xbf16>
    %cst_153 = arith.constant dense<0.000000e+00> : vector<8x128xf32>
    %204 = tpu.matmul %203, %202, %cst_153 {dimension_numbers = #tpu.dot_dimension_numbers<[1], [0], [0], [1], [0, 0, 1, 1], [], []>} : vector<8x128xbf16>, vector<128x128xbf16>, vector<8x128xf32> -> vector<8x128xf32>
    %c0_154 = arith.constant 0 : index
    %c0_155 = arith.constant 0 : index
    %205 = vector.load %arg18[%c0_154, %c0_155] : memref<1x128xf32, #tpu.memory_space<vmem>>, vector<1x128xf32>
    %206 = vector.broadcast %205 : vector<1x128xf32> to vector<8x128xf32>
    %207 = arith.addf %204, %206 : vector<8x128xf32>
    %208 = arith.mulf %207, %207 : vector<8x128xf32>
    %209 = arith.mulf %207, %208 : vector<8x128xf32>
    %cst_156 = arith.constant 4.471500e-02 : f32
    %210 = vector.broadcast %cst_156 : f32 to vector<8x128xf32>
    %211 = arith.mulf %210, %209 : vector<8x128xf32>
    %212 = arith.addf %207, %211 : vector<8x128xf32>
    %cst_157 = arith.constant 0.797884583 : f32
    %213 = vector.broadcast %cst_157 : f32 to vector<8x128xf32>
    %214 = arith.mulf %213, %212 : vector<8x128xf32>
    %215 = math.tanh %214 : vector<8x128xf32>
    %cst_158 = arith.constant 1.000000e+00 : f32
    %216 = vector.broadcast %cst_158 : f32 to vector<8x128xf32>
    %217 = arith.addf %216, %215 : vector<8x128xf32>
    %cst_159 = arith.constant 5.000000e-01 : f32
    %218 = vector.broadcast %cst_159 : f32 to vector<8x128xf32>
    %219 = arith.mulf %218, %217 : vector<8x128xf32>
    %220 = arith.mulf %207, %219 : vector<8x128xf32>
    %c0_160 = arith.constant 0 : index
    %c0_161 = arith.constant 0 : index
    %221 = vector.load %arg19[%c0_160, %c0_161] : memref<128x128xbf16, #tpu.memory_space<vmem>>, vector<128x128xbf16>
    %222 = arith.truncf %220 : vector<8x128xf32> to vector<8x128xbf16>
    %cst_162 = arith.constant dense<0.000000e+00> : vector<8x128xf32>
    %223 = tpu.matmul %222, %221, %cst_162 {dimension_numbers = #tpu.dot_dimension_numbers<[1], [0], [0], [1], [0, 0, 1, 1], [], []>} : vector<8x128xbf16>, vector<128x128xbf16>, vector<8x128xf32> -> vector<8x128xf32>
    %224 = arith.addf %195, %223 : vector<8x128xf32>
    %c0_163 = arith.constant 0 : index
    %c0_164 = arith.constant 0 : index
    %225 = vector.load %arg20[%c0_163, %c0_164] : memref<1x128xf32, #tpu.memory_space<vmem>>, vector<1x128xf32>
    %226 = vector.broadcast %225 : vector<1x128xf32> to vector<8x128xf32>
    %227 = arith.addf %224, %226 : vector<8x128xf32>
    %c0_165 = arith.constant 0 : index
    %c0_166 = arith.constant 0 : index
    %c0_167 = arith.constant 0 : index
    %228 = vector.load %arg21[%c0_165, %c0_166, %c0_167] : memref<4x2x8xf32, #tpu.memory_space<vmem>>, vector<1x2x8xf32>
    %229 = vector.shape_cast %228 : vector<1x2x8xf32> to vector<2x8xf32>
    %cst_168 = arith.constant dense<0.000000e+00> : vector<2x128xf32>
    %230 = tpu.matmul %229, %227, %cst_168 {dimension_numbers = #tpu.dot_dimension_numbers<[1], [0], [0], [1], [0, 0, 1, 1], [], []>} : vector<2x8xf32>, vector<8x128xf32>, vector<2x128xf32> -> vector<2x128xf32>
    %c0_169 = arith.constant 0 : index
    %c0_170 = arith.constant 0 : index
    %c0_171 = arith.constant 0 : index
    %231 = vector.load %arg22[%c0_169, %c0_170, %c0_171] : memref<4x128x128xbf16, #tpu.memory_space<vmem>>, vector<1x128x128xbf16>
    %232 = vector.shape_cast %231 : vector<1x128x128xbf16> to vector<128x128xbf16>
    %233 = arith.truncf %230 : vector<2x128xf32> to vector<2x128xbf16>
    %cst_172 = arith.constant dense<0.000000e+00> : vector<2x128xf32>
    %234 = tpu.matmul %233, %232, %cst_172 {dimension_numbers = #tpu.dot_dimension_numbers<[1], [0], [0], [1], [0, 0, 1, 1], [], []>} : vector<2x128xbf16>, vector<128x128xbf16>, vector<2x128xf32> -> vector<2x128xf32>
    %c1_173 = arith.constant 1 : index
    %c0_174 = arith.constant 0 : index
    %c0_175 = arith.constant 0 : index
    %235 = vector.load %arg21[%c1_173, %c0_174, %c0_175] : memref<4x2x8xf32, #tpu.memory_space<vmem>>, vector<1x2x8xf32>
    %236 = vector.shape_cast %235 : vector<1x2x8xf32> to vector<2x8xf32>
    %cst_176 = arith.constant dense<0.000000e+00> : vector<2x128xf32>
    %237 = tpu.matmul %236, %227, %cst_176 {dimension_numbers = #tpu.dot_dimension_numbers<[1], [0], [0], [1], [0, 0, 1, 1], [], []>} : vector<2x8xf32>, vector<8x128xf32>, vector<2x128xf32> -> vector<2x128xf32>
    %c1_177 = arith.constant 1 : index
    %c0_178 = arith.constant 0 : index
    %c0_179 = arith.constant 0 : index
    %238 = vector.load %arg22[%c1_177, %c0_178, %c0_179] : memref<4x128x128xbf16, #tpu.memory_space<vmem>>, vector<1x128x128xbf16>
    %239 = vector.shape_cast %238 : vector<1x128x128xbf16> to vector<128x128xbf16>
    %240 = arith.truncf %237 : vector<2x128xf32> to vector<2x128xbf16>
    %cst_180 = arith.constant dense<0.000000e+00> : vector<2x128xf32>
    %241 = tpu.matmul %240, %239, %cst_180 {dimension_numbers = #tpu.dot_dimension_numbers<[1], [0], [0], [1], [0, 0, 1, 1], [], []>} : vector<2x128xbf16>, vector<128x128xbf16>, vector<2x128xf32> -> vector<2x128xf32>
    %242 = arith.addf %234, %241 : vector<2x128xf32>
    %c2_181 = arith.constant 2 : index
    %c0_182 = arith.constant 0 : index
    %c0_183 = arith.constant 0 : index
    %243 = vector.load %arg21[%c2_181, %c0_182, %c0_183] : memref<4x2x8xf32, #tpu.memory_space<vmem>>, vector<1x2x8xf32>
    %244 = vector.shape_cast %243 : vector<1x2x8xf32> to vector<2x8xf32>
    %cst_184 = arith.constant dense<0.000000e+00> : vector<2x128xf32>
    %245 = tpu.matmul %244, %227, %cst_184 {dimension_numbers = #tpu.dot_dimension_numbers<[1], [0], [0], [1], [0, 0, 1, 1], [], []>} : vector<2x8xf32>, vector<8x128xf32>, vector<2x128xf32> -> vector<2x128xf32>
    %c2_185 = arith.constant 2 : index
    %c0_186 = arith.constant 0 : index
    %c0_187 = arith.constant 0 : index
    %246 = vector.load %arg22[%c2_185, %c0_186, %c0_187] : memref<4x128x128xbf16, #tpu.memory_space<vmem>>, vector<1x128x128xbf16>
    %247 = vector.shape_cast %246 : vector<1x128x128xbf16> to vector<128x128xbf16>
    %248 = arith.truncf %245 : vector<2x128xf32> to vector<2x128xbf16>
    %cst_188 = arith.constant dense<0.000000e+00> : vector<2x128xf32>
    %249 = tpu.matmul %248, %247, %cst_188 {dimension_numbers = #tpu.dot_dimension_numbers<[1], [0], [0], [1], [0, 0, 1, 1], [], []>} : vector<2x128xbf16>, vector<128x128xbf16>, vector<2x128xf32> -> vector<2x128xf32>
    %250 = arith.addf %242, %249 : vector<2x128xf32>
    %c3_189 = arith.constant 3 : index
    %c0_190 = arith.constant 0 : index
    %c0_191 = arith.constant 0 : index
    %251 = vector.load %arg21[%c3_189, %c0_190, %c0_191] : memref<4x2x8xf32, #tpu.memory_space<vmem>>, vector<1x2x8xf32>
    %252 = vector.shape_cast %251 : vector<1x2x8xf32> to vector<2x8xf32>
    %cst_192 = arith.constant dense<0.000000e+00> : vector<2x128xf32>
    %253 = tpu.matmul %252, %227, %cst_192 {dimension_numbers = #tpu.dot_dimension_numbers<[1], [0], [0], [1], [0, 0, 1, 1], [], []>} : vector<2x8xf32>, vector<8x128xf32>, vector<2x128xf32> -> vector<2x128xf32>
    %c3_193 = arith.constant 3 : index
    %c0_194 = arith.constant 0 : index
    %c0_195 = arith.constant 0 : index
    %254 = vector.load %arg22[%c3_193, %c0_194, %c0_195] : memref<4x128x128xbf16, #tpu.memory_space<vmem>>, vector<1x128x128xbf16>
    %255 = vector.shape_cast %254 : vector<1x128x128xbf16> to vector<128x128xbf16>
    %256 = arith.truncf %253 : vector<2x128xf32> to vector<2x128xbf16>
    %cst_196 = arith.constant dense<0.000000e+00> : vector<2x128xf32>
    %257 = tpu.matmul %256, %255, %cst_196 {dimension_numbers = #tpu.dot_dimension_numbers<[1], [0], [0], [1], [0, 0, 1, 1], [], []>} : vector<2x128xbf16>, vector<128x128xbf16>, vector<2x128xf32> -> vector<2x128xf32>
    %258 = arith.addf %250, %257 : vector<2x128xf32>
    %c0_197 = arith.constant 0 : index
    %c0_198 = arith.constant 0 : index
    %259 = vector.load %arg23[%c0_197, %c0_198] : memref<1x128xf32, #tpu.memory_space<vmem>>, vector<1x128xf32>
    %260 = vector.broadcast %259 : vector<1x128xf32> to vector<2x128xf32>
    %261 = arith.addf %258, %260 : vector<2x128xf32>
    %cst_199 = arith.constant dense<0.000000e+00> : vector<2xf32>
    %262 = vector.multi_reduction <add>, %261, %cst_199 [1] : vector<2x128xf32> to vector<2xf32>
    %263 = vector.shape_cast %262 : vector<2xf32> to vector<2x1xf32>
    %cst_200 = arith.constant 7.812500e-03 : f32
    %264 = vector.broadcast %cst_200 : f32 to vector<2x1xf32>
    %265 = arith.mulf %263, %264 : vector<2x1xf32>
    %266 = arith.mulf %261, %261 : vector<2x128xf32>
    %cst_201 = arith.constant dense<0.000000e+00> : vector<2xf32>
    %267 = vector.multi_reduction <add>, %266, %cst_201 [1] : vector<2x128xf32> to vector<2xf32>
    %268 = vector.shape_cast %267 : vector<2xf32> to vector<2x1xf32>
    %cst_202 = arith.constant 7.812500e-03 : f32
    %269 = vector.broadcast %cst_202 : f32 to vector<2x1xf32>
    %270 = arith.mulf %268, %269 : vector<2x1xf32>
    %271 = arith.mulf %265, %265 : vector<2x1xf32>
    %272 = arith.subf %270, %271 : vector<2x1xf32>
    %cst_203 = arith.constant 0.000000e+00 : f32
    %273 = vector.broadcast %cst_203 : f32 to vector<2x1xf32>
    %274 = arith.maximumf %272, %273 : vector<2x1xf32>
    %275 = vector.broadcast %265 : vector<2x1xf32> to vector<2x128xf32>
    %276 = arith.subf %261, %275 : vector<2x128xf32>
    %cst_204 = arith.constant 9.99999974E-6 : f32
    %277 = vector.broadcast %cst_204 : f32 to vector<2x1xf32>
    %278 = arith.addf %274, %277 : vector<2x1xf32>
    %279 = math.rsqrt %278 : vector<2x1xf32>
    %280 = vector.broadcast %279 : vector<2x1xf32> to vector<2x128xf32>
    %281 = arith.mulf %276, %280 : vector<2x128xf32>
    %c0_205 = arith.constant 0 : index
    %c0_206 = arith.constant 0 : index
    %282 = vector.load %arg24[%c0_205, %c0_206] : memref<1x128xf32, #tpu.memory_space<vmem>>, vector<1x128xf32>
    %283 = vector.broadcast %282 : vector<1x128xf32> to vector<2x128xf32>
    %284 = arith.mulf %281, %283 : vector<2x128xf32>
    %c0_207 = arith.constant 0 : index
    %c0_208 = arith.constant 0 : index
    %285 = vector.load %arg25[%c0_207, %c0_208] : memref<1x128xf32, #tpu.memory_space<vmem>>, vector<1x128xf32>
    %286 = vector.broadcast %285 : vector<1x128xf32> to vector<2x128xf32>
    %287 = arith.addf %284, %286 : vector<2x128xf32>
    %c0_209 = arith.constant 0 : index
    %c0_210 = arith.constant 0 : index
    %c0_211 = arith.constant 0 : index
    %288 = vector.load %arg26[%c0_209, %c0_210, %c0_211] : memref<9x2x2xf32, #tpu.memory_space<vmem>>, vector<1x2x2xf32>
    %289 = vector.shape_cast %288 : vector<1x2x2xf32> to vector<2x2xf32>
    %c0_212 = arith.constant 0 : index
    %c0_213 = arith.constant 0 : index
    %c0_214 = arith.constant 0 : index
    %290 = vector.load %arg27[%c0_212, %c0_213, %c0_214] : memref<9x1x128xf32, #tpu.memory_space<vmem>>, vector<1x1x128xf32>
    %291 = vector.shape_cast %290 : vector<1x1x128xf32> to vector<1x128xf32>
    %292 = vector.broadcast %291 : vector<1x128xf32> to vector<2x128xf32>
    %293 = arith.mulf %287, %292 : vector<2x128xf32>
    %cst_215 = arith.constant dense<0.000000e+00> : vector<2x128xf32>
    %294 = tpu.matmul %289, %293, %cst_215 {dimension_numbers = #tpu.dot_dimension_numbers<[1], [0], [0], [1], [0, 0, 1, 1], [], []>} : vector<2x2xf32>, vector<2x128xf32>, vector<2x128xf32> -> vector<2x128xf32>
    %c1_216 = arith.constant 1 : index
    %c0_217 = arith.constant 0 : index
    %c0_218 = arith.constant 0 : index
    %295 = vector.load %arg26[%c1_216, %c0_217, %c0_218] : memref<9x2x2xf32, #tpu.memory_space<vmem>>, vector<1x2x2xf32>
    %296 = vector.shape_cast %295 : vector<1x2x2xf32> to vector<2x2xf32>
    %c1_219 = arith.constant 1 : index
    %c0_220 = arith.constant 0 : index
    %c0_221 = arith.constant 0 : index
    %297 = vector.load %arg27[%c1_219, %c0_220, %c0_221] : memref<9x1x128xf32, #tpu.memory_space<vmem>>, vector<1x1x128xf32>
    %298 = vector.shape_cast %297 : vector<1x1x128xf32> to vector<1x128xf32>
    %299 = vector.broadcast %298 : vector<1x128xf32> to vector<2x128xf32>
    %300 = arith.mulf %287, %299 : vector<2x128xf32>
    %cst_222 = arith.constant dense<0.000000e+00> : vector<2x128xf32>
    %301 = tpu.matmul %296, %300, %cst_222 {dimension_numbers = #tpu.dot_dimension_numbers<[1], [0], [0], [1], [0, 0, 1, 1], [], []>} : vector<2x2xf32>, vector<2x128xf32>, vector<2x128xf32> -> vector<2x128xf32>
    %302 = arith.addf %294, %301 : vector<2x128xf32>
    %c2_223 = arith.constant 2 : index
    %c0_224 = arith.constant 0 : index
    %c0_225 = arith.constant 0 : index
    %303 = vector.load %arg26[%c2_223, %c0_224, %c0_225] : memref<9x2x2xf32, #tpu.memory_space<vmem>>, vector<1x2x2xf32>
    %304 = vector.shape_cast %303 : vector<1x2x2xf32> to vector<2x2xf32>
    %c2_226 = arith.constant 2 : index
    %c0_227 = arith.constant 0 : index
    %c0_228 = arith.constant 0 : index
    %305 = vector.load %arg27[%c2_226, %c0_227, %c0_228] : memref<9x1x128xf32, #tpu.memory_space<vmem>>, vector<1x1x128xf32>
    %306 = vector.shape_cast %305 : vector<1x1x128xf32> to vector<1x128xf32>
    %307 = vector.broadcast %306 : vector<1x128xf32> to vector<2x128xf32>
    %308 = arith.mulf %287, %307 : vector<2x128xf32>
    %cst_229 = arith.constant dense<0.000000e+00> : vector<2x128xf32>
    %309 = tpu.matmul %304, %308, %cst_229 {dimension_numbers = #tpu.dot_dimension_numbers<[1], [0], [0], [1], [0, 0, 1, 1], [], []>} : vector<2x2xf32>, vector<2x128xf32>, vector<2x128xf32> -> vector<2x128xf32>
    %310 = arith.addf %302, %309 : vector<2x128xf32>
    %c3_230 = arith.constant 3 : index
    %c0_231 = arith.constant 0 : index
    %c0_232 = arith.constant 0 : index
    %311 = vector.load %arg26[%c3_230, %c0_231, %c0_232] : memref<9x2x2xf32, #tpu.memory_space<vmem>>, vector<1x2x2xf32>
    %312 = vector.shape_cast %311 : vector<1x2x2xf32> to vector<2x2xf32>
    %c3_233 = arith.constant 3 : index
    %c0_234 = arith.constant 0 : index
    %c0_235 = arith.constant 0 : index
    %313 = vector.load %arg27[%c3_233, %c0_234, %c0_235] : memref<9x1x128xf32, #tpu.memory_space<vmem>>, vector<1x1x128xf32>
    %314 = vector.shape_cast %313 : vector<1x1x128xf32> to vector<1x128xf32>
    %315 = vector.broadcast %314 : vector<1x128xf32> to vector<2x128xf32>
    %316 = arith.mulf %287, %315 : vector<2x128xf32>
    %cst_236 = arith.constant dense<0.000000e+00> : vector<2x128xf32>
    %317 = tpu.matmul %312, %316, %cst_236 {dimension_numbers = #tpu.dot_dimension_numbers<[1], [0], [0], [1], [0, 0, 1, 1], [], []>} : vector<2x2xf32>, vector<2x128xf32>, vector<2x128xf32> -> vector<2x128xf32>
    %318 = arith.addf %310, %317 : vector<2x128xf32>
    %c4_237 = arith.constant 4 : index
    %c0_238 = arith.constant 0 : index
    %c0_239 = arith.constant 0 : index
    %319 = vector.load %arg26[%c4_237, %c0_238, %c0_239] : memref<9x2x2xf32, #tpu.memory_space<vmem>>, vector<1x2x2xf32>
    %320 = vector.shape_cast %319 : vector<1x2x2xf32> to vector<2x2xf32>
    %c4_240 = arith.constant 4 : index
    %c0_241 = arith.constant 0 : index
    %c0_242 = arith.constant 0 : index
    %321 = vector.load %arg27[%c4_240, %c0_241, %c0_242] : memref<9x1x128xf32, #tpu.memory_space<vmem>>, vector<1x1x128xf32>
    %322 = vector.shape_cast %321 : vector<1x1x128xf32> to vector<1x128xf32>
    %323 = vector.broadcast %322 : vector<1x128xf32> to vector<2x128xf32>
    %324 = arith.mulf %287, %323 : vector<2x128xf32>
    %cst_243 = arith.constant dense<0.000000e+00> : vector<2x128xf32>
    %325 = tpu.matmul %320, %324, %cst_243 {dimension_numbers = #tpu.dot_dimension_numbers<[1], [0], [0], [1], [0, 0, 1, 1], [], []>} : vector<2x2xf32>, vector<2x128xf32>, vector<2x128xf32> -> vector<2x128xf32>
    %326 = arith.addf %318, %325 : vector<2x128xf32>
    %c5_244 = arith.constant 5 : index
    %c0_245 = arith.constant 0 : index
    %c0_246 = arith.constant 0 : index
    %327 = vector.load %arg26[%c5_244, %c0_245, %c0_246] : memref<9x2x2xf32, #tpu.memory_space<vmem>>, vector<1x2x2xf32>
    %328 = vector.shape_cast %327 : vector<1x2x2xf32> to vector<2x2xf32>
    %c5_247 = arith.constant 5 : index
    %c0_248 = arith.constant 0 : index
    %c0_249 = arith.constant 0 : index
    %329 = vector.load %arg27[%c5_247, %c0_248, %c0_249] : memref<9x1x128xf32, #tpu.memory_space<vmem>>, vector<1x1x128xf32>
    %330 = vector.shape_cast %329 : vector<1x1x128xf32> to vector<1x128xf32>
    %331 = vector.broadcast %330 : vector<1x128xf32> to vector<2x128xf32>
    %332 = arith.mulf %287, %331 : vector<2x128xf32>
    %cst_250 = arith.constant dense<0.000000e+00> : vector<2x128xf32>
    %333 = tpu.matmul %328, %332, %cst_250 {dimension_numbers = #tpu.dot_dimension_numbers<[1], [0], [0], [1], [0, 0, 1, 1], [], []>} : vector<2x2xf32>, vector<2x128xf32>, vector<2x128xf32> -> vector<2x128xf32>
    %334 = arith.addf %326, %333 : vector<2x128xf32>
    %c6_251 = arith.constant 6 : index
    %c0_252 = arith.constant 0 : index
    %c0_253 = arith.constant 0 : index
    %335 = vector.load %arg26[%c6_251, %c0_252, %c0_253] : memref<9x2x2xf32, #tpu.memory_space<vmem>>, vector<1x2x2xf32>
    %336 = vector.shape_cast %335 : vector<1x2x2xf32> to vector<2x2xf32>
    %c6_254 = arith.constant 6 : index
    %c0_255 = arith.constant 0 : index
    %c0_256 = arith.constant 0 : index
    %337 = vector.load %arg27[%c6_254, %c0_255, %c0_256] : memref<9x1x128xf32, #tpu.memory_space<vmem>>, vector<1x1x128xf32>
    %338 = vector.shape_cast %337 : vector<1x1x128xf32> to vector<1x128xf32>
    %339 = vector.broadcast %338 : vector<1x128xf32> to vector<2x128xf32>
    %340 = arith.mulf %287, %339 : vector<2x128xf32>
    %cst_257 = arith.constant dense<0.000000e+00> : vector<2x128xf32>
    %341 = tpu.matmul %336, %340, %cst_257 {dimension_numbers = #tpu.dot_dimension_numbers<[1], [0], [0], [1], [0, 0, 1, 1], [], []>} : vector<2x2xf32>, vector<2x128xf32>, vector<2x128xf32> -> vector<2x128xf32>
    %342 = arith.addf %334, %341 : vector<2x128xf32>
    %c7_258 = arith.constant 7 : index
    %c0_259 = arith.constant 0 : index
    %c0_260 = arith.constant 0 : index
    %343 = vector.load %arg26[%c7_258, %c0_259, %c0_260] : memref<9x2x2xf32, #tpu.memory_space<vmem>>, vector<1x2x2xf32>
    %344 = vector.shape_cast %343 : vector<1x2x2xf32> to vector<2x2xf32>
    %c7_261 = arith.constant 7 : index
    %c0_262 = arith.constant 0 : index
    %c0_263 = arith.constant 0 : index
    %345 = vector.load %arg27[%c7_261, %c0_262, %c0_263] : memref<9x1x128xf32, #tpu.memory_space<vmem>>, vector<1x1x128xf32>
    %346 = vector.shape_cast %345 : vector<1x1x128xf32> to vector<1x128xf32>
    %347 = vector.broadcast %346 : vector<1x128xf32> to vector<2x128xf32>
    %348 = arith.mulf %287, %347 : vector<2x128xf32>
    %cst_264 = arith.constant dense<0.000000e+00> : vector<2x128xf32>
    %349 = tpu.matmul %344, %348, %cst_264 {dimension_numbers = #tpu.dot_dimension_numbers<[1], [0], [0], [1], [0, 0, 1, 1], [], []>} : vector<2x2xf32>, vector<2x128xf32>, vector<2x128xf32> -> vector<2x128xf32>
    %350 = arith.addf %342, %349 : vector<2x128xf32>
    %c8_265 = arith.constant 8 : index
    %c0_266 = arith.constant 0 : index
    %c0_267 = arith.constant 0 : index
    %351 = vector.load %arg26[%c8_265, %c0_266, %c0_267] : memref<9x2x2xf32, #tpu.memory_space<vmem>>, vector<1x2x2xf32>
    %352 = vector.shape_cast %351 : vector<1x2x2xf32> to vector<2x2xf32>
    %c8_268 = arith.constant 8 : index
    %c0_269 = arith.constant 0 : index
    %c0_270 = arith.constant 0 : index
    %353 = vector.load %arg27[%c8_268, %c0_269, %c0_270] : memref<9x1x128xf32, #tpu.memory_space<vmem>>, vector<1x1x128xf32>
    %354 = vector.shape_cast %353 : vector<1x1x128xf32> to vector<1x128xf32>
    %355 = vector.broadcast %354 : vector<1x128xf32> to vector<2x128xf32>
    %356 = arith.mulf %287, %355 : vector<2x128xf32>
    %cst_271 = arith.constant dense<0.000000e+00> : vector<2x128xf32>
    %357 = tpu.matmul %352, %356, %cst_271 {dimension_numbers = #tpu.dot_dimension_numbers<[1], [0], [0], [1], [0, 0, 1, 1], [], []>} : vector<2x2xf32>, vector<2x128xf32>, vector<2x128xf32> -> vector<2x128xf32>
    %358 = arith.addf %350, %357 : vector<2x128xf32>
    %c0_272 = arith.constant 0 : index
    %c0_273 = arith.constant 0 : index
    %359 = vector.load %arg28[%c0_272, %c0_273] : memref<1x128xf32, #tpu.memory_space<vmem>>, vector<1x128xf32>
    %360 = vector.broadcast %359 : vector<1x128xf32> to vector<2x128xf32>
    %361 = arith.addf %358, %360 : vector<2x128xf32>
    %362 = arith.addf %287, %361 : vector<2x128xf32>
    %cst_274 = arith.constant dense<0.000000e+00> : vector<2xf32>
    %363 = vector.multi_reduction <add>, %362, %cst_274 [1] : vector<2x128xf32> to vector<2xf32>
    %364 = vector.shape_cast %363 : vector<2xf32> to vector<2x1xf32>
    %cst_275 = arith.constant 7.812500e-03 : f32
    %365 = vector.broadcast %cst_275 : f32 to vector<2x1xf32>
    %366 = arith.mulf %364, %365 : vector<2x1xf32>
    %367 = arith.mulf %362, %362 : vector<2x128xf32>
    %cst_276 = arith.constant dense<0.000000e+00> : vector<2xf32>
    %368 = vector.multi_reduction <add>, %367, %cst_276 [1] : vector<2x128xf32> to vector<2xf32>
    %369 = vector.shape_cast %368 : vector<2xf32> to vector<2x1xf32>
    %cst_277 = arith.constant 7.812500e-03 : f32
    %370 = vector.broadcast %cst_277 : f32 to vector<2x1xf32>
    %371 = arith.mulf %369, %370 : vector<2x1xf32>
    %372 = arith.mulf %366, %366 : vector<2x1xf32>
    %373 = arith.subf %371, %372 : vector<2x1xf32>
    %cst_278 = arith.constant 0.000000e+00 : f32
    %374 = vector.broadcast %cst_278 : f32 to vector<2x1xf32>
    %375 = arith.maximumf %373, %374 : vector<2x1xf32>
    %376 = vector.broadcast %366 : vector<2x1xf32> to vector<2x128xf32>
    %377 = arith.subf %362, %376 : vector<2x128xf32>
    %cst_279 = arith.constant 9.99999974E-6 : f32
    %378 = vector.broadcast %cst_279 : f32 to vector<2x1xf32>
    %379 = arith.addf %375, %378 : vector<2x1xf32>
    %380 = math.rsqrt %379 : vector<2x1xf32>
    %381 = vector.broadcast %380 : vector<2x1xf32> to vector<2x128xf32>
    %382 = arith.mulf %377, %381 : vector<2x128xf32>
    %c0_280 = arith.constant 0 : index
    %c0_281 = arith.constant 0 : index
    %383 = vector.load %arg29[%c0_280, %c0_281] : memref<1x128xf32, #tpu.memory_space<vmem>>, vector<1x128xf32>
    %384 = vector.broadcast %383 : vector<1x128xf32> to vector<2x128xf32>
    %385 = arith.mulf %382, %384 : vector<2x128xf32>
    %c0_282 = arith.constant 0 : index
    %c0_283 = arith.constant 0 : index
    %386 = vector.load %arg30[%c0_282, %c0_283] : memref<1x128xf32, #tpu.memory_space<vmem>>, vector<1x128xf32>
    %387 = vector.broadcast %386 : vector<1x128xf32> to vector<2x128xf32>
    %388 = arith.addf %385, %387 : vector<2x128xf32>
    %c0_284 = arith.constant 0 : index
    %c0_285 = arith.constant 0 : index
    %389 = vector.load %arg31[%c0_284, %c0_285] : memref<128x384xbf16, #tpu.memory_space<vmem>>, vector<128x384xbf16>
    %390 = arith.truncf %388 : vector<2x128xf32> to vector<2x128xbf16>
    %cst_286 = arith.constant dense<0.000000e+00> : vector<2x384xf32>
    %391 = tpu.matmul %390, %389, %cst_286 {dimension_numbers = #tpu.dot_dimension_numbers<[1], [0], [0], [1], [0, 0, 1, 1], [], []>} : vector<2x128xbf16>, vector<128x384xbf16>, vector<2x384xf32> -> vector<2x384xf32>
    %c0_287 = arith.constant 0 : index
    %c0_288 = arith.constant 0 : index
    %392 = vector.load %arg32[%c0_287, %c0_288] : memref<1x384xf32, #tpu.memory_space<vmem>>, vector<1x384xf32>
    %393 = vector.broadcast %392 : vector<1x384xf32> to vector<2x384xf32>
    %394 = arith.addf %391, %393 : vector<2x384xf32>
    %c0_289 = arith.constant 0 : index
    %c0_290 = arith.constant 0 : index
    %395 = vector.load %arg33[%c0_289, %c0_290] : memref<128x128xbf16, #tpu.memory_space<vmem>>, vector<128x128xbf16>
    %396 = vector.extract_strided_slice %394 {offsets = [0, 0], sizes = [2, 64], strides = [1, 1]} : vector<2x384xf32> to vector<2x64xf32>
    %397 = vector.extract_strided_slice %394 {offsets = [0, 128], sizes = [2, 64], strides = [1, 1]} : vector<2x384xf32> to vector<2x64xf32>
    %398 = vector.extract_strided_slice %394 {offsets = [0, 256], sizes = [2, 64], strides = [1, 1]} : vector<2x384xf32> to vector<2x64xf32>
    %cst_291 = arith.constant dense<0.000000e+00> : vector<2x2xf32>
    %399 = tpu.matmul %396, %397, %cst_291 {dimension_numbers = #tpu.dot_dimension_numbers<[1], [1], [0], [0], [0, 0, 1, 0], [], []>} : vector<2x64xf32>, vector<2x64xf32>, vector<2x2xf32> -> vector<2x2xf32>
    %cst_292 = arith.constant dense<0xFF800000> : vector<2xf32>
    %400 = vector.multi_reduction <maximumf>, %399, %cst_292 [1] : vector<2x2xf32> to vector<2xf32>
    %401 = vector.shape_cast %400 : vector<2xf32> to vector<2x1xf32>
    %402 = vector.broadcast %401 : vector<2x1xf32> to vector<2x2xf32>
    %403 = arith.subf %399, %402 : vector<2x2xf32>
    %404 = math.exp %403 : vector<2x2xf32>
    %cst_293 = arith.constant dense<0.000000e+00> : vector<2xf32>
    %405 = vector.multi_reduction <add>, %404, %cst_293 [1] : vector<2x2xf32> to vector<2xf32>
    %406 = vector.shape_cast %405 : vector<2xf32> to vector<2x1xf32>
    %407 = tpu.reciprocal %406 {approx = true} : vector<2x1xf32> -> vector<2x1xf32>
    %408 = vector.broadcast %407 : vector<2x1xf32> to vector<2x2xf32>
    %409 = arith.mulf %404, %408 : vector<2x2xf32>
    %cst_294 = arith.constant dense<0.000000e+00> : vector<2x64xf32>
    %410 = tpu.matmul %409, %398, %cst_294 {dimension_numbers = #tpu.dot_dimension_numbers<[1], [0], [0], [1], [0, 0, 1, 1], [], []>} : vector<2x2xf32>, vector<2x64xf32>, vector<2x64xf32> -> vector<2x64xf32>
    %411 = vector.extract_strided_slice %395 {offsets = [0, 0], sizes = [64, 128], strides = [1, 1]} : vector<128x128xbf16> to vector<64x128xbf16>
    %412 = arith.truncf %410 : vector<2x64xf32> to vector<2x64xbf16>
    %cst_295 = arith.constant dense<0.000000e+00> : vector<2x128xf32>
    %413 = tpu.matmul %412, %411, %cst_295 {dimension_numbers = #tpu.dot_dimension_numbers<[1], [0], [0], [1], [0, 0, 1, 1], [], []>} : vector<2x64xbf16>, vector<64x128xbf16>, vector<2x128xf32> -> vector<2x128xf32>
    %414 = vector.extract_strided_slice %394 {offsets = [0, 64], sizes = [2, 64], strides = [1, 1]} : vector<2x384xf32> to vector<2x64xf32>
    %415 = vector.extract_strided_slice %394 {offsets = [0, 192], sizes = [2, 64], strides = [1, 1]} : vector<2x384xf32> to vector<2x64xf32>
    %416 = vector.extract_strided_slice %394 {offsets = [0, 320], sizes = [2, 64], strides = [1, 1]} : vector<2x384xf32> to vector<2x64xf32>
    %cst_296 = arith.constant dense<0.000000e+00> : vector<2x2xf32>
    %417 = tpu.matmul %414, %415, %cst_296 {dimension_numbers = #tpu.dot_dimension_numbers<[1], [1], [0], [0], [0, 0, 1, 0], [], []>} : vector<2x64xf32>, vector<2x64xf32>, vector<2x2xf32> -> vector<2x2xf32>
    %cst_297 = arith.constant dense<0xFF800000> : vector<2xf32>
    %418 = vector.multi_reduction <maximumf>, %417, %cst_297 [1] : vector<2x2xf32> to vector<2xf32>
    %419 = vector.shape_cast %418 : vector<2xf32> to vector<2x1xf32>
    %420 = vector.broadcast %419 : vector<2x1xf32> to vector<2x2xf32>
    %421 = arith.subf %417, %420 : vector<2x2xf32>
    %422 = math.exp %421 : vector<2x2xf32>
    %cst_298 = arith.constant dense<0.000000e+00> : vector<2xf32>
    %423 = vector.multi_reduction <add>, %422, %cst_298 [1] : vector<2x2xf32> to vector<2xf32>
    %424 = vector.shape_cast %423 : vector<2xf32> to vector<2x1xf32>
    %425 = tpu.reciprocal %424 {approx = true} : vector<2x1xf32> -> vector<2x1xf32>
    %426 = vector.broadcast %425 : vector<2x1xf32> to vector<2x2xf32>
    %427 = arith.mulf %422, %426 : vector<2x2xf32>
    %cst_299 = arith.constant dense<0.000000e+00> : vector<2x64xf32>
    %428 = tpu.matmul %427, %416, %cst_299 {dimension_numbers = #tpu.dot_dimension_numbers<[1], [0], [0], [1], [0, 0, 1, 1], [], []>} : vector<2x2xf32>, vector<2x64xf32>, vector<2x64xf32> -> vector<2x64xf32>
    %429 = vector.extract_strided_slice %395 {offsets = [64, 0], sizes = [64, 128], strides = [1, 1]} : vector<128x128xbf16> to vector<64x128xbf16>
    %430 = arith.truncf %428 : vector<2x64xf32> to vector<2x64xbf16>
    %cst_300 = arith.constant dense<0.000000e+00> : vector<2x128xf32>
    %431 = tpu.matmul %430, %429, %cst_300 {dimension_numbers = #tpu.dot_dimension_numbers<[1], [0], [0], [1], [0, 0, 1, 1], [], []>} : vector<2x64xbf16>, vector<64x128xbf16>, vector<2x128xf32> -> vector<2x128xf32>
    %432 = arith.addf %413, %431 : vector<2x128xf32>
    %433 = arith.addf %362, %432 : vector<2x128xf32>
    %c0_301 = arith.constant 0 : index
    %c0_302 = arith.constant 0 : index
    %434 = vector.load %arg34[%c0_301, %c0_302] : memref<1x128xf32, #tpu.memory_space<vmem>>, vector<1x128xf32>
    %435 = vector.broadcast %434 : vector<1x128xf32> to vector<2x128xf32>
    %436 = arith.addf %433, %435 : vector<2x128xf32>
    %cst_303 = arith.constant dense<0.000000e+00> : vector<2xf32>
    %437 = vector.multi_reduction <add>, %436, %cst_303 [1] : vector<2x128xf32> to vector<2xf32>
    %438 = vector.shape_cast %437 : vector<2xf32> to vector<2x1xf32>
    %cst_304 = arith.constant 7.812500e-03 : f32
    %439 = vector.broadcast %cst_304 : f32 to vector<2x1xf32>
    %440 = arith.mulf %438, %439 : vector<2x1xf32>
    %441 = arith.mulf %436, %436 : vector<2x128xf32>
    %cst_305 = arith.constant dense<0.000000e+00> : vector<2xf32>
    %442 = vector.multi_reduction <add>, %441, %cst_305 [1] : vector<2x128xf32> to vector<2xf32>
    %443 = vector.shape_cast %442 : vector<2xf32> to vector<2x1xf32>
    %cst_306 = arith.constant 7.812500e-03 : f32
    %444 = vector.broadcast %cst_306 : f32 to vector<2x1xf32>
    %445 = arith.mulf %443, %444 : vector<2x1xf32>
    %446 = arith.mulf %440, %440 : vector<2x1xf32>
    %447 = arith.subf %445, %446 : vector<2x1xf32>
    %cst_307 = arith.constant 0.000000e+00 : f32
    %448 = vector.broadcast %cst_307 : f32 to vector<2x1xf32>
    %449 = arith.maximumf %447, %448 : vector<2x1xf32>
    %450 = vector.broadcast %440 : vector<2x1xf32> to vector<2x128xf32>
    %451 = arith.subf %436, %450 : vector<2x128xf32>
    %cst_308 = arith.constant 9.99999974E-6 : f32
    %452 = vector.broadcast %cst_308 : f32 to vector<2x1xf32>
    %453 = arith.addf %449, %452 : vector<2x1xf32>
    %454 = math.rsqrt %453 : vector<2x1xf32>
    %455 = vector.broadcast %454 : vector<2x1xf32> to vector<2x128xf32>
    %456 = arith.mulf %451, %455 : vector<2x128xf32>
    %c0_309 = arith.constant 0 : index
    %c0_310 = arith.constant 0 : index
    %457 = vector.load %arg35[%c0_309, %c0_310] : memref<1x128xf32, #tpu.memory_space<vmem>>, vector<1x128xf32>
    %458 = vector.broadcast %457 : vector<1x128xf32> to vector<2x128xf32>
    %459 = arith.mulf %456, %458 : vector<2x128xf32>
    %c0_311 = arith.constant 0 : index
    %c0_312 = arith.constant 0 : index
    %460 = vector.load %arg36[%c0_311, %c0_312] : memref<1x128xf32, #tpu.memory_space<vmem>>, vector<1x128xf32>
    %461 = vector.broadcast %460 : vector<1x128xf32> to vector<2x128xf32>
    %462 = arith.addf %459, %461 : vector<2x128xf32>
    %c0_313 = arith.constant 0 : index
    %c0_314 = arith.constant 0 : index
    %463 = vector.load %arg37[%c0_313, %c0_314] : memref<128x128xbf16, #tpu.memory_space<vmem>>, vector<128x128xbf16>
    %464 = arith.truncf %462 : vector<2x128xf32> to vector<2x128xbf16>
    %cst_315 = arith.constant dense<0.000000e+00> : vector<2x128xf32>
    %465 = tpu.matmul %464, %463, %cst_315 {dimension_numbers = #tpu.dot_dimension_numbers<[1], [0], [0], [1], [0, 0, 1, 1], [], []>} : vector<2x128xbf16>, vector<128x128xbf16>, vector<2x128xf32> -> vector<2x128xf32>
    %c0_316 = arith.constant 0 : index
    %c0_317 = arith.constant 0 : index
    %466 = vector.load %arg38[%c0_316, %c0_317] : memref<1x128xf32, #tpu.memory_space<vmem>>, vector<1x128xf32>
    %467 = vector.broadcast %466 : vector<1x128xf32> to vector<2x128xf32>
    %468 = arith.addf %465, %467 : vector<2x128xf32>
    %469 = arith.mulf %468, %468 : vector<2x128xf32>
    %470 = arith.mulf %468, %469 : vector<2x128xf32>
    %cst_318 = arith.constant 4.471500e-02 : f32
    %471 = vector.broadcast %cst_318 : f32 to vector<2x128xf32>
    %472 = arith.mulf %471, %470 : vector<2x128xf32>
    %473 = arith.addf %468, %472 : vector<2x128xf32>
    %cst_319 = arith.constant 0.797884583 : f32
    %474 = vector.broadcast %cst_319 : f32 to vector<2x128xf32>
    %475 = arith.mulf %474, %473 : vector<2x128xf32>
    %476 = math.tanh %475 : vector<2x128xf32>
    %cst_320 = arith.constant 1.000000e+00 : f32
    %477 = vector.broadcast %cst_320 : f32 to vector<2x128xf32>
    %478 = arith.addf %477, %476 : vector<2x128xf32>
    %cst_321 = arith.constant 5.000000e-01 : f32
    %479 = vector.broadcast %cst_321 : f32 to vector<2x128xf32>
    %480 = arith.mulf %479, %478 : vector<2x128xf32>
    %481 = arith.mulf %468, %480 : vector<2x128xf32>
    %c0_322 = arith.constant 0 : index
    %c0_323 = arith.constant 0 : index
    %482 = vector.load %arg39[%c0_322, %c0_323] : memref<128x128xbf16, #tpu.memory_space<vmem>>, vector<128x128xbf16>
    %483 = arith.truncf %481 : vector<2x128xf32> to vector<2x128xbf16>
    %cst_324 = arith.constant dense<0.000000e+00> : vector<2x128xf32>
    %484 = tpu.matmul %483, %482, %cst_324 {dimension_numbers = #tpu.dot_dimension_numbers<[1], [0], [0], [1], [0, 0, 1, 1], [], []>} : vector<2x128xbf16>, vector<128x128xbf16>, vector<2x128xf32> -> vector<2x128xf32>
    %485 = arith.addf %436, %484 : vector<2x128xf32>
    %c0_325 = arith.constant 0 : index
    %c0_326 = arith.constant 0 : index
    %486 = vector.load %arg40[%c0_325, %c0_326] : memref<1x128xf32, #tpu.memory_space<vmem>>, vector<1x128xf32>
    %487 = vector.broadcast %486 : vector<1x128xf32> to vector<2x128xf32>
    %488 = arith.addf %485, %487 : vector<2x128xf32>
    %cst_327 = arith.constant dense<0.000000e+00> : vector<128xf32>
    %489 = vector.multi_reduction <add>, %488, %cst_327 [0] : vector<2x128xf32> to vector<128xf32>
    %490 = vector.shape_cast %489 : vector<128xf32> to vector<1x128xf32>
    %cst_328 = arith.constant 2.000000e+00 : f32
    %491 = vector.broadcast %cst_328 : f32 to vector<1x128xf32>
    %492 = arith.divf %490, %491 : vector<1x128xf32>
    %c0_329 = arith.constant 0 : index
    %c0_330 = arith.constant 0 : index
    %493 = vector.load %arg41[%c0_329, %c0_330] : memref<128x128xbf16, #tpu.memory_space<vmem>>, vector<128x128xbf16>
    %494 = arith.truncf %492 : vector<1x128xf32> to vector<1x128xbf16>
    %cst_331 = arith.constant dense<0.000000e+00> : vector<1x128xf32>
    %495 = tpu.matmul %494, %493, %cst_331 {dimension_numbers = #tpu.dot_dimension_numbers<[1], [0], [0], [1], [0, 0, 1, 1], [], []>} : vector<1x128xbf16>, vector<128x128xbf16>, vector<1x128xf32> -> vector<1x128xf32>
    %c0_332 = arith.constant 0 : index
    %c0_333 = arith.constant 0 : index
    %496 = vector.load %arg42[%c0_332, %c0_333] : memref<1x128xf32, #tpu.memory_space<vmem>>, vector<1x128xf32>
    %497 = arith.addf %495, %496 : vector<1x128xf32>
    %c0_334 = arith.constant 0 : index
    %c0_335 = arith.constant 0 : index
    %c0_336 = arith.constant 0 : index
    %498 = vector.load %arg43[%c0_334, %c0_335, %c0_336] : memref<1x1x128xf32, #tpu.memory_space<vmem>>, vector<1x1x128xf32>
    %499 = vector.shape_cast %498 : vector<1x1x128xf32> to vector<1x128xf32>
    %500 = vector.shape_cast %497 : vector<1x128xf32> to vector<1x1x128xf32>
    tpu.vector_store %arg43[%c0_334, %c0_335, %c0_336], %500 {strides = array<i32>} : memref<1x1x128xf32, #tpu.memory_space<vmem>>, vector<1x1x128xf32>,
    return
  }
  func.func @transform_0(%arg0: i32) -> (i32, i32, i32) {
    %c0_i32 = arith.constant 0 : i32
    %c0_i32_0 = arith.constant 0 : i32
    %c0_i32_1 = arith.constant 0 : i32
    return %arg0, %c0_i32, %c0_i32_0 : i32, i32, i32
  }
  func.func @transform_1(%arg0: i32) -> (i32, i32) {
    %c0_i32 = arith.constant 0 : i32
    %c0_i32_0 = arith.constant 0 : i32
    %c0_i32_1 = arith.constant 0 : i32
    return %c0_i32, %c0_i32_0 : i32, i32
  }
  func.func @transform_2(%arg0: i32) -> (i32, i32) {
    %c0_i32 = arith.constant 0 : i32
    %c0_i32_0 = arith.constant 0 : i32
    %c0_i32_1 = arith.constant 0 : i32
    return %c0_i32, %c0_i32_0 : i32, i32
  }
  func.func @transform_3(%arg0: i32) -> (i32, i32) {
    %c0_i32 = arith.constant 0 : i32
    %c0_i32_0 = arith.constant 0 : i32
    %c0_i32_1 = arith.constant 0 : i32
    return %c0_i32, %c0_i32_0 : i32, i32
  }
  func.func @transform_4(%arg0: i32) -> (i32, i32) {
    %c0_i32 = arith.constant 0 : i32
    %c0_i32_0 = arith.constant 0 : i32
    %c0_i32_1 = arith.constant 0 : i32
    return %c0_i32, %c0_i32_0 : i32, i32
  }
  func.func @transform_5(%arg0: i32) -> (i32, i32, i32) {
    %c0_i32 = arith.constant 0 : i32
    %c0_i32_0 = arith.constant 0 : i32
    %c0_i32_1 = arith.constant 0 : i32
    %c0_i32_2 = arith.constant 0 : i32
    return %c0_i32, %c0_i32_0, %c0_i32_1 : i32, i32, i32
  }
  func.func @transform_6(%arg0: i32) -> (i32, i32, i32) {
    %c0_i32 = arith.constant 0 : i32
    %c0_i32_0 = arith.constant 0 : i32
    %c0_i32_1 = arith.constant 0 : i32
    %c0_i32_2 = arith.constant 0 : i32
    return %c0_i32, %c0_i32_0, %c0_i32_1 : i32, i32, i32
  }
  func.func @transform_7(%arg0: i32) -> (i32, i32) {
    %c0_i32 = arith.constant 0 : i32
    %c0_i32_0 = arith.constant 0 : i32
    %c0_i32_1 = arith.constant 0 : i32
    return %c0_i32, %c0_i32_0 : i32, i32
  }
  func.func @transform_8(%arg0: i32) -> (i32, i32) {
    %c0_i32 = arith.constant 0 : i32
    %c0_i32_0 = arith.constant 0 : i32
    %c0_i32_1 = arith.constant 0 : i32
    return %c0_i32, %c0_i32_0 : i32, i32
  }
  func.func @transform_9(%arg0: i32) -> (i32, i32) {
    %c0_i32 = arith.constant 0 : i32
    %c0_i32_0 = arith.constant 0 : i32
    %c0_i32_1 = arith.constant 0 : i32
    return %c0_i32, %c0_i32_0 : i32, i32
  }
  func.func @transform_10(%arg0: i32) -> (i32, i32) {
    %c0_i32 = arith.constant 0 : i32
    %c0_i32_0 = arith.constant 0 : i32
    %c0_i32_1 = arith.constant 0 : i32
    return %c0_i32, %c0_i32_0 : i32, i32
  }
  func.func @transform_11(%arg0: i32) -> (i32, i32) {
    %c0_i32 = arith.constant 0 : i32
    %c0_i32_0 = arith.constant 0 : i32
    %c0_i32_1 = arith.constant 0 : i32
    return %c0_i32, %c0_i32_0 : i32, i32
  }
  func.func @transform_12(%arg0: i32) -> (i32, i32, i32) {
    %c0_i32 = arith.constant 0 : i32
    %c0_i32_0 = arith.constant 0 : i32
    %c0_i32_1 = arith.constant 0 : i32
    %c0_i32_2 = arith.constant 0 : i32
    return %c0_i32, %c0_i32_0, %c0_i32_1 : i32, i32, i32
  }
  func.func @transform_13(%arg0: i32) -> (i32, i32) {
    %c0_i32 = arith.constant 0 : i32
    %c0_i32_0 = arith.constant 0 : i32
    %c0_i32_1 = arith.constant 0 : i32
    return %c0_i32, %c0_i32_0 : i32, i32
  }
  func.func @transform_14(%arg0: i32) -> (i32, i32) {
    %c0_i32 = arith.constant 0 : i32
    %c0_i32_0 = arith.constant 0 : i32
    %c0_i32_1 = arith.constant 0 : i32
    return %c0_i32, %c0_i32_0 : i32, i32
  }
  func.func @transform_15(%arg0: i32) -> (i32, i32) {
    %c0_i32 = arith.constant 0 : i32
    %c0_i32_0 = arith.constant 0 : i32
    %c0_i32_1 = arith.constant 0 : i32
    return %c0_i32, %c0_i32_0 : i32, i32
  }
  func.func @transform_16(%arg0: i32) -> (i32, i32) {
    %c0_i32 = arith.constant 0 : i32
    %c0_i32_0 = arith.constant 0 : i32
    %c0_i32_1 = arith.constant 0 : i32
    return %c0_i32, %c0_i32_0 : i32, i32
  }
  func.func @transform_17(%arg0: i32) -> (i32, i32) {
    %c0_i32 = arith.constant 0 : i32
    %c0_i32_0 = arith.constant 0 : i32
    %c0_i32_1 = arith.constant 0 : i32
    return %c0_i32, %c0_i32_0 : i32, i32
  }
  func.func @transform_18(%arg0: i32) -> (i32, i32) {
    %c0_i32 = arith.constant 0 : i32
    %c0_i32_0 = arith.constant 0 : i32
    %c0_i32_1 = arith.constant 0 : i32
    return %c0_i32, %c0_i32_0 : i32, i32
  }
  func.func @transform_19(%arg0: i32) -> (i32, i32) {
    %c0_i32 = arith.constant 0 : i32
    %c0_i32_0 = arith.constant 0 : i32
    %c0_i32_1 = arith.constant 0 : i32
    return %c0_i32, %c0_i32_0 : i32, i32
  }
  func.func @transform_20(%arg0: i32) -> (i32, i32, i32) {
    %c0_i32 = arith.constant 0 : i32
    %c0_i32_0 = arith.constant 0 : i32
    %c0_i32_1 = arith.constant 0 : i32
    %c0_i32_2 = arith.constant 0 : i32
    return %c0_i32, %c0_i32_0, %c0_i32_1 : i32, i32, i32
  }
  func.func @transform_21(%arg0: i32) -> (i32, i32, i32) {
    %c0_i32 = arith.constant 0 : i32
    %c0_i32_0 = arith.constant 0 : i32
    %c0_i32_1 = arith.constant 0 : i32
    %c0_i32_2 = arith.constant 0 : i32
    return %c0_i32, %c0_i32_0, %c0_i32_1 : i32, i32, i32
  }
  func.func @transform_22(%arg0: i32) -> (i32, i32) {
    %c0_i32 = arith.constant 0 : i32
    %c0_i32_0 = arith.constant 0 : i32
    %c0_i32_1 = arith.constant 0 : i32
    return %c0_i32, %c0_i32_0 : i32, i32
  }
  func.func @transform_23(%arg0: i32) -> (i32, i32) {
    %c0_i32 = arith.constant 0 : i32
    %c0_i32_0 = arith.constant 0 : i32
    %c0_i32_1 = arith.constant 0 : i32
    return %c0_i32, %c0_i32_0 : i32, i32
  }
  func.func @transform_24(%arg0: i32) -> (i32, i32) {
    %c0_i32 = arith.constant 0 : i32
    %c0_i32_0 = arith.constant 0 : i32
    %c0_i32_1 = arith.constant 0 : i32
    return %c0_i32, %c0_i32_0 : i32, i32
  }
  func.func @transform_25(%arg0: i32) -> (i32, i32, i32) {
    %c0_i32 = arith.constant 0 : i32
    %c0_i32_0 = arith.constant 0 : i32
    %c0_i32_1 = arith.constant 0 : i32
    %c0_i32_2 = arith.constant 0 : i32
    return %c0_i32, %c0_i32_0, %c0_i32_1 : i32, i32, i32
  }
  func.func @transform_26(%arg0: i32) -> (i32, i32, i32) {
    %c0_i32 = arith.constant 0 : i32
    %c0_i32_0 = arith.constant 0 : i32
    %c0_i32_1 = arith.constant 0 : i32
    %c0_i32_2 = arith.constant 0 : i32
    return %c0_i32, %c0_i32_0, %c0_i32_1 : i32, i32, i32
  }
  func.func @transform_27(%arg0: i32) -> (i32, i32) {
    %c0_i32 = arith.constant 0 : i32
    %c0_i32_0 = arith.constant 0 : i32
    %c0_i32_1 = arith.constant 0 : i32
    return %c0_i32, %c0_i32_0 : i32, i32
  }
  func.func @transform_28(%arg0: i32) -> (i32, i32) {
    %c0_i32 = arith.constant 0 : i32
    %c0_i32_0 = arith.constant 0 : i32
    %c0_i32_1 = arith.constant 0 : i32
    return %c0_i32, %c0_i32_0 : i32, i32
  }
  func.func @transform_29(%arg0: i32) -> (i32, i32) {
    %c0_i32 = arith.constant 0 : i32
    %c0_i32_0 = arith.constant 0 : i32
    %c0_i32_1 = arith.constant 0 : i32
    return %c0_i32, %c0_i32_0 : i32, i32
  }
  func.func @transform_30(%arg0: i32) -> (i32, i32) {
    %c0_i32 = arith.constant 0 : i32
    %c0_i32_0 = arith.constant 0 : i32
    %c0_i32_1 = arith.constant 0 : i32
    return %c0_i32, %c0_i32_0 : i32, i32
  }
  func.func @transform_31(%arg0: i32) -> (i32, i32) {
    %c0_i32 = arith.constant 0 : i32
    %c0_i32_0 = arith.constant 0 : i32
    %c0_i32_1 = arith.constant 0 : i32
    return %c0_i32, %c0_i32_0 : i32, i32
  }
  func.func @transform_32(%arg0: i32) -> (i32, i32) {
    %c0_i32 = arith.constant 0 : i32
    %c0_i32_0 = arith.constant 0 : i32
    %c0_i32_1 = arith.constant 0 : i32
    return %c0_i32, %c0_i32_0 : i32, i32
  }
  func.func @transform_33(%arg0: i32) -> (i32, i32) {
    %c0_i32 = arith.constant 0 : i32
    %c0_i32_0 = arith.constant 0 : i32
    %c0_i32_1 = arith.constant 0 : i32
    return %c0_i32, %c0_i32_0 : i32, i32
  }
  func.func @transform_34(%arg0: i32) -> (i32, i32) {
    %c0_i32 = arith.constant 0 : i32
    %c0_i32_0 = arith.constant 0 : i32
    %c0_i32_1 = arith.constant 0 : i32
    return %c0_i32, %c0_i32_0 : i32, i32
  }
  func.func @transform_35(%arg0: i32) -> (i32, i32) {
    %c0_i32 = arith.constant 0 : i32
    %c0_i32_0 = arith.constant 0 : i32
    %c0_i32_1 = arith.constant 0 : i32
    return %c0_i32, %c0_i32_0 : i32, i32
  }
  func.func @transform_36(%arg0: i32) -> (i32, i32) {
    %c0_i32 = arith.constant 0 : i32
    %c0_i32_0 = arith.constant 0 : i32
    %c0_i32_1 = arith.constant 0 : i32
    return %c0_i32, %c0_i32_0 : i32, i32
  }
  func.func @transform_37(%arg0: i32) -> (i32, i32) {
    %c0_i32 = arith.constant 0 : i32
    %c0_i32_0 = arith.constant 0 : i32
    %c0_i32_1 = arith.constant 0 : i32
    return %c0_i32, %c0_i32_0 : i32, i32
  }
  func.func @transform_38(%arg0: i32) -> (i32, i32) {
    %c0_i32 = arith.constant 0 : i32
    %c0_i32_0 = arith.constant 0 : i32
    %c0_i32_1 = arith.constant 0 : i32
    return %c0_i32, %c0_i32_0 : i32, i32
  }
  func.func @transform_39(%arg0: i32) -> (i32, i32) {
    %c0_i32 = arith.constant 0 : i32
    %c0_i32_0 = arith.constant 0 : i32
    %c0_i32_1 = arith.constant 0 : i32
    return %c0_i32, %c0_i32_0 : i32, i32
  }
  func.func @transform_40(%arg0: i32) -> (i32, i32) {
    %c0_i32 = arith.constant 0 : i32
    %c0_i32_0 = arith.constant 0 : i32
    %c0_i32_1 = arith.constant 0 : i32
    return %c0_i32, %c0_i32_0 : i32, i32
  }
  func.func @transform_41(%arg0: i32) -> (i32, i32) {
    %c0_i32 = arith.constant 0 : i32
    %c0_i32_0 = arith.constant 0 : i32
    %c0_i32_1 = arith.constant 0 : i32
    return %c0_i32, %c0_i32_0 : i32, i32
  }
  func.func @transform_42(%arg0: i32) -> (i32, i32, i32) {
    %c0_i32 = arith.constant 0 : i32
    %c0_i32_0 = arith.constant 0 : i32
    %c0_i32_1 = arith.constant 0 : i32
    return %arg0, %c0_i32, %c0_i32_0 : i32, i32, i32
  }
}

</mosaic_0001>

<bundles_post_ra>
// kernel: uniformer_forward.1
= control target key start
LH: loop header
LB: loop body
LE: loop exit
PB: predicated region body
PF: predicated region fallthrough
CT: control target
= control target key end

     0   :  { %s8913_s6 = smov 1   ;;  %s8914_s10 = smov 2   ;;  %s10054_s0 = inlined_call_operand.smem [shape: u32[43], index: -1, kind: input, shape index: {}] }
   0x1   :  { %s8995_s5 = sld [smem:[%s10054_s0]]   ;;  %s8915_s14 = smov 3  }
   0x2   :  { %s9000_s9 = sld [smem:[%s10054_s0 + %s8913_s6]]   ;;  %s8916_s18 = smov 4  }
   0x3   :  { %s9005_s13 = sld [smem:[%s10054_s0 + %s8914_s10]]   ;;  %s8917_s22 = smov 5  }
   0x4   :  { %s9010_s17 = sld [smem:[%s10054_s0 + %s8915_s14]]   ;;  %s8918_s26 = smov 6  }
   0x5   :  { %s9015_s21 = sld [smem:[%s10054_s0 + %s8916_s18]]   ;;  %s8919_s30 = smov 7  }
   0x6   :  { %s9020_s25 = sld [smem:[%s10054_s0 + %s8917_s22]]   ;;  %s8920_s4 = smov 8  }
   0x7   :  { %10085 = sst [smem:[#allocation56_spill]] %s8995_s5  ;;  %s8921_s10 = smov 9  }
   0x8   :  { %10086 = sst [smem:[#allocation57_spill]] %s9000_s9  ;;  %s8922_s15 = smov 10  }
   0x9   :  { %10087 = sst [smem:[#allocation58_spill]] %s9005_s13  ;;  %s8923_s20 = smov 11  }
   0xa   :  { %s9025_s29 = sld [smem:[%s10054_s0 + %s8918_s26]]   ;;  %s8924_s26 = smov 12  }
   0xb   :  { %s9030_s3 = sld [smem:[%s10054_s0 + %s8919_s30]]   ;;  %s8925_s1 = smov 13  }
   0xc   :  { %10088 = sst [smem:[#allocation59_spill]] %s9020_s25  ;;  %s8926_s7 = smov 14  }
   0xd   :  { %s9035_s8 = sld [smem:[%s10054_s0 + %s8920_s4]]   ;;  %s8928_s22 = smov 16  }
   0xe   :  { %s9040_s14 = sld [smem:[%s10054_s0 + %s8921_s10]]   ;;  %s8929_s28 = smov 17  }
   0xf   :  { %s9045_s19 = sld [smem:[%s10054_s0 + %s8922_s15]]   ;;  %s8927_s15 = smov 15  }
  0x10   :  { %10089 = sst [smem:[#allocation60_spill]] %s9025_s29 }
  0x11   :  { %10090 = sst [smem:[#allocation61_spill]] %s9030_s3 }
  0x12   :  { %s9050_s24 = sld [smem:[%s10054_s0 + %s8923_s20]]  }
  0x13   :  { %10091 = sst [smem:[#allocation62_spill]] %s9035_s8 }
  0x14   :  { %s9055_s30 = sld [smem:[%s10054_s0 + %s8924_s26]]  }
  0x15   :  { %10092 = sst [smem:[#allocation63_spill]] %s9045_s19 }
  0x16   :  { %s9060_s6 = sld [smem:[%s10054_s0 + %s8925_s1]]  }
  0x17   :  { %s9065_s12 = sld [smem:[%s10054_s0 + %s8926_s7]]   ;;  %s8930_s7 = smov 18  }
  0x18   :  { %s9070_s20 = sld [smem:[%s10054_s0 + %s8927_s15]]   ;;  %s8931_s15 = smov 19  }
  0x19   :  { %s9075_s27 = sld [smem:[%s10054_s0 + %s8928_s22]]   ;;  %s8932_s22 = smov 20  }
  0x1a   :  { %10093 = sst [smem:[#allocation64_spill]] %s9055_s30 }
  0x1b   :  { %s9080_s4 = sld [smem:[%s10054_s0 + %s8929_s28]]   ;;  %s8933_s28 = smov 21  }
  0x1c   :  { %10094 = sst [smem:[#allocation65_spill]] %s9060_s6 }
  0x1d   :  { %10095 = sst [smem:[#allocation66_spill]] %s9065_s12 }
  0x1e   :  { %10096 = sst [smem:[#allocation67_spill]] %s9070_s20 }
  0x1f   :  { %10097 = sst [smem:[#allocation68_spill]] %s9075_s27 }
  0x20   :  { %s9085_s30 = sld [smem:[%s10054_s0 + %s8930_s7]]   ;;  %s8934_s7 = smov 22  }
  0x21   :  { %10098 = sst [smem:[#allocation69_spill]] %s9080_s4 }
  0x22   :  { %s9090_s19 = sld [smem:[%s10054_s0 + %s8931_s15]]   ;;  %s8935_s15 = smov 23  }
  0x23   :  { %s9095_s27 = sld [smem:[%s10054_s0 + %s8932_s22]]   ;;  %s8936_s22 = smov 24  }
  0x24   :  { %s9100_s25 = sld [smem:[%s10054_s0 + %s8933_s28]]   ;;  %s8937_s28 = smov 25  }
  0x25   :  { %s9110_s29 = sld [smem:[%s10054_s0 + %s8935_s15]]   ;;  %s8939_s15 = smov 27  }
  0x26   :  { %10099 = sst [smem:[#allocation70_spill]] %s9085_s30 }
  0x27   :  { %s9105_s30 = sld [smem:[%s10054_s0 + %s8934_s7]]   ;;  %s8938_s7 = smov 26  }
  0x28   :  { %10100 = sst [smem:[#allocation71_spill]] %s9090_s19 }
  0x29   :  { %10101 = sst [smem:[#allocation72_spill]] %s9095_s27 }
  0x2a   :  { %10102 = sst [smem:[#allocation73_spill]] %s9100_s25 }
  0x2b   :  { %10103 = sst [smem:[#allocation74_spill]] %s9110_s29 }
  0x2c   :  { %s9115_s27 = sld [smem:[%s10054_s0 + %s8936_s22]]   ;;  %s8940_s22 = smov 28  }
  0x2d   :  { %s9120_s25 = sld [smem:[%s10054_s0 + %s8937_s28]]   ;;  %s8941_s28 = smov 29  }
  0x2e   :  { %s9125_s13 = sld [smem:[%s10054_s0 + %s8938_s7]]   ;;  %s8942_s7 = smov 30  }
  0x2f   :  { %s9130_s5 = sld [smem:[%s10054_s0 + %s8939_s15]]   ;;  %s8943_s15 = smov 31  }
  0x30   :  { %s9135_s9 = sld [smem:[%s10054_s0 + %s8940_s22]]   ;;  %s8944_s22 = smov 32  }
  0x31   :  { %s9150_s29 = sld [smem:[%s10054_s0 + %s8943_s15]]   ;;  %s8947_s15 = smov 35  }
  0x33   :  { %10104 = sst [smem:[#allocation75_spill]] %s9120_s25 }
  0x34   :  { %10105 = sst [smem:[#allocation76_spill]] %s9125_s13 }
  0x35   :  { %10106 = sst [smem:[#allocation77_spill]] %s9130_s5 }
  0x36   :  { %10107 = sst [smem:[#allocation78_spill]] %s9135_s9 }
  0x37   :  { %s9140_s25 = sld [smem:[%s10054_s0 + %s8941_s28]]   ;;  %s8945_s28 = smov 33  }
  0x38   :  { %s9145_s13 = sld [smem:[%s10054_s0 + %s8942_s7]]   ;;  %s8946_s7 = smov 34  }
  0x39   :  { %10109 = sst [smem:[#allocation80_spill]] %s9150_s29 }
  0x3a   :  { %s9155_s9 = sld [smem:[%s10054_s0 + %s8944_s22]]   ;;  %s8948_s22 = smov 36  }
  0x3b   :  { %s9160_s19 = sld [smem:[%s10054_s0 + %s8945_s28]]   ;;  %s8949_s28 = smov 37  }
  0x3c   :  { %s9170_s29 = sld [smem:[%s10054_s0 + %s8947_s15]]   ;;  %s8951_s15 = smov 39  }
  0x3d   :  { %s9180_s20 = sld [smem:[%s10054_s0 + %s8949_s28]]   ;;  %s8953_s28 = smov 41  }
  0x3e   :  { %10108 = sst [smem:[#allocation79_spill]] %s9145_s13 }
  0x3f   :  { %s9165_s13 = sld [smem:[%s10054_s0 + %s8946_s7]]   ;;  %s8950_s7 = smov 38  }
  0x40   :  { %10110 = sst [smem:[#allocation81_spill]] %s9155_s9 }
  0x41   :  { %s9175_s9 = sld [smem:[%s10054_s0 + %s8948_s22]]   ;;  %s8952_s22 = smov 40  }
  0x42   :  { %s9190_s6 = sld [smem:[%s10054_s0 + %s8951_s15]]  }
  0x43   :  { %10113 = sst [smem:[#allocation84_spill]] %s9180_s20 }
  0x44   :  { %s9200_s20 = sld [smem:[%s10054_s0 + %s8953_s28]]  }
  0x45   :  { %10111 = sst [smem:[#allocation82_spill]] %s9165_s13 }
  0x46   :  { %s9185_s13 = sld [smem:[%s10054_s0 + %s8950_s7]]   ;;  %s8954_s7 = smov 42  }
  0x47   :  { %10112 = sst [smem:[#allocation83_spill]] %s9175_s9 }
  0x48   :  { %10115 = sst [smem:[#allocation86_spill]] %s9190_s6 }
  0x49   :  { %s9195_s9 = sld [smem:[%s10054_s0 + %s8952_s22]]  }
  0x4c   :  { %10114 = sst [smem:[#allocation85_spill]] %s9185_s13 }
  0x4d   :  { %s9205_s13 = sld [smem:[%s10054_s0 + %s8954_s7]]  }
  0x4e   :  { %90 = vsyncpa [#allocation3], 0 }
  0x4f   :  { %91 = vsyncpa [#allocation6], 0 }
  0x50   :  { %92 = vsyncpa [#allocation9], 0 }
  0x51   :  { %93 = vsyncpa [#allocation12], 0 }
  0x52   :  { %94 = vsyncpa [#allocation15], 0 }
  0x53   :  { %95 = vsyncpa [#allocation18], 0 }
  0x54   :  { %96 = vsyncpa [#allocation21], 0 }
  0x55   :  { %97 = vsyncpa [#allocation24], 0 }
  0x56   :  { %98 = vsyncpa [#allocation27], 0 }
  0x57   :  { %99 = vsyncpa [#allocation30], 0 }
  0x58   :  { %100 = vsyncpa [#allocation33], 0 }
  0x59   :  { %101 = vsyncpa [#allocation36], 0 }
  0x5a   :  { %102 = vsyncpa [#allocation39], 0 }
  0x5b   :  { %103 = vsyncpa [#allocation4], 0 }
  0x5c   :  { %105 = vsyncpa [#allocation4 + $0x1], 0  ;;  %s9207_s15 = smov 0   ;;  %s9209_s16 = smov 0  }
  0x5d   :  { %s9211_s0 = smov 0   ;;  %s9213_s18 = smov 0  }
  0x5e LB: > { %10116 = sst [smem:[#allocation87_spill]] %s8899_s15  ;;  %s9228_s22 = sadd.s32 4294967295, %s8911_s18   ;;  %s8911_s18 = sphi %s9213_s18, %s10195_s18   ;;  %s8907_s0 = sphi %s9211_s0, %s10200_s0   ;;  %s8903_s16 = sphi %s9209_s16, %s10199_s16   ;;  %s8899_s15 = sphi %s9207_s15, %s10198_s15  }
  0x5f   : > { %10117 = sst [smem:[#allocation88_spill]] %s8907_s0  ;;  %s6675_s23 = sadd.s32 4294967294, %s8911_s18  }
  0x60   : > { %10118 = sst [smem:[#allocation89_spill]] %s8911_s18  ;;  %s9232_s26 = sadd.s32 1, %s8911_s18  }
  0x61   : > { %10119 = sst [smem:[#allocation90_spill]] %s9232_s26  ;;  %s1005_s28 = sadd.s32 1, %s8907_s0 }
  0x62   : > { %s1002_s1 = ssub.s32 %s8911_s18, %s9232_s26  ;;  %p1015_p0 = scmp.ne.s32.totalorder %s8907_s0, %s8903_s16 }
  0x63   : > { %p1003_p1 = scmp.eq.s32.totalorder %s1002_s1, 0  ;;  %p1016_p2 = scmp.eq.s32.totalorder %s9228_s22, 1 }
  0x64   : > { %p1021_p3 = scmp.ne.s32.totalorder %s8903_s16, %s8899_s15  ;;  %p1022_p4 = scmp.eq.s32.totalorder %s6675_s23, 1 }
  0x65   : > { %s9243_s2 = scalar_select %p1003_p1, %s8907_s0, %s1005_s28  }
  0x66   : > { %p9245_p5 = por %p1016_p2, %p1015_p0  ;;  %p9249_p6 = por %p1022_p4, %p1021_p3 }
  0x67   : > { %10120 = sst [smem:[#allocation91_spill]] %s9243_s2  ;;  %p6676_p7 = scmp.ge.s32.totalorder %s8911_s18, 1 }
  0x68   : > { %s10121_s7 = scalar_select %p9245_p5, 1, 0 }
  0x69   : > { %s10122_s10 = scalar_select %p9249_p6, 1, 0 }
  0x6a   : > { %p1029_p8 = scmp.lt.s32.totalorder %s8911_s18, 3  ;;  %p10074_p9 = scmp.eq.s32.totalorder %s9228_s22, 0 }
  0x6b   : > { %10123 = sst [smem:[#allocation92_spill]] %s10122_s10  ;;  %s8955_s1 = smov [#allocation5]  }
  0x6c   : > { %p9256_p10 = pnand %p6676_p7, %p1029_p8  ;;  %s1059_s23 = sshll.u32 %s8955_s1, 4  ;;  %s1060_s23 = int_to_ptr.vmem [resolvable:$true] %s1059_s23 }
  0x6d   : > { %s8956_s28 = smov [#allocation8]   ;;  %s8957_s26 = smov [#allocation11]  }
  0x6e   : > { %s10124_s11 = scalar_select %p9256_p10, 1, 0 }
  0x6f   : > { %p7765_p11 = pneg %p9256_p10  ;;  %s1087_s2 = sshll.u32 %s8956_s28, 4  ;;  %s1088_s2 = int_to_ptr.vmem [resolvable:$true] %s1087_s2 }
  0x70   : > { %s1112_s10 = sshll.u32 %s8957_s26, 4  ;;  %s8160_s1 = scalar_lea.vmem %s1060_s23, 16  ;;  %s9268_s10 = int_to_ptr.vmem [resolvable:$true] %s1112_s10 }
  0x71   : > { %p9264_p12 = pnand %p10074_p9, %p7765_p11  ;;  %p8161_p0 = scmp.ne.s32.totalorder %s1060_s23, %s8160_s1 }
  0x72   : > { %s8167_s28 = scalar_lea.vmem %s1060_s23, 32  ;;  %p8168_p3 = scmp.lt.s32.totalorder %s1060_s23, %s1060_s23 }
  0x73   : > { %p9272_p13 = pneg %p9264_p12  ;;  %p8169_p4 = scmp.lt.s32.totalorder %s8167_s28, %s8160_s1 }
  0x75   : > { %p8163_p1 = pnand %p8161_p0, %p9272_p13  ;;  %p8170_p7 = por %p8169_p4, %p8168_p3 }
  0x77   : > { %p8164_p2 = pneg %p8163_p1 }
  0x79   : > { %p8171_p8 = pnand %p8170_p7, %p8164_p2 }
  0x7b   : > { %8174 = shalt.err (!%p8171_p8)
}
  0x7c   : > { %7771 = dma.hbm_to_vmem [thread:$0]  (!%p9264_p12), %s9015_s21, 16, %s1060_s23, [#allocation6]  }
  0x7d   : > { %s8186_s26 = scalar_lea.vmem %s1088_s2, 16  ;;  %s8193_s18 = scalar_lea.vmem %s1088_s2, 32 }
  0x7e   : > { %p8187_p11 = scmp.ne.s32.totalorder %s1088_s2, %s8186_s26  ;;  %p8194_p5 = scmp.lt.s32.totalorder %s1088_s2, %s1088_s2 }
  0x7f   : > { %p8195_p0 = scmp.lt.s32.totalorder %s8193_s18, %s8186_s26 }
  0x80   : > { %p8189_p9 = pnand %p8187_p11, %p9272_p13 }
  0x81   : > { %p8196_p1 = por %p8195_p0, %p8194_p5 }
  0x82   : > { %p8190_p6 = pneg %p8189_p9 }
  0x84   : > { %p8197_p10 = pnand %p8196_p1, %p8190_p6 }
  0x86   : > { %8200 = shalt.err (!%p8197_p10)
}
  0x87   : > { %s10127_s8 = sld [smem:[#allocation62_spill]]  ;;  %s8212_s23 = scalar_lea.vmem %s9268_s10, 16 }
  0x88   : > { %p8213_p2 = scmp.ne.s32.totalorder %s9268_s10, %s8212_s23  ;;  %s8219_s1 = scalar_lea.vmem %s9268_s10, 32 }
  0x89   : > { %p8220_p4 = scmp.lt.s32.totalorder %s9268_s10, %s9268_s10  ;;  %p8221_p5 = scmp.lt.s32.totalorder %s8219_s1, %s8212_s23 }
  0x8a   : > { %p8215_p3 = pnand %p8213_p2, %p9272_p13 }
  0x8b   : > { %p8222_p6 = por %p8221_p5, %p8220_p4 }
  0x8c   : > { %p8216_p9 = pneg %p8215_p3 }
  0x8d   : > { %7777 = dma.hbm_to_vmem [thread:$0]  (!%p9264_p12), %s10127_s8, 16, %s1088_s2, [#allocation9]  }
  0x8e   : > { %p8223_p10 = pnand %p8222_p6, %p8216_p9 }
  0x90   : > { %8226 = shalt.err (!%p8223_p10)
}
  0x91   : > { %7783 = dma.hbm_to_vmem [thread:$0]  (!%p9264_p12), %s9050_s24, 16, %s9268_s10, [#allocation12]  }
  0x92   : > { %s8958_s18 = smov [#allocation14]   ;;  %s8959_s28 = smov [#allocation17]  }
  0x93   : > { %s1137_s2 = sshll.u32 %s8958_s18, 4  ;;  %s1162_s26 = sshll.u32 %s8959_s28, 4  ;;  %s1138_s2 = int_to_ptr.vmem [resolvable:$true] %s1137_s2  ;;  %s1163_s26 = int_to_ptr.vmem [resolvable:$true] %s1162_s26 }
  0x94   : > { %s8238_s8 = scalar_lea.vmem %s1138_s2, 16  ;;  %s8245_s23 = scalar_lea.vmem %s1138_s2, 32 }
  0x95   : > { %p8239_p7 = scmp.ne.s32.totalorder %s1138_s2, %s8238_s8  ;;  %p8246_p0 = scmp.lt.s32.totalorder %s1138_s2, %s1138_s2 }
  0x96   : > { %p8247_p1 = scmp.lt.s32.totalorder %s8245_s23, %s8238_s8 }
  0x97   : > { %p8241_p8 = pnand %p8239_p7, %p9272_p13 }
  0x98   : > { %p8248_p2 = por %p8247_p1, %p8246_p0 }
  0x99   : > { %p8242_p11 = pneg %p8241_p8 }
  0x9b   : > { %p8249_p3 = pnand %p8248_p2, %p8242_p11 }
  0x9d   : > { %8252 = shalt.err (!%p8249_p3)
}
  0x9e   : > { %s10128_s12 = sld [smem:[#allocation66_spill]]  ;;  %s8264_s10 = scalar_lea.vmem %s1163_s26, 16 }
  0x9f   : > { %p8265_p9 = scmp.ne.s32.totalorder %s1163_s26, %s8264_s10  ;;  %s8271_s1 = scalar_lea.vmem %s1163_s26, 32 }
  0xa0   : > { %p8272_p6 = scmp.lt.s32.totalorder %s1163_s26, %s1163_s26  ;;  %p8273_p10 = scmp.lt.s32.totalorder %s8271_s1, %s8264_s10 }
  0xa1   : > { %p8267_p4 = pnand %p8265_p9, %p9272_p13 }
  0xa2   : > { %p8274_p7 = por %p8273_p10, %p8272_p6 }
  0xa3   : > { %p8268_p5 = pneg %p8267_p4 }
  0xa4   : > { %7789 = dma.hbm_to_vmem [thread:$0]  (!%p9264_p12), %s10128_s12, 16, %s1138_s2, [#allocation15]  }
  0xa5   : > { %p8275_p8 = pnand %p8274_p7, %p8268_p5 }
  0xa7   : > { %8278 = shalt.err (!%p8275_p8)
}
  0xa8   : > { %s10129_s4 = sld [smem:[#allocation69_spill]]  ;;  %s8960_s8 = smov [#allocation20]  }
  0xa9   : > { %s1193_s18 = sshll.u32 %s8960_s8, 4  ;;  %s8961_s2 = smov [#allocation23]   ;;  %s1194_s18 = int_to_ptr.vmem [resolvable:$true] %s1193_s18 }
  0xaa   : > { %s1215_s28 = sshll.u32 %s8961_s2, 4  ;;  %s8290_s23 = scalar_lea.vmem %s1194_s18, 16  ;;  %s1216_s28 = int_to_ptr.vmem [resolvable:$true] %s1215_s28 }
  0xab   : > { %p8291_p11 = scmp.ne.s32.totalorder %s1194_s18, %s8290_s23  ;;  %s8297_s12 = scalar_lea.vmem %s1194_s18, 32 }
  0xac   : > { %p8298_p2 = scmp.lt.s32.totalorder %s1194_s18, %s1194_s18  ;;  %p8299_p3 = scmp.lt.s32.totalorder %s8297_s12, %s8290_s23 }
  0xad   : > { %p8293_p0 = pnand %p8291_p11, %p9272_p13 }
  0xae   : > { %7795 = dma.hbm_to_vmem [thread:$0]  (!%p9264_p12), %s10129_s4, 16, %s1163_s26, [#allocation18]  }
  0xaf   : > { %p8294_p1 = pneg %p8293_p0  ;;  %p8300_p9 = por %p8299_p3, %p8298_p2 }
  0xb1   : > { %p8301_p4 = pnand %p8300_p9, %p8294_p1 }
  0xb3   : > { %8304 = shalt.err (!%p8301_p4)
}
  0xb4   : > { %7801 = dma.hbm_to_vmem [thread:$0]  (!%p9264_p12), %s9105_s30, 16, %s1194_s18, [#allocation21]  }
  0xb5   : > { %s8316_s26 = scalar_lea.vmem %s1216_s28, 16  ;;  %s8323_s10 = scalar_lea.vmem %s1216_s28, 32 }
  0xb6   : > { %p8317_p5 = scmp.ne.s32.totalorder %s1216_s28, %s8316_s26  ;;  %p8324_p7 = scmp.lt.s32.totalorder %s1216_s28, %s1216_s28 }
  0xb7   : > { %p8325_p8 = scmp.lt.s32.totalorder %s8323_s10, %s8316_s26 }
  0xb8   : > { %p8319_p6 = pnand %p8317_p5, %p9272_p13 }
  0xb9   : > { %p8326_p11 = por %p8325_p8, %p8324_p7 }
  0xba   : > { %p8320_p10 = pneg %p8319_p6 }
  0xbc   : > { %p8327_p0 = pnand %p8326_p11, %p8320_p10 }
  0xbe   : > { %8330 = shalt.err (!%p8327_p0)
}
  0xbf   : > { %7807 = dma.hbm_to_vmem [thread:$0]  (!%p9264_p12), %s9115_s27, 16, %s1216_s28, [#allocation24]  }
  0xc0   : > { %s8962_s12 = smov [#allocation26]   ;;  %s8963_s8 = smov [#allocation29]  }
  0xc1   : > { %s1242_s1 = sshll.u32 %s8962_s12, 4  ;;  %s1264_s18 = sshll.u32 %s8963_s8, 4  ;;  %s1243_s1 = int_to_ptr.vmem [resolvable:$true] %s1242_s1  ;;  %s1265_s18 = int_to_ptr.vmem [resolvable:$true] %s1264_s18 }
  0xc2   : > { %s8342_s2 = scalar_lea.vmem %s1243_s1, 16  ;;  %s8349_s23 = scalar_lea.vmem %s1243_s1, 32 }
  0xc3   : > { %p8343_p1 = scmp.ne.s32.totalorder %s1243_s1, %s8342_s2  ;;  %p8350_p9 = scmp.lt.s32.totalorder %s1243_s1, %s1243_s1 }
  0xc4   : > { %p8351_p4 = scmp.lt.s32.totalorder %s8349_s23, %s8342_s2 }
  0xc5   : > { %p8345_p2 = pnand %p8343_p1, %p9272_p13 }
  0xc6   : > { %p8352_p5 = por %p8351_p4, %p8350_p9 }
  0xc7   : > { %p8346_p3 = pneg %p8345_p2 }
  0xc9   : > { %p8353_p6 = pnand %p8352_p5, %p8346_p3 }
  0xcb   : > { %8356 = shalt.err (!%p8353_p6)
}
  0xcc   : > { %s10130_s5 = sld [smem:[#allocation77_spill]]  ;;  %s8368_s28 = scalar_lea.vmem %s1265_s18, 16 }
  0xcd   : > { %p8369_p10 = scmp.ne.s32.totalorder %s1265_s18, %s8368_s28  ;;  %s8375_s26 = scalar_lea.vmem %s1265_s18, 32 }
  0xce   : > { %p8376_p11 = scmp.lt.s32.totalorder %s1265_s18, %s1265_s18  ;;  %p8377_p0 = scmp.lt.s32.totalorder %s8375_s26, %s8368_s28 }
  0xcf   : > { %p8371_p7 = pnand %p8369_p10, %p9272_p13 }
  0xd0   : > { %p8378_p1 = por %p8377_p0, %p8376_p11 }
  0xd1   : > { %p8372_p8 = pneg %p8371_p7 }
  0xd2   : > { %7813 = dma.hbm_to_vmem [thread:$0]  (!%p9264_p12), %s10130_s5, 16, %s1243_s1, [#allocation27]  }
  0xd3   : > { %p8379_p2 = pnand %p8378_p1, %p8372_p8 }
  0xd5   : > { %8382 = shalt.err (!%p8379_p2)
}
  0xd6   : > { %7819 = dma.hbm_to_vmem [thread:$0]  (!%p9264_p12), %s9140_s25, 16, %s1265_s18, [#allocation30]  }
  0xd7   : > { %s8964_s10 = smov [#allocation32]   ;;  %s8965_s1 = smov [#allocation35]  }
  0xd8   : > { %s1292_s12 = sshll.u32 %s8964_s10, 4  ;;  %s1314_s8 = sshll.u32 %s8965_s1, 4  ;;  %s1293_s12 = int_to_ptr.vmem [resolvable:$true] %s1292_s12  ;;  %s1315_s8 = int_to_ptr.vmem [resolvable:$true] %s1314_s8 }
  0xd9   : > { %s8394_s2 = scalar_lea.vmem %s1293_s12, 16  ;;  %s8401_s23 = scalar_lea.vmem %s1293_s12, 32 }
  0xda   : > { %p8395_p3 = scmp.ne.s32.totalorder %s1293_s12, %s8394_s2  ;;  %p8402_p5 = scmp.lt.s32.totalorder %s1293_s12, %s1293_s12 }
  0xdb   : > { %p8403_p6 = scmp.lt.s32.totalorder %s8401_s23, %s8394_s2 }
  0xdc   : > { %p8397_p9 = pnand %p8395_p3, %p9272_p13 }
  0xdd   : > { %p8404_p10 = por %p8403_p6, %p8402_p5 }
  0xde   : > { %p8398_p4 = pneg %p8397_p9 }
  0xe0   : > { %p8405_p7 = pnand %p8404_p10, %p8398_p4 }
  0xe2   : > { %8408 = shalt.err (!%p8405_p7)
}
  0xe3   : > { %7825 = dma.hbm_to_vmem [thread:$0]  (!%p9264_p12), %s9160_s19, 16, %s1293_s12, [#allocation33]  }
  0xe4   : > { %s8420_s18 = scalar_lea.vmem %s1315_s8, 16  ;;  %s8427_s28 = scalar_lea.vmem %s1315_s8, 32 }
  0xe5   : > { %p8421_p8 = scmp.ne.s32.totalorder %s1315_s8, %s8420_s18  ;;  %p8428_p1 = scmp.lt.s32.totalorder %s1315_s8, %s1315_s8 }
  0xe6   : > { %p8429_p2 = scmp.lt.s32.totalorder %s8427_s28, %s8420_s18 }
  0xe7   : > { %p8423_p11 = pnand %p8421_p8, %p9272_p13 }
  0xe8   : > { %p8430_p3 = por %p8429_p2, %p8428_p1 }
  0xe9   : > { %p8424_p0 = pneg %p8423_p11 }
  0xeb   : > { %p8431_p9 = pnand %p8430_p3, %p8424_p0 }
  0xed   : > { %8434 = shalt.err (!%p8431_p9)
}
  0xee   : > { %7831 = dma.hbm_to_vmem [thread:$0]  (!%p9264_p12), %s9170_s29, 16, %s1315_s8, [#allocation36]  }
  0xef   : > { %s8966_s26 = smov [#allocation38]   ;;  %s8967_s12 = smov [#allocation2]  }
  0xf0   : > { %s1342_s10 = sshll.u32 %s8966_s26, 4  ;;  %s1048_s1 = sshll.u32 %s8967_s12, 4  ;;  %s1343_s10 = int_to_ptr.vmem [resolvable:$true] %s1342_s10  ;;  %s1049_s1 = int_to_ptr.vmem [resolvable:$true] %s1048_s1 }
  0xf1   : > { %s8446_s2 = scalar_lea.vmem %s1343_s10, 16  ;;  %s8453_s23 = scalar_lea.vmem %s1343_s10, 32 }
  0xf2   : > { %p8447_p4 = scmp.ne.s32.totalorder %s1343_s10, %s8446_s2  ;;  %p8454_p10 = scmp.lt.s32.totalorder %s1343_s10, %s1343_s10 }
  0xf3   : > { %p8455_p7 = scmp.lt.s32.totalorder %s8453_s23, %s8446_s2 }
  0xf4   : > { %p8449_p5 = pnand %p8447_p4, %p9272_p13 }
  0xf5   : > { %p8456_p8 = por %p8455_p7, %p8454_p10 }
  0xf6   : > { %p8450_p6 = pneg %p8449_p5 }
  0xf8   : > { %p8457_p11 = pnand %p8456_p8, %p8450_p6 }
  0xfa   : > { %8460 = shalt.err (!%p8457_p11)
}
  0xfb   : > { %s10131_s6 = sld [smem:[#allocation86_spill]]  ;;  %s8472_s8 = scalar_lea.vmem %s1049_s1, 16 }
  0xfc   : > { %p8473_p0 = scmp.ne.s32.totalorder %s1049_s1, %s8472_s8  ;;  %s8479_s18 = scalar_lea.vmem %s1049_s1, 32 }
  0xfd   : > { %p8480_p3 = scmp.lt.s32.totalorder %s1049_s1, %s1049_s1  ;;  %p8481_p9 = scmp.lt.s32.totalorder %s8479_s18, %s8472_s8 }
  0xfe   : > { %p8475_p1 = pnand %p8473_p0, %p9272_p13 }
  0xff   : > { %p8482_p4 = por %p8481_p9, %p8480_p3 }
 0x100   : > { %p8476_p2 = pneg %p8475_p1 }
 0x101   : > { %7837 = dma.hbm_to_vmem [thread:$0]  (!%p9264_p12), %s10131_s6, 16, %s1343_s10, [#allocation39]  }
 0x102   : > { %p8483_p5 = pnand %p8482_p4, %p8476_p2 }
 0x104   : > { %8486 = shalt.err (!%p8483_p5)
}
 0x105   : > { %7768 = dma.hbm_to_vmem [thread:$0]  (!%p9264_p12), %s9010_s17, 16, %s1049_s1, [#allocation3]  }
 0x106   : > { %s8968_s28 = smov [#allocation7]   ;;  %s8969_s10 = smov [#allocation10]  }
 0x107   : > { %s1076_s26 = sshll.u32 %s8968_s28, 4  ;;  %s1098_s12 = sshll.u32 %s8969_s10, 4  ;;  %s1077_s26 = int_to_ptr.vmem [resolvable:$true] %s1076_s26  ;;  %s1099_s12 = int_to_ptr.vmem [resolvable:$true] %s1098_s12 }
 0x108   : > { %s8498_s2 = scalar_lea.vmem %s1077_s26, 16  ;;  %s8505_s23 = scalar_lea.vmem %s1077_s26, 32 }
 0x109   : > { %p8499_p6 = scmp.ne.s32.totalorder %s1077_s26, %s8498_s2  ;;  %p8506_p8 = scmp.lt.s32.totalorder %s1077_s26, %s1077_s26 }
 0x10a   : > { %p8507_p11 = scmp.lt.s32.totalorder %s8505_s23, %s8498_s2 }
 0x10b   : > { %p8501_p10 = pnand %p8499_p6, %p9272_p13 }
 0x10c   : > { %p8508_p0 = por %p8507_p11, %p8506_p8 }
 0x10d   : > { %p8502_p7 = pneg %p8501_p10 }
 0x10f   : > { %p8509_p1 = pnand %p8508_p0, %p8502_p7 }
 0x111   : > { %8512 = shalt.err (!%p8509_p1)
}
 0x112   : > { %s10132_s3 = sld [smem:[#allocation61_spill]]  ;;  %s8524_s1 = scalar_lea.vmem %s1099_s12, 16 }
 0x113   : > { %p8525_p2 = scmp.ne.s32.totalorder %s1099_s12, %s8524_s1  ;;  %s8531_s8 = scalar_lea.vmem %s1099_s12, 32 }
 0x114   : > { %p8532_p4 = scmp.lt.s32.totalorder %s1099_s12, %s1099_s12  ;;  %p8533_p5 = scmp.lt.s32.totalorder %s8531_s8, %s8524_s1 }
 0x115   : > { %p8527_p3 = pnand %p8525_p2, %p9272_p13 }
 0x116   : > { %p8534_p6 = por %p8533_p5, %p8532_p4 }
 0x117   : > { %p8528_p9 = pneg %p8527_p3 }
 0x118   : > { %7774 = dma.hbm_to_vmem [thread:$0]  (!%p9264_p12), %s10132_s3, 16, %s1077_s26, [#allocation6]  }
 0x119   : > { %p8535_p10 = pnand %p8534_p6, %p8528_p9 }
 0x11b   : > { %8538 = shalt.err (!%p8535_p10)
}
 0x11c   : > { %7780 = dma.hbm_to_vmem [thread:$0]  (!%p9264_p12), %s9040_s14, 16, %s1099_s12, [#allocation9]  }
 0x11d   : > { %s8970_s18 = smov [#allocation13]   ;;  %s8971_s26 = smov [#allocation16]  }
 0x11e   : > { %s1126_s28 = sshll.u32 %s8970_s18, 4  ;;  %s1148_s10 = sshll.u32 %s8971_s26, 4  ;;  %s1127_s28 = int_to_ptr.vmem [resolvable:$true] %s1126_s28  ;;  %s1149_s10 = int_to_ptr.vmem [resolvable:$true] %s1148_s10 }
 0x11f   : > { %s8550_s2 = scalar_lea.vmem %s1127_s28, 16  ;;  %s8557_s23 = scalar_lea.vmem %s1127_s28, 32 }
 0x120   : > { %p8551_p7 = scmp.ne.s32.totalorder %s1127_s28, %s8550_s2  ;;  %p8558_p0 = scmp.lt.s32.totalorder %s1127_s28, %s1127_s28 }
 0x121   : > { %p8559_p1 = scmp.lt.s32.totalorder %s8557_s23, %s8550_s2 }
 0x122   : > { %p8553_p8 = pnand %p8551_p7, %p9272_p13 }
 0x123   : > { %p8560_p2 = por %p8559_p1, %p8558_p0 }
 0x124   : > { %p8554_p11 = pneg %p8553_p8 }
 0x126   : > { %p8561_p3 = pnand %p8560_p2, %p8554_p11 }
 0x128   : > { %8564 = shalt.err (!%p8561_p3)
}
 0x129   : > { %s10133_s1 = sld [smem:[#allocation65_spill]]  ;;  %s8576_s12 = scalar_lea.vmem %s1149_s10, 16 }
 0x12a   : > { %p8577_p9 = scmp.ne.s32.totalorder %s1149_s10, %s8576_s12  ;;  %s8583_s8 = scalar_lea.vmem %s1149_s10, 32 }
 0x12b   : > { %p8584_p6 = scmp.lt.s32.totalorder %s1149_s10, %s1149_s10  ;;  %p8585_p10 = scmp.lt.s32.totalorder %s8583_s8, %s8576_s12 }
 0x12c   : > { %p8579_p4 = pnand %p8577_p9, %p9272_p13 }
 0x12d   : > { %p8586_p7 = por %p8585_p10, %p8584_p6 }
 0x12e   : > { %p8580_p5 = pneg %p8579_p4 }
 0x12f   : > { %7786 = dma.hbm_to_vmem [thread:$0]  (!%p9264_p12), %s10133_s1, 16, %s1127_s28, [#allocation12]  }
 0x130   : > { %p8587_p8 = pnand %p8586_p7, %p8580_p5 }
 0x132   : > { %8590 = shalt.err (!%p8587_p8)
}
 0x133   : > { %s10134_s18 = sld [smem:[#allocation67_spill]]  ;;  %s8972_s26 = smov [#allocation19]  }
 0x134   : > { %s1176_s2 = sshll.u32 %s8972_s26, 4  ;;  %s8973_s28 = smov [#allocation22]   ;;  %s1177_s2 = int_to_ptr.vmem [resolvable:$true] %s1176_s2 }
 0x135   : > { %s1204_s23 = sshll.u32 %s8973_s28, 4  ;;  %s8602_s1 = scalar_lea.vmem %s1177_s2, 16  ;;  %s1205_s23 = int_to_ptr.vmem [resolvable:$true] %s1204_s23 }
 0x136   : > { %p8603_p11 = scmp.ne.s32.totalorder %s1177_s2, %s8602_s1  ;;  %s8609_s3 = scalar_lea.vmem %s1177_s2, 32 }
 0x137   : > { %p8610_p2 = scmp.lt.s32.totalorder %s1177_s2, %s1177_s2  ;;  %p8611_p3 = scmp.lt.s32.totalorder %s8609_s3, %s8602_s1 }
 0x138   : > { %p8605_p0 = pnand %p8603_p11, %p9272_p13 }
 0x139   : > { %7792 = dma.hbm_to_vmem [thread:$0]  (!%p9264_p12), %s10134_s18, 16, %s1149_s10, [#allocation15]  }
 0x13a   : > { %p8606_p1 = pneg %p8605_p0  ;;  %p8612_p9 = por %p8611_p3, %p8610_p2 }
 0x13c   : > { %p8613_p4 = pnand %p8612_p9, %p8606_p1 }
 0x13e   : > { %8616 = shalt.err (!%p8613_p4)
}
 0x13f   : > { %s10135_s12 = sld [smem:[#allocation71_spill]]  ;;  %s8628_s10 = scalar_lea.vmem %s1205_s23, 16 }
 0x140   : > { %p8629_p5 = scmp.ne.s32.totalorder %s1205_s23, %s8628_s10  ;;  %s8635_s8 = scalar_lea.vmem %s1205_s23, 32 }
 0x141   : > { %p8636_p7 = scmp.lt.s32.totalorder %s1205_s23, %s1205_s23  ;;  %p8637_p8 = scmp.lt.s32.totalorder %s8635_s8, %s8628_s10 }
 0x142   : > { %p8631_p6 = pnand %p8629_p5, %p9272_p13 }
 0x143   : > { %p8638_p11 = por %p8637_p8, %p8636_p7 }
 0x144   : > { %p8632_p10 = pneg %p8631_p6 }
 0x145   : > { %7798 = dma.hbm_to_vmem [thread:$0]  (!%p9264_p12), %s10135_s12, 16, %s1177_s2, [#allocation18]  }
 0x146   : > { %p8639_p0 = pnand %p8638_p11, %p8632_p10 }
 0x148   : > { %8642 = shalt.err (!%p8639_p0)
}
 0x149   : > { %s10136_s3 = sld [smem:[#allocation74_spill]]  ;;  %s8974_s18 = smov [#allocation25]  }
 0x14a   : > { %s1228_s26 = sshll.u32 %s8974_s18, 4  ;;  %s1229_s26 = int_to_ptr.vmem [resolvable:$true] %s1228_s26 }
 0x14b   : > { %s8654_s2 = scalar_lea.vmem %s1229_s26, 144  ;;  %s8661_s28 = scalar_lea.vmem %s1229_s26, 160 }
 0x14c   : > { %p8655_p1 = scmp.ne.s32.totalorder %s1229_s26, %s8654_s2  ;;  %p8662_p9 = scmp.lt.s32.totalorder %s1229_s26, %s1229_s26 }
 0x14d   : > { %p8663_p4 = scmp.lt.s32.totalorder %s8661_s28, %s8654_s2 }
 0x14e   : > { %p8657_p2 = pnand %p8655_p1, %p9272_p13 }
 0x14f   : > { %7804 = dma.hbm_to_vmem [thread:$0]  (!%p9264_p12), %s10136_s3, 16, %s1205_s23, [#allocation21]  }
 0x150   : > { %p8658_p3 = pneg %p8657_p2  ;;  %p8664_p5 = por %p8663_p4, %p8662_p9 }
 0x152   : > { %p8665_p6 = pnand %p8664_p5, %p8658_p3 }
 0x154   : > { %8668 = shalt.err (!%p8665_p6)
}
 0x155   : > { %s8975_s1 = smov 16   ;;  %s10137_s12 = sld [smem:[#allocation76_spill]] }
 0x156   : > { %s8976_s10 = smov 1   ;;  %s8977_s23 = smov [#allocation28]  }
 0x157   : > { %s1253_s8 = sshll.u32 %s8977_s23, 4  ;;  %s8978_s3 = smov [#allocation31]   ;;  %s1254_s8 = int_to_ptr.vmem [resolvable:$true] %s1253_s8 }
 0x158   : > { %s1278_s18 = sshll.u32 %s8978_s3, 4  ;;  %s8680_s4 = scalar_lea.vmem %s1254_s8, 16  ;;  %s1279_s18 = int_to_ptr.vmem [resolvable:$true] %s1278_s18 }
 0x159   : > { %p8681_p10 = scmp.ne.s32.totalorder %s1254_s8, %s8680_s4  ;;  %s8687_s2 = scalar_lea.vmem %s1254_s8, 32 }
 0x15a   : > { %p8688_p11 = scmp.lt.s32.totalorder %s1254_s8, %s1254_s8  ;;  %p8689_p0 = scmp.lt.s32.totalorder %s8687_s2, %s8680_s4 }
 0x15b   : > { %7810 = dma.hbm_to_vmem [thread:$0]  (!%p9264_p12), %s10137_s12, 144, %s1229_s26, [#allocation24], %s8975_s1, %s8975_s1, %s8976_s10  }
 0x15c   : > { %p8683_p7 = pnand %p8681_p10, %p9272_p13  ;;  %p8690_p1 = por %p8689_p0, %p8688_p11 }
 0x15e   : > { %p8684_p8 = pneg %p8683_p7 }
 0x160   : > { %p8691_p2 = pnand %p8690_p1, %p8684_p8 }
 0x162   : > { %8694 = shalt.err (!%p8691_p2)
}
 0x163   : > { %s10138_s26 = sld [smem:[#allocation78_spill]]  ;;  %s8706_s28 = scalar_lea.vmem %s1279_s18, 48 }
 0x164   : > { %p8707_p3 = scmp.ne.s32.totalorder %s1279_s18, %s8706_s28  ;;  %s8713_s1 = scalar_lea.vmem %s1279_s18, 64 }
 0x165   : > { %p8714_p5 = scmp.lt.s32.totalorder %s1279_s18, %s1279_s18  ;;  %p8715_p6 = scmp.lt.s32.totalorder %s8713_s1, %s8706_s28 }
 0x166   : > { %p8709_p9 = pnand %p8707_p3, %p9272_p13 }
 0x167   : > { %p8716_p10 = por %p8715_p6, %p8714_p5 }
 0x168   : > { %p8710_p4 = pneg %p8709_p9 }
 0x169   : > { %7816 = dma.hbm_to_vmem [thread:$0]  (!%p9264_p12), %s10138_s26, 16, %s1254_s8, [#allocation27]  }
 0x16a   : > { %p8717_p7 = pnand %p8716_p10, %p8710_p4 }
 0x16c   : > { %8720 = shalt.err (!%p8717_p7)
}
 0x16d   : > { %s10139_s4 = sld [smem:[#allocation80_spill]]  ;;  %s8979_s12 = smov [#allocation34]  }
 0x16e   : > { %s1303_s10 = sshll.u32 %s8979_s12, 4  ;;  %s8980_s23 = smov [#allocation37]   ;;  %s1304_s10 = int_to_ptr.vmem [resolvable:$true] %s1303_s10 }
 0x16f   : > { %s1328_s8 = sshll.u32 %s8980_s23, 4  ;;  %s8732_s3 = scalar_lea.vmem %s1304_s10, 16  ;;  %s1329_s8 = int_to_ptr.vmem [resolvable:$true] %s1328_s8 }
 0x170   : > { %p8733_p8 = scmp.ne.s32.totalorder %s1304_s10, %s8732_s3  ;;  %s8739_s2 = scalar_lea.vmem %s1304_s10, 32 }
 0x171   : > { %p8740_p1 = scmp.lt.s32.totalorder %s1304_s10, %s1304_s10  ;;  %p8741_p2 = scmp.lt.s32.totalorder %s8739_s2, %s8732_s3 }
 0x172   : > { %p8735_p11 = pnand %p8733_p8, %p9272_p13 }
 0x173   : > { %7822 = dma.hbm_to_vmem [thread:$0]  (!%p9264_p12), %s10139_s4, 48, %s1279_s18, [#allocation30]  }
 0x174   : > { %p8736_p0 = pneg %p8735_p11  ;;  %p8742_p3 = por %p8741_p2, %p8740_p1 }
 0x176   : > { %p8743_p9 = pnand %p8742_p3, %p8736_p0 }
 0x178   : > { %8746 = shalt.err (!%p8743_p9)
}
 0x179   : > { %s10140_s18 = sld [smem:[#allocation82_spill]]  ;;  %s8758_s26 = scalar_lea.vmem %s1329_s8, 16 }
 0x17a   : > { %p8759_p4 = scmp.ne.s32.totalorder %s1329_s8, %s8758_s26  ;;  %s8765_s28 = scalar_lea.vmem %s1329_s8, 32 }
 0x17b   : > { %p8766_p10 = scmp.lt.s32.totalorder %s1329_s8, %s1329_s8  ;;  %p8767_p7 = scmp.lt.s32.totalorder %s8765_s28, %s8758_s26 }
 0x17c   : > { %p8761_p5 = pnand %p8759_p4, %p9272_p13 }
 0x17d   : > { %p8768_p8 = por %p8767_p7, %p8766_p10 }
 0x17e   : > { %p8762_p6 = pneg %p8761_p5 }
 0x17f   : > { %7828 = dma.hbm_to_vmem [thread:$0]  (!%p9264_p12), %s10140_s18, 16, %s1304_s10, [#allocation33]  }
 0x180   : > { %p8769_p11 = pnand %p8768_p8, %p8762_p6 }
 0x182   : > { %8772 = shalt.err (!%p8769_p11)
}
 0x183   : > { %s10141_s1 = sld [smem:[#allocation84_spill]]  ;;  %s8981_s4 = smov [#allocation40]  }
 0x184   : > { %s1356_s12 = sshll.u32 %s8981_s4, 4  ;;  %s1357_s12 = int_to_ptr.vmem [resolvable:$true] %s1356_s12 }
 0x185   : > { %s8784_s10 = scalar_lea.vmem %s1357_s12, 16  ;;  %s8791_s23 = scalar_lea.vmem %s1357_s12, 32 }
 0x186   : > { %p8785_p0 = scmp.ne.s32.totalorder %s1357_s12, %s8784_s10  ;;  %p8792_p3 = scmp.lt.s32.totalorder %s1357_s12, %s1357_s12 }
 0x187   : > { %p8793_p9 = scmp.lt.s32.totalorder %s8791_s23, %s8784_s10 }
 0x188   : > { %p8787_p1 = pnand %p8785_p0, %p9272_p13 }
 0x189   : > { %7834 = dma.hbm_to_vmem [thread:$0]  (!%p9264_p12), %s10141_s1, 16, %s1329_s8, [#allocation36]  }
 0x18a   : > { %p8788_p2 = pneg %p8787_p1  ;;  %p8794_p4 = por %p8793_p9, %p8792_p3 }
 0x18c   : > { %p8795_p5 = pnand %p8794_p4, %p8788_p2 }
 0x18e   : > { %8798 = shalt.err (!%p8795_p5)
}
 0x18f   : > { %7840 = dma.hbm_to_vmem [thread:$0]  (!%p9264_p12), %s9200_s20, 16, %s1357_s12, [#allocation39]  }
 0x190   : > { %p10142_p6 = scmp.ne.s32.totalorder %s10124_s11, 0 }
 0x191   : > { %p10143_p10 = scmp.eq.s32.totalorder (!%p10142_p6), %s9228_s22, 0 }
 0x192   : > { %1376 = sbr.rel (%p10142_p6) target bundleno = 5167 (0x142f), region = 188 }
 0x197   : > { %8842 = dma.done.wait (%p10143_p10), [#allocation3], 16   ;;  %p10144_p7 = pmov %p10143_p10 }
 0x199   : > { %8844 = vsyncadd (%p10144_p7), [#allocation3], 4294967280  ;;  %p10145_p13 = pmov %p10144_p7 }
 0x19a   : > { %p10146_p8 = pmov %p10144_p7 }
 0x19b   : > { %8846 = dma.done.wait (%p10145_p13), [#allocation6], 32  }
 0x19c   : > { %8848 = vsyncadd (%p10146_p8), [#allocation6], 4294967264  ;;  %p10147_p11 = pmov %p10144_p7 }
 0x19d   : > { %p10148_p12 = pmov %p10144_p7 }
 0x19e   : > { %8850 = dma.done.wait (%p10147_p11), [#allocation9], 32  }
 0x19f   : > { %8852 = vsyncadd (%p10148_p12), [#allocation9], 4294967264  ;;  %p10149_p0 = pmov %p10144_p7 }
 0x1a1   : > { %8854 = dma.done.wait (%p10149_p0), [#allocation12], 32   ;;  %p10150_p1 = pmov %p10149_p0 }
 0x1a2   : > { %p10151_p2 = pmov %p10149_p0 }
 0x1a3   : > { %8856 = vsyncadd (%p10150_p1), [#allocation12], 4294967264 }
 0x1a4   : > { %8858 = dma.done.wait (%p10151_p2), [#allocation15], 32   ;;  %p10152_p3 = pmov %p10149_p0 }
 0x1a5   : > { %p10153_p9 = pmov %p10149_p0 }
 0x1a6   : > { %8860 = vsyncadd (%p10152_p3), [#allocation15], 4294967264 }
 0x1a7   : > { %8862 = dma.done.wait (%p10153_p9), [#allocation18], 32   ;;  %p10154_p4 = pmov %p10149_p0 }
 0x1a8   : > { %p10155_p5 = pmov %p10149_p0 }
 0x1a9   : > { %8864 = vsyncadd (%p10154_p4), [#allocation18], 4294967264 }
 0x1aa   : > { %8866 = dma.done.wait (%p10155_p5), [#allocation21], 32   ;;  %p10156_p6 = pmov %p10149_p0 }
 0x1ab   : > { %p10157_p10 = pmov %p10149_p0 }
 0x1ac   : > { %8868 = vsyncadd (%p10156_p6), [#allocation21], 4294967264 }
 0x1ad   : > { %8870 = dma.done.wait (%p10157_p10), [#allocation24], 160   ;;  %p10158_p7 = pmov %p10149_p0 }
 0x1ae   : > { %p10159_p13 = pmov %p10149_p0 }
 0x1af   : > { %8872 = vsyncadd (%p10158_p7), [#allocation24], 4294967136 }
 0x1b0   : > { %8874 = dma.done.wait (%p10159_p13), [#allocation27], 32   ;;  %p10160_p8 = pmov %p10149_p0 }
 0x1b1   : > { %p10161_p11 = pmov %p10149_p0 }
 0x1b2   : > { %8876 = vsyncadd (%p10160_p8), [#allocation27], 4294967264 }
 0x1b3   : > { %8878 = dma.done.wait (%p10161_p11), [#allocation30], 64   ;;  %p10162_p12 = pmov %p10149_p0 }
 0x1b5   : > { %8880 = vsyncadd (%p10162_p12), [#allocation30], 4294967232 }
 0x1b6   : > { %8882 = dma.done.wait (%p10149_p0), [#allocation33], 32   ;;  %p10163_p1 = pmov %p10149_p0 }
 0x1b7   : > { %p10164_p2 = pmov %p10149_p0 }
 0x1b8   : > { %8884 = vsyncadd (%p10163_p1), [#allocation33], 4294967264 }
 0x1b9   : > { %8886 = dma.done.wait (%p10164_p2), [#allocation36], 32   ;;  %p10165_p3 = pmov %p10149_p0 }
 0x1ba   : > { %p10166_p9 = pmov %p10149_p0 }
 0x1bb   : > { %8888 = vsyncadd (%p10165_p3), [#allocation36], 4294967264 }
 0x1bc   : > { %8890 = dma.done.wait (%p10166_p9), [#allocation39], 32   ;;  %p10167_p4 = pmov %p10149_p0 }
 0x1bd   : > { %s10168_s15 = sld [smem:[#allocation57_spill]]  ;;  %v8982_v0 = vmov 0.0   ;;  %vm8983_vm0 = vmmov 0   ;;  %p1572_p5 = scmp.lt.s32.totalorder %s9228_s22, 1  ;;  %v6739_v28 = vld [vmem:[#allocation2] ss:$0 sm:$0xff] }
 0x1be   : > { %8892 = vsyncadd (%p10167_p4), [#allocation39], 4294967264  ;;  %7224 = vmatprep.subr.bf16.mxu0 %v8982_v0  ;;  %7240 = vmatprep.mubr.msk.bf16.mxu0 %vm8983_vm0, %v8982_v0  ;;  %s10170_s0 = sld [smem:[#allocation56_spill]]  ;;  %v6740_v30 = vld [vmem:[#allocation5] ss:$0 sm:$0xff]  ;;  %vm1740_vm1 = vcmask 64512  }
 0x1bf   : > { %7244 = vmatprep.subr.mxu1 %v8982_v0  ;;  %7246 = vmatprep.mubr.msk.f32.mxu1 %vm8983_vm0, %v8982_v0  ;;  %s1573_s8 = scalar_select %p1572_p5, %s9228_s22, 1  ;;  %vm4328_vm2 = vcmask 1041408   ;;  %vm4381_vm3 = vcmask 15360   ;;  %vm5466_vm4 = vcmask 523264   ;;  %vm5543_vm5 = vcmask 9216  }
 0x1c0   : > { %s10171_s2 = sld [smem:[#allocation58_spill]]  ;;  %p10190_p10 = scmp.ne.s32.totalorder %s10121_s7, 0 }
 0x1c1   : > { %s6729_s3 = sshll.u32 %s1573_s8, 3  ;;  %s10172_s26 = sld [smem:[#allocation60_spill]] }
 0x1c2   : > { %s10173_s28 = sld [smem:[#allocation59_spill]] }
 0x1c3   : > { %s10169_s11 = smov %s10168_s15  ;;  %v8001_v1 = vld [vmem:[%s10168_s15 + $0x38] sm:$0xff]   ;;  %s10174_s1 = sld [smem:[#allocation63_spill]] }
 0x1c4   : > { %7225 = vmatpush3.bf16.msra.mxu0 %v8001_v1  ;;  %v8002_v2 = vld [vmem:[%s10169_s11 + $0x30] sm:$0xff]   ;;  %v8003_v3 = vld [vmem:[%s10169_s11 + $0x28] sm:$0xff]   ;;  %v8004_v4 = vld [vmem:[%s10169_s11 + $0x20] sm:$0xff]   ;;  %s1575_s18 = scalar_lea.vmem %s10170_s0, %s6729_s3  ;;  %s10175_s4 = sld [smem:[#allocation64_spill]] }
 0x1c5   : > { %7226 = vmatprep.subr.bf16.mxu0 %v8982_v0  ;;  %v8005_v5 = vld [vmem:[%s10169_s11 + $0x18] sm:$0xff]   ;;  %v8006_v6 = vld [vmem:[%s10169_s11 + $0x10] sm:$0xff]   ;;  %v8007_v7 = vld [vmem:[%s10169_s11 + $0x8] sm:$0xff]   ;;  %s10176_s12 = sld [smem:[#allocation68_spill]] }
 0x1c6   : > { %v8008_v8 = vld [vmem:[%s10169_s11] sm:$0xff]   ;;  %s10177_s10 = sld [smem:[#allocation70_spill]] }
 0x1c7   : > { %v1577_v9 = vld [vmem:[%s1575_s18] sm:$0xff]  ;;  %v6773_v56 = vld [vmem:[%s10172_s26 + $0x8] ss:$0 sm:$0xff]  ;;  %s10178_s23 = sld [smem:[#allocation73_spill]]  ;;  %s8985_s18 = smov 64  }
 0x1c8   : > { %7227 = vmatpush3.bf16.msra.mxu0 %v8002_v2  ;;  %v1594_v10 = vpack.c.bf16 %v1577_v9, %v1577_v9  ;;  %v6730_v11 = vld [vmem:[%s10171_s2] ss:$0 sm:$0xff]  ;;  %v6744_v32 = vld [vmem:[%s10172_s26 + $0x1] ss:$0 sm:$0xff]  ;;  %v9495_v36 = vld [vmem:[%s10173_s28 + $0x8] sm:$0xff]  ;;  %s10179_s15 = sld [smem:[#allocation72_spill]] }
 0x1c9   : > { %7228 = vmatprep.subr.bf16.mxu0 %v8982_v0  ;;  %v6741_v34 = vld [vmem:[%s10172_s26] ss:$0 sm:$0xff]  ;;  %v6749_v38 = vld [vmem:[%s10172_s26 + $0x2] ss:$0 sm:$0xff]  ;;  %v6753_v41 = vld [vmem:[%s10172_s26 + $0x3] ss:$0 sm:$0xff] }
 0x1ca   : > { %v9505_v39 = vld [vmem:[%s10173_s28] sm:$0xff]  ;;  %v9515_v42 = vld [vmem:[%s10173_s28 + $0x10] sm:$0xff]  ;;  %v9525_v45 = vld [vmem:[%s10173_s28 + $0x18] sm:$0xff]  ;;  %s10181_s0 = sld [smem:[#allocation75_spill]] }
 0x1cb   : > { %v6757_v44 = vld [vmem:[%s10172_s26 + $0x4] ss:$0 sm:$0xff]  ;;  %v6761_v47 = vld [vmem:[%s10172_s26 + $0x5] ss:$0 sm:$0xff]  ;;  %v6765_v50 = vld [vmem:[%s10172_s26 + $0x6] ss:$0 sm:$0xff] }
 0x1cc   : > { %7229 = vmatpush3.bf16.msra.mxu0 %v8003_v3  ;;  %v9535_v48 = vld [vmem:[%s10173_s28 + $0x20] sm:$0xff]  ;;  %v9545_v51 = vld [vmem:[%s10173_s28 + $0x28] sm:$0xff]  ;;  %v9555_v54 = vld [vmem:[%s10173_s28 + $0x30] sm:$0xff]  ;;  %s10183_s2 = sld [smem:[#allocation79_spill]] }
 0x1cd   : > { %7230 = vmatprep.subr.bf16.mxu0 %v8982_v0  ;;  %v6769_v53 = vld [vmem:[%s10172_s26 + $0x7] ss:$0 sm:$0xff]  ;;  %v9565_v57 = vld [vmem:[%s10173_s28 + $0x38] sm:$0xff]  ;;  %v8010_v61 = vld [vmem:[%s10174_s1 + $0x30] sm:$0xff]  }
 0x1ce   : > { %v9574_v59 = vld [vmem:[%s10173_s28 + $0x40] sm:$0xff]  ;;  %v8009_v60 = vld [vmem:[%s10174_s1 + $0x38] sm:$0xff]   ;;  %v8011_v62 = vld [vmem:[%s10174_s1 + $0x28] sm:$0xff]   ;;  %s10180_s8 = smov %s10179_s15 }
 0x1cf   : > { %v8012_v63 = vld [vmem:[%s10174_s1 + $0x20] sm:$0xff]   ;;  %v8013_v1 = vld [vmem:[%s10174_s1 + $0x18] sm:$0xff]   ;;  %v8014_v2 = vld [vmem:[%s10174_s1 + $0x10] sm:$0xff]  }
 0x1d0   : > { %7231 = vmatpush3.bf16.msra.mxu0 %v8004_v4  ;;  %v8015_v3 = vld [vmem:[%s10174_s1 + $0x8] sm:$0xff]   ;;  %v8016_v4 = vld [vmem:[%s10174_s1] sm:$0xff]   ;;  %s10182_s3 = smov %s10181_s0 }
 0x1d1   : > { %7232 = vmatprep.subr.bf16.mxu0 %v8982_v0 }
 0x1d4   : > { %7233 = vmatpush3.bf16.msra.mxu0 %v8005_v5 }
 0x1d5   : > { %7234 = vmatprep.subr.bf16.mxu0 %v8982_v0 }
 0x1d8   : > { %7235 = vmatpush3.bf16.msra.mxu0 %v8006_v6 }
 0x1d9   : > { %7236 = vmatprep.subr.bf16.mxu0 %v8982_v0 }
 0x1dc   : > { %7237 = vmatpush3.bf16.msra.mxu0 %v8007_v7 }
 0x1dd   : > { %7238 = vmatprep.subr.bf16.mxu0 %v8982_v0 }
 0x1e0   : > { %7239 = vmatpush3.bf16.msra.mxu0 %v8008_v8 }
 0x1e1   : > { %7289 = vmatprep.subr.bf16.mxu0 %v8982_v0 }
 0x1e3   : > { %7241 = vmatmul.mubr.bf16.vlgmr.msra.gmra.mxu0 %v1594_v10 }
 0x1e4   : > { %7305 = vmatprep.mubr.msk.bf16.mxu0 %vm8983_vm0, %v8982_v0  ;;  %7290 = vmatpush3.bf16.msra.mxu0 %v8009_v60  ;;  %v6796_v60 = vld [vmem:[%s10175_s4 + $0x3] ss:$0 sm:$0xff] }
 0x1e5   : > { %7291 = vmatprep.subr.bf16.mxu0 %v8982_v0 }
 0x1e8   : > { %7292 = vmatpush3.bf16.msra.mxu0 %v8010_v61  ;;  %v6799_v61 = vld [vmem:[%s10175_s4 + $0x4] ss:$0 sm:$0xff] }
 0x1e9   : > { %7293 = vmatprep.subr.bf16.mxu0 %v8982_v0 }
 0x1ec   : > { %7294 = vmatpush3.bf16.msra.mxu0 %v8011_v62  ;;  %v6802_v62 = vld [vmem:[%s10175_s4 + $0x5] ss:$0 sm:$0xff] }
 0x1ed   : > { %7295 = vmatprep.subr.bf16.mxu0 %v8982_v0 }
 0x1f0   : > { %7296 = vmatpush3.bf16.msra.mxu0 %v8012_v63  ;;  %v6805_v63 = vld [vmem:[%s10175_s4 + $0x6] ss:$0 sm:$0xff] }
 0x1f1   : > { %7297 = vmatprep.subr.bf16.mxu0 %v8982_v0 }
 0x1f4   : > { %7298 = vmatpush3.bf16.msra.mxu0 %v8013_v1  ;;  %v6808_v1 = vld [vmem:[%s10175_s4 + $0x7] ss:$0 sm:$0xff] }
 0x1f5   : > { %7299 = vmatprep.subr.bf16.mxu0 %v8982_v0 }
 0x1f8   : > { %7300 = vmatpush3.bf16.msra.mxu0 %v8014_v2  ;;  %v6811_v2 = vld [vmem:[%s10175_s4 + $0x8] ss:$0 sm:$0xff] }
 0x1f9   : > { %7301 = vmatprep.subr.bf16.mxu0 %v8982_v0 }
 0x1fc   : > { %7302 = vmatpush3.bf16.msra.mxu0 %v8015_v3  ;;  %v8019_v3 = vld [vmem:[%s10176_s12 + $0x28] sm:$0xff]  }
 0x1fd   : > { %7303 = vmatprep.subr.bf16.mxu0 %v8982_v0 }
 0x200   : > { %7304 = vmatpush3.bf16.msra.mxu0 %v8016_v4  ;;  %v8020_v4 = vld [vmem:[%s10176_s12 + $0x20] sm:$0xff]  }
 0x201   : > { %7354 = vmatprep.subr.bf16.mxu0 %v8982_v0 }
 0x2a3   : > { %v1684_v12 = vpop.f32.mrf.mxu0 }
 0x2a4   : > { %v1685_v13 = vadd.f32 %v6730_v11, %v1684_v12 }
 0x2a5   : > { %v7242_v14 = vpop.f32.mrf.mxu0 }
 0x2a6   : > { %1690 = vadd.xlane.f32.xlu0 %v1685_v13  ;;  %v1693_v16 = vmul.f32 %v1685_v13, %v1685_v13 }
 0x2a7   : > { %v1687_v15 = vpop.f32.mrf.mxu0 }
 0x2a9   : > { %v7243_v17 = vpop.f32.mrf.mxu0 }
 0x2aa   : > { %1694 = vadd.xlane.f32.xlu0 %v1693_v16 }
 0x32f   : > { %v1691_v18 = vpop.xlane.xlu0 %1690 }
 0x330   : > { %v1692_v19 = vmul.f32 0.015625, %v1691_v18 }
 0x332   : > { %v1697_v21 = vmul.f32 %v1692_v19, %v1692_v19  ;;  %v1700_v26 = vsub.f32 %v1685_v13, %v1692_v19 }
 0x333   : > { %v1695_v20 = vpop.xlane.xlu0 %1694 }
 0x334   : > { %v1696_v22 = vmul.f32 0.015625, %v1695_v20 }
 0x336   : > { %v1698_v23 = vsub.f32 %v1696_v22, %v1697_v21 }
 0x338   : > { %v1699_v24 = vmax.f32 %v1698_v23, 0.0 }
 0x33a   : > { %v1701_v25 = vadd.f32 1e-05, %v1699_v24 }
 0x33c   : > { %8129 = vrsqrt.f32 %v1701_v25 }
 0x349   : > { %v8130_v27 = vpop.eup %8129 }
 0x34a   : > { %v1703_v29 = vmul.f32 %v8130_v27, %v1700_v26 }
 0x34c   : > { %v1711_v31 = vmul.f32 %v6739_v28, %v1703_v29  ;;  %v6775_v29 = vld [vmem:[#allocation7] ss:$0 sm:$0xff] }
 0x34e   : > { %v9490_v33 = vadd.f32 %v6740_v30, %v1711_v31 }
 0x350   : > { %v1739_v35 = vmul.f32 %v6744_v32, %v9490_v33  ;;  %v1728_v37 = vmul.f32 %v6741_v34, %v9490_v33  ;;  %v1897_v40 = vmul.f32 %v6749_v38, %v9490_v33  ;;  %v1982_v43 = vmul.f32 %v6753_v41, %v9490_v33  ;;  %v6776_v34 = vld [vmem:[#allocation8] ss:$0 sm:$0xff] }
 0x351   : > { %v2067_v46 = vmul.f32 %v6757_v44, %v9490_v33  ;;  %v2152_v49 = vmul.f32 %v6761_v47, %v9490_v33  ;;  %v2237_v52 = vmul.f32 %v6765_v50, %v9490_v33  ;;  %v2322_v55 = vmul.f32 %v6769_v53, %v9490_v33  ;;  %v6787_v50 = vld [vmem:[%s10175_s4] ss:$0 sm:$0xff] }
 0x352   : > { %7245 = vmatpush3.msra.mxu1 %v1739_v35  ;;  %v2407_v58 = vmul.f32 %v6773_v56, %v9490_v33  ;;  %v6793_v56 = vld [vmem:[%s10175_s4 + $0x2] ss:$0 sm:$0xff] }
 0x353   : > { %7247 = vmatmul.mubr.msk.f32.vlgmr.msra.gmra.mxu1 %vm1740_vm1, %v9495_v36  ;;  %7249 = vmatprep.subr.mxu1 %v8982_v0 }
 0x354   : > { %7250 = vmatpush3.msra.mxu1 %v1728_v37  ;;  %7251 = vmatprep.mubr.msk.f32.mxu1 %vm8983_vm0, %v8982_v0  ;;  %v6777_v37 = vld [vmem:[#allocation10] ss:$0 sm:$0xff] }
 0x355   : > { %7254 = vmatprep.subr.mxu1 %v8982_v0 }
 0x357   : > { %7252 = vmatmul.mubr.msk.f32.vlgmr.msra.gmra.mxu1 %vm1740_vm1, %v9505_v39 }
 0x358   : > { %7255 = vmatpush3.msra.mxu1 %v1897_v40  ;;  %7256 = vmatprep.mubr.msk.f32.mxu1 %vm8983_vm0, %v8982_v0 }
 0x359   : > { %7259 = vmatprep.subr.mxu1 %v8982_v0 }
 0x35b   : > { %7257 = vmatmul.mubr.msk.f32.vlgmr.msra.gmra.mxu1 %vm1740_vm1, %v9515_v42 }
 0x35c   : > { %7260 = vmatpush3.msra.mxu1 %v1982_v43  ;;  %7261 = vmatprep.mubr.msk.f32.mxu1 %vm8983_vm0, %v8982_v0  ;;  %v6778_v43 = vld [vmem:[#allocation11] ss:$0 sm:$0xff] }
 0x35d   : > { %7264 = vmatprep.subr.mxu1 %v8982_v0 }
 0x35f   : > { %7262 = vmatmul.mubr.msk.f32.vlgmr.msra.gmra.mxu1 %vm1740_vm1, %v9525_v45 }
 0x360   : > { %7265 = vmatpush3.msra.mxu1 %v2067_v46  ;;  %7266 = vmatprep.mubr.msk.f32.mxu1 %vm8983_vm0, %v8982_v0  ;;  %v6789_v46 = vld [vmem:[%s10175_s4 + $0x1] ss:$0 sm:$0xff] }
 0x361   : > { %7269 = vmatprep.subr.mxu1 %v8982_v0 }
 0x363   : > { %7267 = vmatmul.mubr.msk.f32.vlgmr.msra.gmra.mxu1 %vm1740_vm1, %v9535_v48 }
 0x364   : > { %7270 = vmatpush3.msra.mxu1 %v2152_v49  ;;  %7271 = vmatprep.mubr.msk.f32.mxu1 %vm8983_vm0, %v8982_v0 }
 0x365   : > { %7274 = vmatprep.subr.mxu1 %v8982_v0 }
 0x367   : > { %7272 = vmatmul.mubr.msk.f32.vlgmr.msra.gmra.mxu1 %vm1740_vm1, %v9545_v51 }
 0x368   : > { %7275 = vmatpush3.msra.mxu1 %v2237_v52  ;;  %7276 = vmatprep.mubr.msk.f32.mxu1 %vm8983_vm0, %v8982_v0 }
 0x369   : > { %7279 = vmatprep.subr.mxu1 %v8982_v0 }
 0x36b   : > { %7277 = vmatmul.mubr.msk.f32.vlgmr.msra.gmra.mxu1 %vm1740_vm1, %v9555_v54 }
 0x36c   : > { %7280 = vmatpush3.msra.mxu1 %v2322_v55  ;;  %7281 = vmatprep.mubr.msk.f32.mxu1 %vm8983_vm0, %v8982_v0 }
 0x36d   : > { %7284 = vmatprep.subr.mxu1 %v8982_v0 }
 0x36f   : > { %7282 = vmatmul.mubr.msk.f32.vlgmr.msra.gmra.mxu1 %vm1740_vm1, %v9565_v57 }
 0x370   : > { %7285 = vmatpush3.msra.mxu1 %v2407_v58  ;;  %7286 = vmatprep.mubr.msk.f32.mxu1 %vm8983_vm0, %v8982_v0 }
 0x371   : > { %7309 = vmatprep.subr.mxu1 %v8982_v0 }
 0x373   : > { %7287 = vmatmul.mubr.msk.f32.vlgmr.msra.gmra.mxu1 %vm1740_vm1, %v9574_v59 }
 0x374   : > { %7311 = vmatprep.mubr.msk.f32.mxu1 %vm8983_vm0, %v8982_v0 }
 0x413   : > { %v1810_v5 = vpop.f32.mrf.mxu1 }
 0x415   : > { %v7248_v6 = vpop.f32.mrf.mxu1 }
 0x416   : > { %v8023_v6 = vld [vmem:[%s10176_s12 + $0x8] sm:$0xff]  }
 0x417   : > { %v1883_v7 = vpop.f32.mrf.mxu1 }
 0x418   : > { %v1884_v15 = vadd.f32 %v1883_v7, %v1810_v5  ;;  %v8022_v5 = vld [vmem:[%s10176_s12 + $0x10] sm:$0xff]   ;;  %v8024_v7 = vld [vmem:[%s10176_s12] sm:$0xff]  }
 0x419   : > { %v7253_v8 = vpop.f32.mrf.mxu1 }
 0x41b   : > { %v1967_v9 = vpop.f32.mrf.mxu1 }
 0x41c   : > { %v1971_v17 = vadd.f32 %v1967_v9, %v1884_v15 }
 0x41d   : > { %v7258_v10 = vpop.f32.mrf.mxu1 }
 0x41f   : > { %v2052_v11 = vpop.f32.mrf.mxu1 }
 0x420   : > { %v2056_v19 = vadd.f32 %v2052_v11, %v1971_v17 }
 0x421   : > { %v7263_v12 = vpop.f32.mrf.mxu1 }
 0x423   : > { %v2137_v13 = vpop.f32.mrf.mxu1 }
 0x424   : > { %v2141_v21 = vadd.f32 %v2137_v13, %v2056_v19 }
 0x425   : > { %v7268_v14 = vpop.f32.mrf.mxu1 }
 0x427   : > { %v2222_v16 = vpop.f32.mrf.mxu1 }
 0x428   : > { %v2226_v23 = vadd.f32 %v2222_v16, %v2141_v21 }
 0x429   : > { %v7273_v18 = vpop.f32.mrf.mxu1 }
 0x42b   : > { %v2307_v20 = vpop.f32.mrf.mxu1 }
 0x42c   : > { %v2311_v25 = vadd.f32 %v2307_v20, %v2226_v23 }
 0x42d   : > { %v7278_v22 = vpop.f32.mrf.mxu1 }
 0x42f   : > { %v2392_v24 = vpop.f32.mrf.mxu1 }
 0x430   : > { %v2396_v27 = vadd.f32 %v2392_v24, %v2311_v25 }
 0x431   : > { %v7283_v26 = vpop.f32.mrf.mxu1 }
 0x433   : > { %v2477_v28 = vpop.f32.mrf.mxu1 }
 0x434   : > { %v2481_v30 = vadd.f32 %v2477_v28, %v2396_v27 }
 0x435   : > { %v7288_v31 = vpop.f32.mrf.mxu1 }
 0x436   : > { %v2489_v32 = vadd.f32 %v6775_v29, %v2481_v30 }
 0x438   : > { %v9598_v35 = vadd.f32 %v2489_v32, %v9490_v33  ;;  %v6813_v32 = vld [vmem:[#allocation13] ss:$0 sm:$0xff] }
 0x43a   : > { %v2498_v38 = vmul.f32 %v6776_v34, %v9598_v35 }
 0x43c   : > { %v2506_v40 = vadd.f32 %v6777_v37, %v2498_v38 }
 0x43e   : > { %v2523_v41 = vpack.c.bf16 %v2506_v40, %v2506_v40  ;;  %v6814_v40 = vld [vmem:[#allocation14] ss:$0 sm:$0xff] }
 0x440   : > { %7306 = vmatmul.mubr.bf16.vlgmr.msra.gmra.mxu0 %v2523_v41 }
 0x441   : > { %7370 = vmatprep.mubr.msk.bf16.mxu0 %vm8983_vm0, %v8982_v0 }
 0x500   : > { %v2613_v44 = vpop.f32.mrf.mxu0 }
 0x501   : > { %v2614_v47 = vadd.f32 %v6778_v43, %v2613_v44  ;;  %v6815_v43 = vld [vmem:[#allocation16] ss:$0 sm:$0xff] }
 0x502   : > { %v7307_v49 = vpop.f32.mrf.mxu0 }
 0x503   : > { %v2635_v52 = vmul.f32 %v6789_v46, %v2614_v47  ;;  %v2626_v53 = vmul.f32 %v6787_v50, %v2614_v47  ;;  %v2784_v58 = vmul.f32 %v6793_v56, %v2614_v47  ;;  %v8025_v49 = vld [vmem:[%s10177_s10 + $0x38] sm:$0xff]   ;;  %v8026_v50 = vld [vmem:[%s10177_s10 + $0x30] sm:$0xff]   ;;  %v8032_v56 = vld [vmem:[%s10177_s10] sm:$0xff]  }
 0x504   : > { %v2616_v33 = vpop.f32.mrf.mxu0 }
 0x505   : > { %7310 = vmatpush3.msra.mxu1 %v2635_v52  ;;  %v8028_v52 = vld [vmem:[%s10177_s10 + $0x20] sm:$0xff]   ;;  %v8029_v33 = vld [vmem:[%s10177_s10 + $0x18] sm:$0xff]  }
 0x506   : > { %v7308_v55 = vpop.f32.mrf.mxu0  ;;  %7312 = vmatmul.mubr.msk.f32.vlgmr.msra.gmra.mxu1 %vm1740_vm1, %v9495_v36  ;;  %7314 = vmatprep.subr.mxu1 %v8982_v0  ;;  %v2864_v36 = vmul.f32 %v6796_v60, %v2614_v47 }
 0x507   : > { %7315 = vmatpush3.msra.mxu1 %v2626_v53  ;;  %7316 = vmatprep.mubr.msk.f32.mxu1 %vm8983_vm0, %v8982_v0  ;;  %v8030_v53 = vld [vmem:[%s10177_s10 + $0x10] sm:$0xff]   ;;  %v8031_v55 = vld [vmem:[%s10177_s10 + $0x8] sm:$0xff]  }
 0x508   : > { %7319 = vmatprep.subr.mxu1 %v8982_v0 }
 0x50a   : > { %7317 = vmatmul.mubr.msk.f32.vlgmr.msra.gmra.mxu1 %vm1740_vm1, %v9505_v39  ;;  %v2944_v39 = vmul.f32 %v6799_v61, %v2614_v47 }
 0x50b   : > { %7320 = vmatpush3.msra.mxu1 %v2784_v58  ;;  %7321 = vmatprep.mubr.msk.f32.mxu1 %vm8983_vm0, %v8982_v0  ;;  %v6816_v58 = vld [vmem:[#allocation17] ss:$0 sm:$0xff] }
 0x50c   : > { %7324 = vmatprep.subr.mxu1 %v8982_v0 }
 0x50e   : > { %7322 = vmatmul.mubr.msk.f32.vlgmr.msra.gmra.mxu1 %vm1740_vm1, %v9515_v42  ;;  %v3024_v42 = vmul.f32 %v6802_v62, %v2614_v47 }
 0x50f   : > { %7325 = vmatpush3.msra.mxu1 %v2864_v36  ;;  %7326 = vmatprep.mubr.msk.f32.mxu1 %vm8983_vm0, %v8982_v0 }
 0x510   : > { %7329 = vmatprep.subr.mxu1 %v8982_v0 }
 0x512   : > { %7327 = vmatmul.mubr.msk.f32.vlgmr.msra.gmra.mxu1 %vm1740_vm1, %v9525_v45  ;;  %v3104_v45 = vmul.f32 %v6805_v63, %v2614_v47 }
 0x513   : > { %7330 = vmatpush3.msra.mxu1 %v2944_v39  ;;  %7331 = vmatprep.mubr.msk.f32.mxu1 %vm8983_vm0, %v8982_v0 }
 0x514   : > { %7334 = vmatprep.subr.mxu1 %v8982_v0 }
 0x516   : > { %7332 = vmatmul.mubr.msk.f32.vlgmr.msra.gmra.mxu1 %vm1740_vm1, %v9535_v48  ;;  %v3184_v48 = vmul.f32 %v6808_v1, %v2614_v47 }
 0x517   : > { %7335 = vmatpush3.msra.mxu1 %v3024_v42  ;;  %7336 = vmatprep.mubr.msk.f32.mxu1 %vm8983_vm0, %v8982_v0 }
 0x518   : > { %7339 = vmatprep.subr.mxu1 %v8982_v0 }
 0x51a   : > { %7337 = vmatmul.mubr.msk.f32.vlgmr.msra.gmra.mxu1 %vm1740_vm1, %v9545_v51  ;;  %v3264_v51 = vmul.f32 %v6811_v2, %v2614_v47 }
 0x51b   : > { %7340 = vmatpush3.msra.mxu1 %v3104_v45  ;;  %7341 = vmatprep.mubr.msk.f32.mxu1 %vm8983_vm0, %v8982_v0 }
 0x51c   : > { %7344 = vmatprep.subr.mxu1 %v8982_v0 }
 0x51e   : > { %7342 = vmatmul.mubr.msk.f32.vlgmr.msra.gmra.mxu1 %vm1740_vm1, %v9555_v54  ;;  %v8017_v54 = vld [vmem:[%s10176_s12 + $0x38] sm:$0xff]  }
 0x51f   : > { %7345 = vmatpush3.msra.mxu1 %v3184_v48  ;;  %7346 = vmatprep.mubr.msk.f32.mxu1 %vm8983_vm0, %v8982_v0 }
 0x520   : > { %7349 = vmatprep.subr.mxu1 %v8982_v0  ;;  %7355 = vmatpush3.bf16.msra.mxu0 %v8017_v54 }
 0x521   : > { %7356 = vmatprep.subr.bf16.mxu0 %v8982_v0 }
 0x522   : > { %7347 = vmatmul.mubr.msk.f32.vlgmr.msra.gmra.mxu1 %vm1740_vm1, %v9565_v57  ;;  %v8018_v57 = vld [vmem:[%s10176_s12 + $0x30] sm:$0xff]  }
 0x523   : > { %7350 = vmatpush3.msra.mxu1 %v3264_v51  ;;  %7351 = vmatprep.mubr.msk.f32.mxu1 %vm8983_vm0, %v8982_v0 }
 0x524   : > { %7374 = vmatprep.subr.bf16.mxu1 %v8982_v0  ;;  %7357 = vmatpush3.bf16.msra.mxu0 %v8018_v57 }
 0x525   : > { %7358 = vmatprep.subr.bf16.mxu0 %v8982_v0 }
 0x526   : > { %7352 = vmatmul.mubr.msk.f32.vlgmr.msra.gmra.mxu1 %vm1740_vm1, %v9574_v59  ;;  %v8021_v59 = vld [vmem:[%s10176_s12 + $0x18] sm:$0xff]  }
 0x527   : > { %7390 = vmatprep.mubr.msk.bf16.mxu1 %vm8983_vm0, %v8982_v0  ;;  %7375 = vmatpush3.bf16.msra.mxu1 %v8025_v49  ;;  %v8055_v49 = vld [vmem:[%s10178_s23 + $0xe8] sm:$0xff]  }
 0x528   : > { %7359 = vmatpush3.bf16.msra.mxu0 %v8019_v3  ;;  %7376 = vmatprep.subr.bf16.mxu1 %v8982_v0 }
 0x529   : > { %7360 = vmatprep.subr.bf16.mxu0 %v8982_v0 }
 0x52b   : > { %7377 = vmatpush3.bf16.msra.mxu1 %v8026_v50  ;;  %v8056_v50 = vld [vmem:[%s10178_s23 + $0x98] sm:$0xff]  }
 0x52c   : > { %7361 = vmatpush3.bf16.msra.mxu0 %v8020_v4  ;;  %7378 = vmatprep.subr.bf16.mxu1 %v8982_v0  ;;  %v8034_v4 = vld [vmem:[%s10178_s23 + $0x78] sm:$0xff]  }
 0x52d   : > { %7362 = vmatprep.subr.bf16.mxu0 %v8982_v0 }
 0x530   : > { %7363 = vmatpush3.bf16.msra.mxu0 %v8021_v59  ;;  %v8036_v59 = vld [vmem:[%s10178_s23 + $0x70] sm:$0xff]  }
 0x531   : > { %7364 = vmatprep.subr.bf16.mxu0 %v8982_v0 }
 0x534   : > { %7365 = vmatpush3.bf16.msra.mxu0 %v8022_v5  ;;  %v8038_v5 = vld [vmem:[%s10178_s23 + $0x68] sm:$0xff]  }
 0x535   : > { %7366 = vmatprep.subr.bf16.mxu0 %v8982_v0 }
 0x538   : > { %7367 = vmatpush3.bf16.msra.mxu0 %v8023_v6  ;;  %v8040_v6 = vld [vmem:[%s10178_s23 + $0x60] sm:$0xff]  }
 0x539   : > { %7368 = vmatprep.subr.bf16.mxu0 %v8982_v0 }
 0x53c   : > { %7369 = vmatpush3.bf16.msra.mxu0 %v8024_v7  ;;  %v8042_v7 = vld [vmem:[%s10178_s23 + $0x58] sm:$0xff]  }
 0x53d   : > { %7394 = vmatprep.subr.mxu0 %v8982_v0 }
 0x5c6   : > { %v2702_v8 = vpop.f32.mrf.mxu1 }
 0x5c8   : > { %v7313_v9 = vpop.f32.mrf.mxu1 }
 0x5c9   : > { %v8046_v9 = vld [vmem:[%s10178_s23 + $0x48] sm:$0xff]  }
 0x5ca   : > { %v2772_v10 = vpop.f32.mrf.mxu1 }
 0x5cb   : > { %v2773_v18 = vadd.f32 %v2772_v10, %v2702_v8  ;;  %v8044_v8 = vld [vmem:[%s10178_s23 + $0x50] sm:$0xff]  }
 0x5cc   : > { %v7318_v11 = vpop.f32.mrf.mxu1 }
 0x5cd   : > { %v6833_v11 = vld [vmem:[#allocation19] ss:$0 sm:$0xff] }
 0x5ce   : > { %v2851_v12 = vpop.f32.mrf.mxu1 }
 0x5cf   : > { %v2855_v20 = vadd.f32 %v2851_v12, %v2773_v18  ;;  %v6835_v18 = vld [vmem:[%s10180_s8 + $0x2] sm:$0x3] }
 0x5d0   : > { %v7323_v13 = vpop.f32.mrf.mxu1 }
 0x5d2   : > { %v2931_v14 = vpop.f32.mrf.mxu1 }
 0x5d3   : > { %v2935_v22 = vadd.f32 %v2931_v14, %v2855_v20  ;;  %v8035_v20 = vld [vmem:[%s10178_s23 + $0x30] sm:$0xff]  }
 0x5d4   : > { %v7328_v15 = vpop.f32.mrf.mxu1 }
 0x5d5   : > { %v3596_v15 = vld [vmem:[%s10179_s15] sm:$0x3]  ;;  %s10184_s15 = sld [smem:[#allocation81_spill]] }
 0x5d6   : > { %v3011_v16 = vpop.f32.mrf.mxu1 }
 0x5d7   : > { %v3015_v24 = vadd.f32 %v3011_v16, %v2935_v22  ;;  %v8039_v22 = vld [vmem:[%s10178_s23 + $0x20] sm:$0xff]  }
 0x5d8   : > { %v7333_v17 = vpop.f32.mrf.mxu1 }
 0x5da   : > { %v3091_v19 = vpop.f32.mrf.mxu1 }
 0x5db   : > { %v3095_v26 = vadd.f32 %v3091_v19, %v3015_v24  ;;  %v8033_v19 = vld [vmem:[%s10178_s23 + $0x38] sm:$0xff]   ;;  %v8043_v24 = vld [vmem:[%s10178_s23 + $0x10] sm:$0xff]   ;;  %s10185_s1 = smov %s10184_s15 }
 0x5dc   : > { %v7338_v21 = vpop.f32.mrf.mxu1 }
 0x5dd   : > { %v8037_v21 = vld [vmem:[%s10178_s23 + $0x28] sm:$0xff]  }
 0x5de   : > { %v3171_v23 = vpop.f32.mrf.mxu1 }
 0x5df   : > { %v3175_v28 = vadd.f32 %v3171_v23, %v3095_v26  ;;  %v8041_v23 = vld [vmem:[%s10178_s23 + $0x18] sm:$0xff]   ;;  %v8047_v26 = vld [vmem:[%s10178_s23] sm:$0xff]  }
 0x5e0   : > { %v7343_v25 = vpop.f32.mrf.mxu1 }
 0x5e1   : > { %v8045_v25 = vld [vmem:[%s10178_s23 + $0x8] sm:$0xff]  }
 0x5e2   : > { %v3251_v27 = vpop.f32.mrf.mxu1 }
 0x5e3   : > { %v3255_v30 = vadd.f32 %v3251_v27, %v3175_v28  ;;  %v8048_v27 = vld [vmem:[%s10178_s23 + $0x40] sm:$0xff]  }
 0x5e4   : > { %v7348_v29 = vpop.f32.mrf.mxu1 }
 0x5e5   : > { %v8049_v29 = vld [vmem:[%s10178_s23 + $0xb8] sm:$0xff]  }
 0x5e6   : > { %v3331_v31 = vpop.f32.mrf.mxu1 }
 0x5e7   : > { %v3335_v34 = vadd.f32 %v3331_v31, %v3255_v30 }
 0x5e8   : > { %v7353_v37 = vpop.f32.mrf.mxu1 }
 0x5e9   : > { %v3343_v38 = vadd.f32 %v6813_v32, %v3335_v34  ;;  %v8050_v37 = vld [vmem:[%s10178_s23 + $0xb0] sm:$0xff]  }
 0x5eb   : > { %v9674_v41 = vadd.f32 %v3343_v38, %v9598_v35  ;;  %v8027_v35 = vld [vmem:[%s10177_s10 + $0x28] sm:$0xff]  }
 0x5ec   : > { %7379 = vmatpush3.bf16.msra.mxu1 %v8027_v35  ;;  %v8057_v35 = vld [vmem:[%s10178_s23 + $0xe0] sm:$0xff]  }
 0x5ed   : > { %v3352_v44 = vmul.f32 %v6814_v40, %v9674_v41  ;;  %7380 = vmatprep.subr.bf16.mxu1 %v8982_v0  ;;  %v8052_v40 = vld [vmem:[%s10178_s23 + $0xa8] sm:$0xff]  }
 0x5ef   : > { %v3360_v46 = vadd.f32 %v6815_v43, %v3352_v44  ;;  %v8054_v43 = vld [vmem:[%s10178_s23 + $0xa0] sm:$0xff]  }
 0x5f0   : > { %7381 = vmatpush3.bf16.msra.mxu1 %v8028_v52  ;;  %v6895_v44 = vld [vmem:[%s10180_s8 + $0x6] sm:$0x3]  ;;  %v8058_v52 = vld [vmem:[%s10178_s23 + $0x90] sm:$0xff]  }
 0x5f1   : > { %v3377_v47 = vpack.c.bf16 %v3360_v46, %v3360_v46  ;;  %7382 = vmatprep.subr.bf16.mxu1 %v8982_v0  ;;  %v8051_v46 = vld [vmem:[%s10178_s23 + $0xf8] sm:$0xff]  }
 0x5f3   : > { %7371 = vmatmul.mubr.bf16.vlgmr.msra.gmra.mxu0 %v3377_v47  ;;  %v8053_v47 = vld [vmem:[%s10178_s23 + $0xf0] sm:$0xff]  }
 0x5f4   : > { %7396 = vmatprep.mubr.msk.f32.mxu0 %vm8983_vm0, %v8982_v0  ;;  %7383 = vmatpush3.bf16.msra.mxu1 %v8029_v33  ;;  %v8059_v33 = vld [vmem:[%s10178_s23 + $0xd8] sm:$0xff]  }
 0x5f5   : > { %7384 = vmatprep.subr.bf16.mxu1 %v8982_v0 }
 0x5f8   : > { %7385 = vmatpush3.bf16.msra.mxu1 %v8030_v53  ;;  %v8060_v53 = vld [vmem:[%s10178_s23 + $0x88] sm:$0xff]  }
 0x5f9   : > { %7386 = vmatprep.subr.bf16.mxu1 %v8982_v0 }
 0x5fc   : > { %7387 = vmatpush3.bf16.msra.mxu1 %v8031_v55  ;;  %v8061_v55 = vld [vmem:[%s10178_s23 + $0xd0] sm:$0xff]  }
 0x5fd   : > { %7388 = vmatprep.subr.bf16.mxu1 %v8982_v0 }
 0x600   : > { %7389 = vmatpush3.bf16.msra.mxu1 %v8032_v56  ;;  %v8062_v56 = vld [vmem:[%s10178_s23 + $0x80] sm:$0xff]  }
 0x601   : > { %7404 = vmatprep.subr.bf16.mxu1 %v8982_v0 }
 0x6b3   : > { %v3467_v60 = vpop.f32.mrf.mxu0 }
 0x6b4   : > { %v3468_v36 = vadd.f32 %v6816_v58, %v3467_v60  ;;  %v8063_v58 = vld [vmem:[%s10178_s23 + $0xc8] sm:$0xff]   ;;  %v8064_v60 = vld [vmem:[%s10178_s23 + $0xc0] sm:$0xff]  }
 0x6b5   : > { %v7372_v61 = vpop.f32.mrf.mxu0 }
 0x6b6   : > { %v3473_v39 = vmul.f32 %v3468_v36, %v3468_v36 }
 0x6b7   : > { %v3470_v62 = vpop.f32.mrf.mxu0 }
 0x6b8   : > { %v3474_v42 = vmul.f32 %v3473_v39, %v3468_v36 }
 0x6b9   : > { %v7373_v63 = vpop.f32.mrf.mxu0 }
 0x6ba   : > { %v3475_v45 = vmul.f32 0.044715, %v3474_v42 }
 0x6bc   : > { %v3476_v1 = vadd.f32 %v3475_v45, %v3468_v36 }
 0x6be   : > { %v3477_v48 = vmul.f32 0.7978846, %v3476_v1 }
 0x6c0   : > { %8131 = vtanh.f32 %v3477_v48 }
 0x6cd   : > { %v8132_v2 = vpop.eup %8131 }
 0x6ce   : > { %v3479_v51 = vadd.f32 1.0, %v8132_v2 }
 0x6d0   : > { %v3480_v54 = vmul.f32 0.5, %v3479_v51 }
 0x6d2   : > { %v3481_v57 = vmul.f32 %v3480_v54, %v3468_v36 }
 0x6d4   : > { %v3498_v3 = vpack.c.bf16 %v3481_v57, %v3481_v57 }
 0x6d6   : > { %7391 = vmatmul.mubr.bf16.vlgmr.msra.gmra.mxu1 %v3498_v3 }
 0x6d7   : > { %7420 = vmatprep.mubr.msk.bf16.mxu1 %vm8983_vm0, %v8982_v0  ;;  %7405 = vmatpush3.bf16.msra.mxu1 %v8034_v4 }
 0x6d8   : > { %7406 = vmatprep.subr.bf16.mxu1 %v8982_v0 }
 0x6db   : > { %7407 = vmatpush3.bf16.msra.mxu1 %v8036_v59 }
 0x6dc   : > { %7408 = vmatprep.subr.bf16.mxu1 %v8982_v0 }
 0x6df   : > { %7409 = vmatpush3.bf16.msra.mxu1 %v8038_v5 }
 0x6e0   : > { %7410 = vmatprep.subr.bf16.mxu1 %v8982_v0 }
 0x6e3   : > { %7411 = vmatpush3.bf16.msra.mxu1 %v8040_v6 }
 0x6e4   : > { %7412 = vmatprep.subr.bf16.mxu1 %v8982_v0 }
 0x6e7   : > { %7413 = vmatpush3.bf16.msra.mxu1 %v8042_v7 }
 0x6e8   : > { %7414 = vmatprep.subr.bf16.mxu1 %v8982_v0 }
 0x6eb   : > { %7415 = vmatpush3.bf16.msra.mxu1 %v8044_v8 }
 0x6ec   : > { %7416 = vmatprep.subr.bf16.mxu1 %v8982_v0 }
 0x6ef   : > { %7417 = vmatpush3.bf16.msra.mxu1 %v8046_v9  ;;  %v6921_v9 = vld [vmem:[#allocation20] ss:$0 sm:$0xff] }
 0x6f0   : > { %7418 = vmatprep.subr.bf16.mxu1 %v8982_v0 }
 0x6f3   : > { %7419 = vmatpush3.bf16.msra.mxu1 %v8048_v27 }
 0x6f4   : > { %7444 = vmatprep.subr.mxu1 %v8982_v0 }
 0x796   : > { %v3581_v10 = vpop.f32.mrf.mxu1 }
 0x797   : > { %v3587_v12 = vadd.f32 %v3581_v10, %v9674_v41  ;;  %v6869_v41 = vld [vmem:[%s10180_s8 + $0x4] sm:$0x3] }
 0x798   : > { %v7392_v13 = vpop.f32.mrf.mxu1 }
 0x799   : > { %v9712_v14 = vadd.f32 %v6833_v11, %v3587_v12 }
 0x79a   : > { %v3584_v16 = vpop.f32.mrf.mxu1 }
 0x79b   : > { %7395 = vmatpush3.msra.mxu0 %v9712_v14 }
 0x79c   : > { %v7393_v17 = vpop.f32.mrf.mxu1  ;;  %7397 = vmatmul.mubr.msk.f32.vlgmr.msra.gmra.mxu0 %vm1740_vm1, %v3596_v15  ;;  %7399 = vmatprep.subr.mxu0 %v8982_v0 }
 0x79d   : > { %7400 = vmatpush3.msra.mxu0 %v9712_v14  ;;  %7401 = vmatprep.mubr.msk.f32.mxu0 %vm8983_vm0, %v8982_v0 }
 0x79e   : > { %7424 = vmatprep.subr.bf16.mxu0 %v8982_v0 }
 0x7a0   : > { %7402 = vmatmul.mubr.msk.f32.vlgmr.msra.gmra.mxu0 %vm1740_vm1, %v6835_v18 }
 0x7a1   : > { %7425 = vmatpush3.bf16.msra.mxu0 %v8033_v19  ;;  %7440 = vmatprep.mubr.msk.bf16.mxu0 %vm8983_vm0, %v8982_v0 }
 0x7a2   : > { %7426 = vmatprep.subr.bf16.mxu0 %v8982_v0 }
 0x7a5   : > { %7427 = vmatpush3.bf16.msra.mxu0 %v8035_v20 }
 0x7a6   : > { %7428 = vmatprep.subr.bf16.mxu0 %v8982_v0 }
 0x7a9   : > { %7429 = vmatpush3.bf16.msra.mxu0 %v8037_v21 }
 0x7aa   : > { %7430 = vmatprep.subr.bf16.mxu0 %v8982_v0 }
 0x7ad   : > { %7431 = vmatpush3.bf16.msra.mxu0 %v8039_v22 }
 0x7ae   : > { %7432 = vmatprep.subr.bf16.mxu0 %v8982_v0 }
 0x7b1   : > { %7433 = vmatpush3.bf16.msra.mxu0 %v8041_v23 }
 0x7b2   : > { %7434 = vmatprep.subr.bf16.mxu0 %v8982_v0 }
 0x7b5   : > { %7435 = vmatpush3.bf16.msra.mxu0 %v8043_v24 }
 0x7b6   : > { %7436 = vmatprep.subr.bf16.mxu0 %v8982_v0 }
 0x7b9   : > { %7437 = vmatpush3.bf16.msra.mxu0 %v8045_v25 }
 0x7ba   : > { %7438 = vmatprep.subr.bf16.mxu0 %v8982_v0 }
 0x7bd   : > { %7439 = vmatpush3.bf16.msra.mxu0 %v8047_v26 }
 0x7be   : > { %7449 = vmatprep.subr.bf16.mxu0 %v8982_v0 }
 0x85c   : > { %v3666_v28 = vpop.f32.mrf.mxu0 }
 0x85d   : > { %v3686_v30 = vpack.c.bf16 %v3666_v28, %v3666_v28 }
 0x85e   : > { %v7398_v31 = vpop.f32.mrf.mxu0 }
 0x85f   : > { %7441 = vmatmul.mubr.bf16.vlgmr.msra.gmra.mxu0 %v3686_v30  ;;  %v6923_v31 = vld [vmem:[#allocation23] ss:$0 sm:$0xff] }
 0x860   : > { %v3758_v32 = vpop.f32.mrf.mxu0  ;;  %7450 = vmatpush3.bf16.msra.mxu0 %v8049_v29  ;;  %7465 = vmatprep.mubr.msk.bf16.mxu0 %vm8983_vm0, %v8982_v0  ;;  %v6922_v29 = vld [vmem:[#allocation22] ss:$0 sm:$0xff] }
 0x861   : > { %v3779_v34 = vpack.c.bf16 %v3758_v32, %v3758_v32  ;;  %7451 = vmatprep.subr.bf16.mxu0 %v8982_v0 }
 0x862   : > { %v7403_v38 = vpop.f32.mrf.mxu0 }
 0x863   : > { %7421 = vmatmul.mubr.bf16.vlgmr.msra.gmra.mxu1 %v3779_v34  ;;  %v6926_v34 = vld [vmem:[#allocation25 + $0x1] ss:$0 sm:$0xff] }
 0x864   : > { %7445 = vmatpush3.msra.mxu1 %v9712_v14  ;;  %7446 = vmatprep.mubr.msk.f32.mxu1 %vm8983_vm0, %v8982_v0 }
 0x865   : > { %7469 = vmatprep.subr.mxu1 %v8982_v0  ;;  %7452 = vmatpush3.bf16.msra.mxu0 %v8050_v37  ;;  %v6932_v37 = vld [vmem:[#allocation25 + $0x2] ss:$0 sm:$0xff] }
 0x866   : > { %7453 = vmatprep.subr.bf16.mxu0 %v8982_v0 }
 0x869   : > { %7454 = vmatpush3.bf16.msra.mxu0 %v8052_v40  ;;  %v6924_v40 = vld [vmem:[#allocation25] ss:$0 sm:$0xff] }
 0x86a   : > { %7455 = vmatprep.subr.bf16.mxu0 %v8982_v0 }
 0x86b   : > { %7447 = vmatmul.mubr.msk.f32.vlgmr.msra.gmra.mxu1 %vm1740_vm1, %v6869_v41 }
 0x86c   : > { %7470 = vmatpush3.msra.mxu1 %v9712_v14  ;;  %7471 = vmatprep.mubr.msk.f32.mxu1 %vm8983_vm0, %v8982_v0 }
 0x86d   : > { %7474 = vmatprep.subr.bf16.mxu1 %v8982_v0  ;;  %7456 = vmatpush3.bf16.msra.mxu0 %v8054_v43 }
 0x86e   : > { %7457 = vmatprep.subr.bf16.mxu0 %v8982_v0 }
 0x86f   : > { %7472 = vmatmul.mubr.msk.f32.vlgmr.msra.gmra.mxu1 %vm1740_vm1, %v6895_v44  ;;  %v6925_v44 = vld [vmem:[%s10181_s0 + $0x2] sm:$0x3]  ;;  %s10186_s0 = sld [smem:[#allocation83_spill]] }
 0x870   : > { %7475 = vmatpush3.bf16.msra.mxu1 %v8051_v46  ;;  %7490 = vmatprep.mubr.msk.bf16.mxu1 %vm8983_vm0, %v8982_v0  ;;  %v6940_v46 = vld [vmem:[#allocation25 + $0x4] ss:$0 sm:$0xff] }
 0x871   : > { %7476 = vmatprep.subr.bf16.mxu1 %v8982_v0  ;;  %7458 = vmatpush3.bf16.msra.mxu0 %v8056_v50 }
 0x872   : > { %7459 = vmatprep.subr.bf16.mxu0 %v8982_v0 }
 0x874   : > { %7477 = vmatpush3.bf16.msra.mxu1 %v8053_v47  ;;  %v6931_v47 = vld [vmem:[%s10182_s3 + $0x4] sm:$0x3] }
 0x875   : > { %7478 = vmatprep.subr.bf16.mxu1 %v8982_v0  ;;  %7460 = vmatpush3.bf16.msra.mxu0 %v8058_v52  ;;  %v6948_v52 = vld [vmem:[#allocation25 + $0x6] ss:$0 sm:$0xff] }
 0x876   : > { %7461 = vmatprep.subr.bf16.mxu0 %v8982_v0 }
 0x878   : > { %7479 = vmatpush3.bf16.msra.mxu1 %v8055_v49 }
 0x879   : > { %7480 = vmatprep.subr.bf16.mxu1 %v8982_v0  ;;  %7462 = vmatpush3.bf16.msra.mxu0 %v8060_v53  ;;  %v6939_v53 = vld [vmem:[%s10182_s3 + $0x8] sm:$0x3] }
 0x87a   : > { %7463 = vmatprep.subr.bf16.mxu0 %v8982_v0 }
 0x87c   : > { %7481 = vmatpush3.bf16.msra.mxu1 %v8057_v35  ;;  %v6936_v35 = vld [vmem:[#allocation25 + $0x3] ss:$0 sm:$0xff] }
 0x87d   : > { %7482 = vmatprep.subr.bf16.mxu1 %v8982_v0  ;;  %7464 = vmatpush3.bf16.msra.mxu0 %v8062_v56 }
 0x87e   : > { %7494 = vmatprep.subr.mxu0 %v8982_v0 }
 0x880   : > { %7483 = vmatpush3.bf16.msra.mxu1 %v8059_v33  ;;  %v4361_v33 = vld [vmem:[%s10182_s3] sm:$0x3] }
 0x881   : > { %7484 = vmatprep.subr.bf16.mxu1 %v8982_v0 }
 0x884   : > { %7485 = vmatpush3.bf16.msra.mxu1 %v8061_v55 }
 0x885   : > { %7486 = vmatprep.subr.bf16.mxu1 %v8982_v0 }
 0x888   : > { %7487 = vmatpush3.bf16.msra.mxu1 %v8063_v58  ;;  %v6944_v58 = vld [vmem:[#allocation25 + $0x5] ss:$0 sm:$0xff] }
 0x889   : > { %7488 = vmatprep.subr.bf16.mxu1 %v8982_v0 }
 0x88c   : > { %7489 = vmatpush3.bf16.msra.mxu1 %v8064_v60  ;;  %v6956_v60 = vld [vmem:[#allocation25 + $0x8] ss:$0 sm:$0xff] }
 0x88d   : > { %7504 = vmatprep.subr.mxu1 %v8982_v0 }
 0x91f   : > { %v3950_v36 = vpop.f32.mrf.mxu0 }
 0x921   : > { %v7442_v61 = vpop.f32.mrf.mxu0 }
 0x922   : > { %v6947_v61 = vld [vmem:[%s10182_s3 + $0xc] sm:$0x3] }
 0x923   : > { %v3862_v39 = vpop.f32.mrf.mxu1  ;;  %v3953_v62 = vpop.f32.mrf.mxu0 }
 0x924   : > { %v3951_v42 = vadd.f32 %v3950_v36, %v3862_v39  ;;  %v6935_v36 = vld [vmem:[%s10182_s3 + $0x6] sm:$0x3] }
 0x925   : > { %v7422_v63 = vpop.f32.mrf.mxu1  ;;  %v7443_v45 = vpop.f32.mrf.mxu0 }
 0x926   : > { %v6943_v63 = vld [vmem:[%s10182_s3 + $0xa] sm:$0x3]  ;;  %v6955_v45 = vld [vmem:[%s10182_s3 + $0x10] sm:$0x3] }
 0x927   : > { %v3865_v1 = vpop.f32.mrf.mxu1 }
 0x929   : > { %v7423_v48 = vpop.f32.mrf.mxu1 }
 0x92a   : > { %v6951_v48 = vld [vmem:[%s10182_s3 + $0xe] sm:$0x3] }
 0x92b   : > { %v4027_v2 = vpop.f32.mrf.mxu1 }
 0x92c   : > { %v4048_v51 = vpack.c.bf16 %v4027_v2, %v4027_v2 }
 0x92d   : > { %v7448_v54 = vpop.f32.mrf.mxu1 }
 0x92e   : > { %7466 = vmatmul.mubr.bf16.vlgmr.msra.gmra.mxu0 %v4048_v51 }
 0x92f   : > { %v4209_v57 = vpop.f32.mrf.mxu1  ;;  %7496 = vmatprep.mubr.msk.f32.mxu0 %vm8983_vm0, %v8982_v0 }
 0x930   : > { %v4230_v3 = vpack.c.bf16 %v4209_v57, %v4209_v57 }
 0x931   : > { %v7473_v4 = vpop.f32.mrf.mxu1 }
 0x932   : > { %7491 = vmatmul.mubr.bf16.vlgmr.msra.gmra.mxu1 %v4230_v3 }
 0x933   : > { %7506 = vmatprep.mubr.msk.f32.mxu1 %vm8983_vm0, %v8982_v0 }
 0x9ee   : > { %v4131_v59 = vpop.f32.mrf.mxu0 }
 0x9ef   : > { %v4137_v6 = vadd.f32 %v4131_v59, %v3951_v42  ;;  %v6952_v42 = vld [vmem:[#allocation25 + $0x7] ss:$0 sm:$0xff] }
 0x9f0   : > { %v7467_v5 = vpop.f32.mrf.mxu0 }
 0x9f2   : > { %v4134_v7 = vpop.f32.mrf.mxu0  ;;  %v4313_v8 = vpop.f32.mrf.mxu1 }
 0x9f3   : > { %v4319_v10 = vadd.f32 %v4313_v8, %v4137_v6 }
 0x9f4   : > { %v7468_v11 = vpop.f32.mrf.mxu0  ;;  %v7492_v12 = vpop.f32.mrf.mxu1 }
 0x9f5   : > { %v4327_v13 = vadd.f32 %v6921_v9, %v4319_v10 }
 0x9f6   : > { %v4316_v14 = vpop.f32.mrf.mxu1 }
 0x9f7   : > { %v4329_v15 = vsel %vm4328_vm2, %v4327_v13, 0.0  ;;  %v4333_v16 = vmul.f32 %v4327_v13, %v4327_v13 }
 0x9f8   : > { %v7493_v17 = vpop.f32.mrf.mxu1  ;;  %4330 = vadd.xlane.f32.xlu1 %v4329_v15 }
 0x9f9   : > { %v4334_v18 = vsel %vm4328_vm2, %v4333_v16, 0.0 }
 0x9fc   : > { %4335 = vadd.xlane.f32.xlu1 %v4334_v18 }
 0xa81   : > { %v4331_v19 = vpop.xlane.xlu1 %4330 }
 0xa82   : > { %v4332_v20 = vmul.f32 0.0078125, %v4331_v19 }
 0xa84   : > { %v4338_v22 = vmul.f32 %v4332_v20, %v4332_v20  ;;  %v4341_v27 = vsub.f32 %v4327_v13, %v4332_v20 }
 0xa85   : > { %v4336_v21 = vpop.xlane.xlu1 %4335 }
 0xa86   : > { %v4337_v23 = vmul.f32 0.0078125, %v4336_v21 }
 0xa88   : > { %v4339_v24 = vsub.f32 %v4337_v23, %v4338_v22  ;;  %v6959_v22 = vld [vmem:[#allocation26] ss:$0 sm:$0xff] }
 0xa8a   : > { %v4340_v25 = vmax.f32 %v4339_v24, 0.0 }
 0xa8c   : > { %v4342_v26 = vadd.f32 1e-05, %v4340_v25 }
 0xa8e   : > { %8133 = vrsqrt.f32 %v4342_v26 }
 0xa9b   : > { %v8134_v28 = vpop.eup %8133 }
 0xa9c   : > { %v4344_v30 = vmul.f32 %v8134_v28, %v4341_v27 }
 0xa9e   : > { %v4352_v32 = vmul.f32 %v6922_v29, %v4344_v30  ;;  %v8067_v30 = vld [vmem:[%s10183_s2 + $0xac] ss:$12 sps:$4 sm:$0xff]  }
 0xaa0   : > { %v9798_v38 = vadd.f32 %v6923_v31, %v4352_v32  ;;  %v8065_v31 = vld [vmem:[%s10183_s2 + $0xa8] ss:$12 sps:$4 sm:$0xff]   ;;  %v8068_v32 = vld [vmem:[%s10183_s2 + $0xb0] ss:$12 sps:$4 sm:$0xff]  }
 0xaa2   : > { %v4380_v41 = vmul.f32 %v6926_v34, %v9798_v38  ;;  %v4544_v43 = vmul.f32 %v6932_v37, %v9798_v38  ;;  %v4369_v49 = vmul.f32 %v6924_v40, %v9798_v38  ;;  %v4720_v50 = vmul.f32 %v6940_v46, %v9798_v38  ;;  %v8071_v34 = vld [vmem:[%s10183_s2 + $0x94] ss:$12 sps:$4 sm:$0xff]   ;;  %v8069_v37 = vld [vmem:[%s10183_s2 + $0x90] ss:$12 sps:$4 sm:$0xff]  }
 0xaa3   : > { %v4632_v55 = vmul.f32 %v6936_v35, %v9798_v38  ;;  %v4896_v56 = vmul.f32 %v6948_v52, %v9798_v38  ;;  %v4808_v39 = vmul.f32 %v6944_v58, %v9798_v38  ;;  %v5072_v62 = vmul.f32 %v6956_v60, %v9798_v38  ;;  %v8075_v40 = vld [vmem:[%s10183_s2 + $0x7c] ss:$12 sps:$4 sm:$0xff]   ;;  %v8079_v46 = vld [vmem:[%s10183_s2 + $0x64] ss:$12 sps:$4 sm:$0xff]   ;;  %v8087_v52 = vld [vmem:[%s10183_s2 + $0x34] ss:$12 sps:$4 sm:$0xff]  }
 0xaa4   : > { %7495 = vmatpush3.msk.msra.mxu0 %vm4328_vm2, %v4380_v41  ;;  %7505 = vmatpush3.msk.msra.mxu1 %vm4328_vm2, %v4544_v43  ;;  %v4984_v1 = vmul.f32 %v6952_v42, %v9798_v38  ;;  %v8073_v41 = vld [vmem:[%s10183_s2 + $0x78] ss:$12 sps:$4 sm:$0xff]   ;;  %v8076_v43 = vld [vmem:[%s10183_s2 + $0x80] ss:$12 sps:$4 sm:$0xff]   ;;  %v8084_v35 = vld [vmem:[%s10183_s2 + $0x50] ss:$12 sps:$4 sm:$0xff]  }
 0xaa5   : > { %7497 = vmatmul.mubr.msk.f32.vlgmr.msra.gmra.mxu0 %vm4381_vm3, %v6925_v44  ;;  %7499 = vmatprep.subr.mxu0 %v8982_v0  ;;  %v8077_v44 = vld [vmem:[%s10183_s2 + $0x60] ss:$12 sps:$4 sm:$0xff]   ;;  %v8089_v58 = vld [vmem:[%s10183_s2 + $0x18] ss:$12 sps:$4 sm:$0xff]  }
 0xaa6   : > { %7507 = vmatmul.mubr.msk.f32.vlgmr.msra.gmra.mxu1 %vm4381_vm3, %v6931_v47  ;;  %7514 = vmatprep.subr.mxu1 %v8982_v0  ;;  %v8080_v47 = vld [vmem:[%s10183_s2 + $0x68] ss:$12 sps:$4 sm:$0xff]   ;;  %v8092_v60 = vld [vmem:[%s10183_s2 + $0x20] ss:$12 sps:$4 sm:$0xff]  }
 0xaa7   : > { %7500 = vmatpush3.msk.msra.mxu0 %vm4328_vm2, %v4369_v49  ;;  %7515 = vmatpush3.msk.msra.mxu1 %vm4328_vm2, %v4720_v50  ;;  %v8083_v49 = vld [vmem:[%s10183_s2 + $0x4c] ss:$12 sps:$4 sm:$0xff]   ;;  %v8081_v50 = vld [vmem:[%s10183_s2 + $0x48] ss:$12 sps:$4 sm:$0xff]  }
 0xaa8   : > { %7501 = vmatprep.mubr.msk.f32.mxu0 %vm8983_vm0, %v8982_v0  ;;  %7509 = vmatprep.subr.mxu0 %v8982_v0 }
 0xaa9   : > { %7516 = vmatprep.mubr.msk.f32.mxu1 %vm8983_vm0, %v8982_v0  ;;  %7524 = vmatprep.subr.mxu1 %v8982_v0 }
 0xaaa   : > { %7502 = vmatmul.mubr.msk.f32.vlgmr.msra.gmra.mxu0 %vm4381_vm3, %v4361_v33  ;;  %7517 = vmatmul.mubr.msk.f32.vlgmr.msra.gmra.mxu1 %vm4381_vm3, %v6939_v53  ;;  %v8984_v33 = vmov 0   ;;  %v8085_v53 = vld [vmem:[%s10183_s2 + $0x30] ss:$12 sps:$4 sm:$0xff]  }
 0xaab   : > { %7510 = vmatpush3.msk.msra.mxu0 %vm4328_vm2, %v4632_v55  ;;  %7525 = vmatpush3.msk.msra.mxu1 %vm4328_vm2, %v4896_v56  ;;  %v8088_v55 = vld [vmem:[%s10183_s2 + $0x38] ss:$12 sps:$4 sm:$0xff]   ;;  %v8091_v56 = vld [vmem:[%s10183_s2 + $0x1c] ss:$12 sps:$4 sm:$0xff]  }
 0xaac   : > { %7511 = vmatprep.mubr.msk.f32.mxu0 %vm8983_vm0, %v8982_v0  ;;  %7519 = vmatprep.subr.mxu0 %v8982_v0 }
 0xaad   : > { %7526 = vmatprep.mubr.msk.f32.mxu1 %vm8983_vm0, %v8982_v0  ;;  %7534 = vmatprep.subr.mxu1 %v8982_v0 }
 0xaae   : > { %7512 = vmatmul.mubr.msk.f32.vlgmr.msra.gmra.mxu0 %vm4381_vm3, %v6935_v36  ;;  %7527 = vmatmul.mubr.msk.f32.vlgmr.msra.gmra.mxu1 %vm4381_vm3, %v6947_v61  ;;  %v8095_v36 = vld [vmem:[%s10183_s2 + $0x4] ss:$12 sps:$4 sm:$0xff]   ;;  %v8093_v61 = vld [vmem:[%s10183_s2] ss:$12 sps:$4 sm:$0xff]  }
 0xaaf   : > { %7520 = vmatpush3.msk.msra.mxu0 %vm4328_vm2, %v4808_v39  ;;  %7535 = vmatpush3.msk.msra.mxu1 %vm4328_vm2, %v5072_v62  ;;  %v8096_v39 = vld [vmem:[%s10183_s2 + $0x8] ss:$12 sps:$4 sm:$0xff]  }
 0xab0   : > { %7521 = vmatprep.mubr.msk.f32.mxu0 %vm8983_vm0, %v8982_v0  ;;  %7529 = vmatprep.subr.mxu0 %v8982_v0 }
 0xab1   : > { %7536 = vmatprep.mubr.msk.f32.mxu1 %vm8983_vm0, %v8982_v0  ;;  %7539 = vmatprep.subr.bf16.mxu1 %v8982_v0 }
 0xab2   : > { %7522 = vmatmul.mubr.msk.f32.vlgmr.msra.gmra.mxu0 %vm4381_vm3, %v6943_v63  ;;  %7537 = vmatmul.mubr.msk.f32.vlgmr.msra.gmra.mxu1 %vm4381_vm3, %v6955_v45 }
 0xab3   : > { %7530 = vmatpush3.msk.msra.mxu0 %vm4328_vm2, %v4984_v1  ;;  %7531 = vmatprep.mubr.msk.f32.mxu0 %vm8983_vm0, %v8982_v0 }
 0xab4   : > { %7555 = vmatprep.mubr.msk.bf16.mxu1 %vm8983_vm0, %v8982_v0  ;;  %5369 = vmatprep.subr.bf16.mxu0 %v8067_v30 }
 0xab5   : > { %7540 = vmatpush3.bf16.msra.mxu1 %v8068_v32 }
 0xab6   : > { %7532 = vmatmul.mubr.msk.f32.vlgmr.msra.gmra.mxu0 %vm4381_vm3, %v6951_v48  ;;  %7541 = vmatprep.subr.bf16.mxu1 %v8982_v0 }
 0xab7   : > { %5370 = vmatpush1.bf16.msra.mxu0 %v8065_v31  ;;  %5401 = vmatprep.mubr.bf16.mxu0 %v8984_v33 }
 0xab8   : > { %5371 = vmatprep.subr.bf16.mxu0 %v8071_v34 }
 0xabb   : > { %5372 = vmatpush1.bf16.msra.mxu0 %v8069_v37 }
 0xabc   : > { %5373 = vmatprep.subr.bf16.mxu0 %v8075_v40 }
 0xabf   : > { %5374 = vmatpush1.bf16.msra.mxu0 %v8073_v41 }
 0xac0   : > { %5375 = vmatprep.subr.bf16.mxu0 %v8079_v46 }
 0xac3   : > { %5376 = vmatpush1.bf16.msra.mxu0 %v8077_v44 }
 0xac4   : > { %5377 = vmatprep.subr.bf16.mxu0 %v8083_v49 }
 0xac7   : > { %5378 = vmatpush1.bf16.msra.mxu0 %v8081_v50 }
 0xac8   : > { %5379 = vmatprep.subr.bf16.mxu0 %v8087_v52 }
 0xacb   : > { %5380 = vmatpush1.bf16.msra.mxu0 %v8085_v53 }
 0xacc   : > { %5381 = vmatprep.subr.bf16.mxu0 %v8091_v56 }
 0xacf   : > { %5382 = vmatpush1.bf16.msra.mxu0 %v8089_v58 }
 0xad0   : > { %5383 = vmatprep.subr.bf16.mxu0 %v8095_v36 }
 0xad3   : > { %5384 = vmatpush1.bf16.msra.mxu0 %v8093_v61  ;;  %v8097_v61 = vld [vmem:[%s10184_s15 + $0x38] sm:$0xff]   ;;  %s1570_s15 = sand.u32 1, %s8903_s16  }
 0xad4   : > { %7559 = vmatprep.subr.mxu0 %v8982_v0  ;;  %s6326_s3 = scalar_lea.sflag [#allocation4], %s1570_s15 }
 0xb65   : > { %v4454_v2 = vpop.f32.mrf.mxu0 }
 0xb66   : > { %v4617_v51 = vpop.f32.mrf.mxu1 }
 0xb67   : > { %v7498_v54 = vpop.f32.mrf.mxu0 }
 0xb68   : > { %v7508_v57 = vpop.f32.mrf.mxu1 }
 0xb6a   : > { %v4530_v3 = vpop.f32.mrf.mxu0  ;;  %v4793_v4 = vpop.f32.mrf.mxu1 }
 0xb6b   : > { %v4531_v59 = vadd.f32 %v4530_v3, %v4454_v2  ;;  %v6960_v3 = vld [vmem:[#allocation28] ss:$0 sm:$0xff] }
 0xb6c   : > { %v7503_v5 = vpop.f32.mrf.mxu0  ;;  %v7518_v6 = vpop.f32.mrf.mxu1 }
 0xb6d   : > { %v4621_v7 = vadd.f32 %v4617_v51, %v4531_v59  ;;  %v6961_v59 = vld [vmem:[#allocation29] ss:$0 sm:$0xff] }
 0xb6e   : > { %v4705_v8 = vpop.f32.mrf.mxu0  ;;  %v4969_v9 = vpop.f32.mrf.mxu1 }
 0xb6f   : > { %v4709_v10 = vadd.f32 %v4705_v8, %v4621_v7  ;;  %v5226_v8 = vlaneseq }
 0xb70   : > { %v7513_v11 = vpop.f32.mrf.mxu0  ;;  %v7528_v12 = vpop.f32.mrf.mxu1 }
 0xb71   : > { %v4797_v13 = vadd.f32 %v4793_v4, %v4709_v10  ;;  %v5224_v12 = vld [vmem:[#allocation31] sm:$0x7] }
 0xb72   : > { %v4881_v14 = vpop.f32.mrf.mxu0  ;;  %v5145_v15 = vpop.f32.mrf.mxu1 }
 0xb73   : > { %v4885_v16 = vadd.f32 %v4881_v14, %v4797_v13 }
 0xb74   : > { %v7523_v17 = vpop.f32.mrf.mxu0  ;;  %v7538_v18 = vpop.f32.mrf.mxu1 }
 0xb75   : > { %v4973_v19 = vadd.f32 %v4969_v9, %v4885_v16  ;;  %v5227_v9 = vshrl.u32 %v5226_v8, 7 }
 0xb76   : > { %v5057_v20 = vpop.f32.mrf.mxu0 }
 0xb77   : > { %v5061_v21 = vadd.f32 %v5057_v20, %v4973_v19  ;;  %v5228_v10 = vsub.s32 0, %v5227_v9  ;;  %v5236_v11 = vsub.s32 2, %v5227_v9  ;;  %v5232_v13 = vsub.s32 1, %v5227_v9 }
 0xb78   : > { %v7533_v23 = vpop.f32.mrf.mxu0 }
 0xb79   : > { %v5149_v24 = vadd.f32 %v5145_v15, %v5061_v21  ;;  %v5229_v14 = vrot.slane %v5224_v12, %v5228_v10  ;;  %v5237_v15 = vrot.slane %v5224_v12, %v5236_v11  ;;  %v5233_v16 = vrot.slane %v5224_v12, %v5232_v13  ;;  %v7004_v11 = vld [vmem:[#allocation32] ss:$0 sm:$0xff] }
 0xb7b   : > { %v5157_v25 = vadd.f32 %v6959_v22, %v5149_v24 }
 0xb7d   : > { %v9861_v26 = vadd.f32 %v5157_v25, %v9798_v38  ;;  %v8072_v38 = vld [vmem:[%s10183_s2 + $0x98] ss:$12 sps:$4 sm:$0xff]   ;;  %s10187_s2 = smov %s10186_s0 }
 0xb7e   : > { %7542 = vmatpush3.bf16.msra.mxu1 %v8072_v38 }
 0xb7f   : > { %v5159_v27 = vsel %vm4328_vm2, %v9861_v26, 0.0  ;;  %v5163_v28 = vmul.f32 %v9861_v26, %v9861_v26  ;;  %7543 = vmatprep.subr.bf16.mxu1 %v8982_v0 }
 0xb80   : > { %5160 = vadd.xlane.f32.xlu0 %v5159_v27 }
 0xb81   : > { %v5164_v29 = vsel %vm4328_vm2, %v5163_v28, 0.0 }
 0xb82   : > { %5165 = vadd.xlane.f32.xlu1 %v5164_v29  ;;  %7544 = vmatpush3.bf16.msra.mxu1 %v8076_v43 }
 0xb83   : > { %7545 = vmatprep.subr.bf16.mxu1 %v8982_v0 }
 0xb86   : > { %7546 = vmatpush3.bf16.msra.mxu1 %v8080_v47 }
 0xb87   : > { %7547 = vmatprep.subr.bf16.mxu1 %v8982_v0 }
 0xb8a   : > { %7548 = vmatpush3.bf16.msra.mxu1 %v8084_v35 }
 0xb8b   : > { %7549 = vmatprep.subr.bf16.mxu1 %v8982_v0 }
 0xb8e   : > { %7550 = vmatpush3.bf16.msra.mxu1 %v8088_v55 }
 0xb8f   : > { %7551 = vmatprep.subr.bf16.mxu1 %v8982_v0 }
 0xb92   : > { %7552 = vmatpush3.bf16.msra.mxu1 %v8092_v60 }
 0xb93   : > { %7553 = vmatprep.subr.bf16.mxu1 %v8982_v0 }
 0xb96   : > { %7554 = vmatpush3.bf16.msra.mxu1 %v8096_v39 }
 0xb97   : > { %7564 = vmatprep.subr.mxu1 %v8982_v0 }
 0xc09   : > { %v5161_v62 = vpop.xlane.xlu0 %5160 }
 0xc0a   : > { %v5162_v42 = vmul.f32 0.0078125, %v5161_v62  ;;  %v8098_v62 = vld [vmem:[%s10185_s1 + $0x30] sm:$0xff]  }
 0xc0b   : > { %v5166_v63 = vpop.xlane.xlu1 %5165 }
 0xc0c   : > { %v5168_v45 = vmul.f32 %v5162_v42, %v5162_v42  ;;  %v5167_v1 = vmul.f32 0.0078125, %v5166_v63  ;;  %v5171_v54 = vsub.f32 %v9861_v26, %v5162_v42  ;;  %v8099_v42 = vld [vmem:[%s10185_s1 + $0x28] sm:$0xff]   ;;  %v8100_v63 = vld [vmem:[%s10185_s1 + $0x20] sm:$0xff]  }
 0xc0e   : > { %v5169_v48 = vsub.f32 %v5167_v1, %v5168_v45 }
 0xc10   : > { %v5170_v2 = vmax.f32 %v5169_v48, 0.0 }
 0xc12   : > { %v5172_v51 = vadd.f32 1e-05, %v5170_v2  ;;  %v8101_v2 = vld [vmem:[%s10185_s1 + $0x18] sm:$0xff]  }
 0xc14   : > { %8135 = vrsqrt.f32 %v5172_v51 }
 0xc21   : > { %v8136_v57 = vpop.eup %8135 }
 0xc22   : > { %v5174_v4 = vmul.f32 %v8136_v57, %v5171_v54  ;;  %v8102_v57 = vld [vmem:[%s10185_s1 + $0x10] sm:$0xff]  }
 0xc24   : > { %v5182_v5 = vmul.f32 %v6960_v3, %v5174_v4  ;;  %v8103_v3 = vld [vmem:[%s10185_s1 + $0x8] sm:$0xff]   ;;  %v8104_v4 = vld [vmem:[%s10185_s1] sm:$0xff]  }
 0xc26   : > { %v5190_v6 = vadd.f32 %v6961_v59, %v5182_v5 }
 0xc28   : > { %v5223_v7 = vpack.c.bf16 %v5190_v6, %v5190_v6 }
 0xc2a   : > { %5402 = vmatmul.mubr.bf16.vlgmr.msra.gmra.mxu0 %v5223_v7  ;;  %7556 = vmatmul.mubr.bf16.vlgmr.msra.gmra.mxu1 %v5223_v7 }
 0xc2b   : > { %7561 = vmatprep.mubr.msk.f32.mxu0 %vm8983_vm0, %v8982_v0  ;;  %7566 = vmatprep.mubr.msk.f32.mxu1 %vm8983_vm0, %v8982_v0 }
 0xcea   : > { %v5403_v17 = vpop.f32.mrf.mxu0  ;;  %v5444_v18 = vpop.f32.mrf.mxu1 }
 0xceb   : > { %v5404_v19 = vadd.f32 %v5403_v17, %v5229_v14  ;;  %v5445_v20 = vadd.f32 %v5444_v18, %v5237_v15 }
 0xcec   : > { %v5405_v21 = vpop.f32.mrf.mxu0  ;;  %v7557_v22 = vpop.f32.mrf.mxu1 }
 0xced   : > { %v5406_v23 = vadd.f32 %v5405_v21, %v5233_v16  ;;  %7565 = vmatpush3.msk.msra.mxu1 %vm4328_vm2, %v5445_v20  ;;  %5632 = vrot.lane.b32.xlu1 %v5404_v19, %s8985_s18  ;;  %v8107_v21 = vld [vmem:[%s10187_s2 + $0x28] sm:$0xff]   ;;  %v8108_v22 = vld [vmem:[%s10187_s2 + $0x20] sm:$0xff]  }
 0xcee   : > { %v5407_v24 = vpop.f32.mrf.mxu0  ;;  %v5447_v25 = vpop.f32.mrf.mxu1  ;;  %7574 = vmatprep.subr.mxu1 %v8982_v0 }
 0xcef   : > { %5634 = vrot.lane.b32.xlu0 %v5406_v23, %s8985_s18  ;;  %7560 = vmatpush3.xpose.msk.msra.mxu0 %vm5466_vm4, %v5406_v23  ;;  %v8109_v23 = vld [vmem:[%s10187_s2 + $0x18] sm:$0xff]   ;;  %v8110_v24 = vld [vmem:[%s10187_s2 + $0x10] sm:$0xff]   ;;  %v8111_v25 = vld [vmem:[%s10187_s2 + $0x8] sm:$0xff]  }
 0xcf0   : > { %v5408_v27 = vpop.f32.mrf.mxu0  ;;  %v7558_v28 = vpop.f32.mrf.mxu1  ;;  %7569 = vmatprep.subr.mxu0 %v8982_v0 }
 0xcf1   : > { %v8112_v27 = vld [vmem:[%s10187_s2] sm:$0xff]  }
 0xcf2   : > { %7562 = vmatmul.mubr.msk.f32.vlgmr.msra.gmra.mxu0 %vm5466_vm4, %v5404_v19 }
 0xcf3   : > { %7571 = vmatprep.mubr.msk.f32.mxu0 %vm8983_vm0, %v8982_v0 }
 0xd5f   : > { %v5633_v30 = vpop.permute.xlu1 %5632 }
 0xd61   : > { %v5635_v29 = vpop.permute.xlu0 %5634 }
 0xd62   : > { %7570 = vmatpush3.xpose.msk.msra.mxu0 %vm5466_vm4, %v5635_v29 }
 0xd63   : > { %7603 = vmatprep.subr.bf16.mxu0 %v8982_v0 }
 0xd65   : > { %7572 = vmatmul.mubr.msk.f32.vlgmr.msra.gmra.mxu0 %vm5466_vm4, %v5633_v30 }
 0xd66   : > { %7619 = vmatprep.mubr.msk.bf16.mxu0 %vm8983_vm0, %v8982_v0 }
 0xdb2   : > { %v5539_v31 = vpop.f32.mrf.mxu0 }
 0xdb3   : > { %v5544_v32 = vsel %vm5543_vm5, %v5539_v31, -inf }
 0xdb4   : > { %5545 = vmax.xlane.f32.xlu1 %v5544_v32  ;;  %v7563_v34 = vpop.f32.mrf.mxu0 }
 0xe25   : > { %v5706_v37 = vpop.f32.mrf.mxu0 }
 0xe26   : > { %v5710_v38 = vsel %vm5543_vm5, %v5706_v37, -inf }
 0xe27   : > { %5711 = vmax.xlane.f32.xlu0 %v5710_v38  ;;  %v7573_v40 = vpop.f32.mrf.mxu0 }
 0xe3d   : > { %v5546_v41 = vpop.xlane.xlu1 %5545 }
 0xe3e   : > { %v5547_v43 = vsub.f32 %v5539_v31, %v5546_v41 }
 0xe40   : > { %v5548_v44 = vmul.f32 1.442695, %v5547_v43  ;;  %v7005_v43 = vld [vmem:[#allocation34] ss:$0 sm:$0xff] }
 0xe42   : > { %8137 = vpow2.f32 %v5548_v44 }
 0xe4f   : > { %v8138_v46 = vpop.eup %8137 }
 0xe50   : > { %v5550_v47 = vsel %vm5543_vm5, %v8138_v46, 0.0 }
 0xe51   : > { %5551 = vadd.xlane.f32.xlu0 %v5550_v47 }
 0xe67   : > { %5721 = vrot.lane.b32.xlu0 %v5445_v20, %s8985_s18  ;;  %v8105_v20 = vld [vmem:[%s10186_s0 + $0x38] sm:$0xff]   ;;  %s10188_s18 = sld [smem:[#allocation85_spill]]  ;;  %s7033_s0 = sshll.u32 %s9228_s22, 4 }
 0xe68   : > { %7604 = vmatpush3.bf16.msra.mxu0 %v8105_v20  ;;  %s8986_s22 = smov [#allocation41]  }
 0xe69   : > { %7605 = vmatprep.subr.bf16.mxu0 %v8982_v0  ;;  %s8803_s5 = sshll.u32 %s8986_s22, 4  ;;  %s8804_s5 = int_to_ptr.vmem [resolvable:$false] %s8803_s5 }
 0xe6a   : > { %s8805_s6 = scalar_lea.vmem %s8804_s5, 32 }
 0xe6d   : > { %s10189_s1 = smov %s10188_s18 }
 0xeb0   : > { %v5712_v49 = vpop.xlane.xlu0 %5711 }
 0xeb1   : > { %v5713_v50 = vsub.f32 %v5706_v37, %v5712_v49 }
 0xeb3   : > { %v5714_v35 = vmul.f32 1.442695, %v5713_v50 }
 0xeb5   : > { %8139 = vpow2.f32 %v5714_v35  ;;  %v8113_v35 = vld [vmem:[%s10188_s18 + $0x38] sm:$0xff]   ;;  %s1571_s18 = scalar_lea.vmem [#allocation41], %s1570_s15 }
 0xec2   : > { %v8140_v52 = vpop.eup %8139 }
 0xec3   : > { %v5716_v33 = vsel %vm5543_vm5, %v8140_v52, 0.0 }
 0xec4   : > { %5717 = vadd.xlane.f32.xlu1 %v5716_v33  ;;  %v8115_v33 = vld [vmem:[%s10189_s1 + $0x28] sm:$0xff]  }
 0xeda   : > { %v5552_v53 = vpop.xlane.xlu0 %5551 }
 0xedb   : > { %8141 = vrcp.f32 %v5552_v53  ;;  %v8116_v53 = vld [vmem:[%s10189_s1 + $0x20] sm:$0xff]  }
 0xede   : > { %v5722_v58 = vpop.permute.xlu0 %5721 }
 0xee8   : > { %v8142_v55 = vpop.eup %8141 }
 0xee9   : > { %v5554_v56 = vmul.f32 %v8142_v55, %v8138_v46  ;;  %v7006_v46 = vld [vmem:[#allocation35] ss:$0 sm:$0xff]  ;;  %v8117_v55 = vld [vmem:[%s10189_s1 + $0x18] sm:$0xff]  }
 0xeeb   : > { %7567 = vmatmul.mubr.msk.f32.vlgmr.msra.gmra.mxu1 %vm4381_vm3, %v5554_v56  ;;  %v8118_v56 = vld [vmem:[%s10189_s1 + $0x10] sm:$0xff]  }
 0xeec   : > { %7575 = vmatpush3.msk.msra.mxu1 %vm4328_vm2, %v5722_v58  ;;  %7576 = vmatprep.mubr.msk.f32.mxu1 %vm8983_vm0, %v8982_v0  ;;  %v8119_v58 = vld [vmem:[%s10189_s1 + $0x8] sm:$0xff]  }
 0xeed   : > { %7579 = vmatprep.subr.bf16.mxu1 %v8982_v0 }
 0xf4d   : > { %v5718_v60 = vpop.xlane.xlu1 %5717 }
 0xf4e   : > { %8143 = vrcp.f32 %v5718_v60  ;;  %v8120_v60 = vld [vmem:[%s10189_s1] sm:$0xff]  }
 0xf5b   : > { %v8144_v36 = vpop.eup %8143 }
 0xf5c   : > { %v5720_v39 = vmul.f32 %v8144_v36, %v8140_v52  ;;  %v8114_v52 = vld [vmem:[%s10189_s1 + $0x30] sm:$0xff]   ;;  %v8121_v36 = vld [vmem:[%s9195_s9 + $0x38] sm:$0xff]   ;;  %s6338_s1 = sshll.u32 %s1571_s18, 4  ;;  %s10019_s1 = int_to_ptr.vmem [resolvable:$true] %s6338_s1 }
 0xf5d   : > { %s8799_s4 = scalar_lea.vmem %s10019_s1, 16  ;;  %p8806_p8 = scmp.lt.s32.totalorder %s10019_s1, %s8804_s5 }
 0xf5e   : > { %7577 = vmatmul.mubr.msk.f32.vlgmr.msra.gmra.mxu1 %vm4381_vm3, %v5720_v39  ;;  %v8123_v39 = vld [vmem:[%s9195_s9 + $0x28] sm:$0xff]   ;;  %p8800_p6 = scmp.ne.s32.totalorder %s10019_s1, %s8799_s4  ;;  %p8807_p11 = scmp.lt.s32.totalorder %s8805_s6, %s8799_s4 }
 0xf5f   : > { %7580 = vmatpush3.bf16.msra.mxu1 %v8097_v61  ;;  %7587 = vmatprep.mubr.msk.bf16.mxu1 %vm8983_vm0, %v8982_v0  ;;  %v8122_v61 = vld [vmem:[%s9195_s9 + $0x30] sm:$0xff]  }
 0xf60   : > { %7581 = vmatprep.subr.bf16.mxu1 %v8982_v0  ;;  %p8801_p7 = pnand %p8800_p6, %p10190_p10  ;;  %p8808_p12 = por %p8807_p11, %p8806_p8 }
 0xf62   : > { %p8802_p13 = pneg %p8801_p7 }
 0xf63   : > { %7582 = vmatpush3.bf16.msra.mxu1 %v8098_v62  ;;  %v7007_v62 = vld [vmem:[#allocation37] ss:$0 sm:$0xff] }
 0xf64   : > { %7583 = vmatprep.subr.bf16.mxu1 %v8982_v0  ;;  %p8809_p0 = pnand %p8808_p12, %p8802_p13 }
 0xf67   : > { %7584 = vmatpush3.bf16.msra.mxu1 %v8099_v42 }
 0xf68   : > { %7585 = vmatprep.subr.bf16.mxu1 %v8982_v0 }
 0xf6b   : > { %7586 = vmatpush3.bf16.msra.mxu1 %v8100_v63 }
 0xf6c   : > { %7591 = vmatprep.subr.bf16.mxu1 %v8982_v0 }
 0xfab   : > { %v5627_v45 = vpop.f32.mrf.mxu1 }
 0xfac   : > { %v5631_v59 = vpack.c.bf16 %v5627_v45, %v5627_v45 }
 0xfad   : > { %v7568_v1 = vpop.f32.mrf.mxu1 }
0x101e   : > { %v5794_v48 = vpop.f32.mrf.mxu1 }
0x101f   : > { %v5798_v51 = vpack.c.bf16 %v5794_v48, %v5794_v48 }
0x1020   : > { %v7578_v54 = vpop.f32.mrf.mxu1 }
0x1021   : > { %7588 = vmatmul.mubr.msk.bf16.vlgmr.msra.gmra.mxu1 %vm5466_vm4, %v5798_v51 }
0x1022   : > { %7592 = vmatpush3.bf16.msra.mxu1 %v8101_v2  ;;  %7599 = vmatprep.mubr.msk.bf16.mxu1 %vm8983_vm0, %v8982_v0 }
0x1023   : > { %7593 = vmatprep.subr.bf16.mxu1 %v8982_v0 }
0x1026   : > { %7594 = vmatpush3.bf16.msra.mxu1 %v8102_v57 }
0x1027   : > { %7595 = vmatprep.subr.bf16.mxu1 %v8982_v0 }
0x102a   : > { %7596 = vmatpush3.bf16.msra.mxu1 %v8103_v3 }
0x102b   : > { %7597 = vmatprep.subr.bf16.mxu1 %v8982_v0 }
0x102e   : > { %7598 = vmatpush3.bf16.msra.mxu1 %v8104_v4 }
0x102f   : > { %7623 = vmatprep.subr.bf16.mxu1 %v8982_v0 }
0x1031   : > { %7600 = vmatmul.mubr.msk.bf16.vlgmr.msra.gmra.mxu1 %vm5466_vm4, %v5631_v59 }
0x1032   : > { %7639 = vmatprep.mubr.msk.bf16.mxu1 %vm8983_vm0, %v8982_v0  ;;  %7624 = vmatpush3.bf16.msra.mxu1 %v8113_v35 }
0x1033   : > { %7625 = vmatprep.subr.bf16.mxu1 %v8982_v0 }
0x1036   : > { %7626 = vmatpush3.bf16.msra.mxu1 %v8114_v52 }
0x1037   : > { %7627 = vmatprep.subr.bf16.mxu1 %v8982_v0 }
0x103a   : > { %7628 = vmatpush3.bf16.msra.mxu1 %v8115_v33 }
0x103b   : > { %7629 = vmatprep.subr.bf16.mxu1 %v8982_v0 }
0x103e   : > { %7630 = vmatpush3.bf16.msra.mxu1 %v8116_v53 }
0x103f   : > { %7631 = vmatprep.subr.bf16.mxu1 %v8982_v0 }
0x1042   : > { %7632 = vmatpush3.bf16.msra.mxu1 %v8117_v55 }
0x1043   : > { %7633 = vmatprep.subr.bf16.mxu1 %v8982_v0 }
0x1046   : > { %7634 = vmatpush3.bf16.msra.mxu1 %v8118_v56 }
0x1047   : > { %7635 = vmatprep.subr.bf16.mxu1 %v8982_v0 }
0x104a   : > { %7636 = vmatpush3.bf16.msra.mxu1 %v8119_v58 }
0x104b   : > { %7637 = vmatprep.subr.bf16.mxu1 %v8982_v0 }
0x104e   : > { %7638 = vmatpush3.bf16.msra.mxu1 %v8120_v60 }
0x10e1   : > { %v5860_v5 = vpop.f32.mrf.mxu1 }
0x10e3   : > { %v7589_v6 = vpop.f32.mrf.mxu1 }
0x10e5   : > { %v5863_v7 = vpop.f32.mrf.mxu1 }
0x10e7   : > { %v7590_v8 = vpop.f32.mrf.mxu1 }
0x10e8   : > { %v8124_v8 = vld [vmem:[%s9195_s9 + $0x20] sm:$0xff]  }
0x10f1   : > { %v5927_v9 = vpop.f32.mrf.mxu1 }
0x10f2   : > { %v5928_v10 = vadd.f32 %v5927_v9, %v5860_v5  ;;  %v8125_v9 = vld [vmem:[%s9195_s9 + $0x18] sm:$0xff]  }
0x10f3   : > { %v7601_v12 = vpop.f32.mrf.mxu1 }
0x10f4   : > { %v5933_v13 = vadd.f32 %v5928_v10, %v9861_v26  ;;  %v8106_v26 = vld [vmem:[%s10187_s2 + $0x30] sm:$0xff]   ;;  %v8128_v12 = vld [vmem:[%s9195_s9] sm:$0xff]   ;;  %s10017_s2 = scalar_lea.hbm %s9205_s13, %s7033_s0 }
0x10f5   : > { %v5930_v14 = vpop.f32.mrf.mxu1  ;;  %7606 = vmatpush3.bf16.msra.mxu0 %v8106_v26  ;;  %v8126_v10 = vld [vmem:[%s9195_s9 + $0x10] sm:$0xff]  }
0x10f6   : > { %v9956_v15 = vadd.f32 %v7004_v11, %v5933_v13  ;;  %7607 = vmatprep.subr.bf16.mxu0 %v8982_v0  ;;  %v8127_v11 = vld [vmem:[%s9195_s9 + $0x8] sm:$0xff]   ;;  %v7024_v14 = vld [vmem:[#allocation38] ss:$0 sm:$0xff] }
0x10f7   : > { %v7602_v16 = vpop.f32.mrf.mxu1 }
0x10f8   : > { %v5942_v17 = vsel %vm4328_vm2, %v9956_v15, 0.0  ;;  %v5946_v18 = vmul.f32 %v9956_v15, %v9956_v15 }
0x10f9   : > { %5943 = vadd.xlane.f32.xlu1 %v5942_v17  ;;  %7608 = vmatpush3.bf16.msra.mxu0 %v8107_v21 }
0x10fa   : > { %v5947_v19 = vsel %vm4328_vm2, %v5946_v18, 0.0  ;;  %7609 = vmatprep.subr.bf16.mxu0 %v8982_v0 }
0x10fd   : > { %5948 = vadd.xlane.f32.xlu1 %v5947_v19  ;;  %7610 = vmatpush3.bf16.msra.mxu0 %v8108_v22 }
0x10fe   : > { %7611 = vmatprep.subr.bf16.mxu0 %v8982_v0 }
0x1101   : > { %7612 = vmatpush3.bf16.msra.mxu0 %v8109_v23 }
0x1102   : > { %7613 = vmatprep.subr.bf16.mxu0 %v8982_v0 }
0x1105   : > { %7614 = vmatpush3.bf16.msra.mxu0 %v8110_v24 }
0x1106   : > { %7615 = vmatprep.subr.bf16.mxu0 %v8982_v0 }
0x1109   : > { %7616 = vmatpush3.bf16.msra.mxu0 %v8111_v25 }
0x110a   : > { %7617 = vmatprep.subr.bf16.mxu0 %v8982_v0 }
0x110d   : > { %7618 = vmatpush3.bf16.msra.mxu0 %v8112_v27 }
0x110e   : > { %7643 = vmatprep.subr.bf16.mxu0 %v8982_v0 }
0x1182   : > { %v5944_v28 = vpop.xlane.xlu1 %5943 }
0x1183   : > { %v5945_v29 = vmul.f32 0.0078125, %v5944_v28 }
0x1185   : > { %v5951_v31 = vmul.f32 %v5945_v29, %v5945_v29  ;;  %v5954_v40 = vsub.f32 %v9956_v15, %v5945_v29 }
0x1186   : > { %v5949_v30 = vpop.xlane.xlu1 %5948 }
0x1187   : > { %v5950_v32 = vmul.f32 0.0078125, %v5949_v30 }
0x1189   : > { %v5952_v34 = vsub.f32 %v5950_v32, %v5951_v31 }
0x118b   : > { %v5953_v37 = vmax.f32 %v5952_v34, 0.0 }
0x118d   : > { %v5955_v38 = vadd.f32 1e-05, %v5953_v37 }
0x118f   : > { %8145 = vrsqrt.f32 %v5955_v38 }
0x119c   : > { %v8146_v41 = vpop.eup %8145 }
0x119d   : > { %v5957_v44 = vmul.f32 %v8146_v41, %v5954_v40 }
0x119f   : > { %v5965_v47 = vmul.f32 %v7005_v43, %v5957_v44 }
0x11a1   : > { %v5973_v49 = vadd.f32 %v7006_v46, %v5965_v47 }
0x11a3   : > { %v5990_v50 = vpack.c.bf16 %v5973_v49, %v5973_v49 }
0x11a5   : > { %7620 = vmatmul.mubr.bf16.vlgmr.msra.gmra.mxu0 %v5990_v50 }
0x11a6   : > { %7659 = vmatprep.mubr.msk.bf16.mxu0 %vm8983_vm0, %v8982_v0  ;;  %7644 = vmatpush3.bf16.msra.mxu0 %v8121_v36 }
0x11a7   : > { %7645 = vmatprep.subr.bf16.mxu0 %v8982_v0 }
0x11aa   : > { %7646 = vmatpush3.bf16.msra.mxu0 %v8122_v61 }
0x11ab   : > { %7647 = vmatprep.subr.bf16.mxu0 %v8982_v0 }
0x11ae   : > { %7648 = vmatpush3.bf16.msra.mxu0 %v8123_v39 }
0x11af   : > { %7649 = vmatprep.subr.bf16.mxu0 %v8982_v0 }
0x11b2   : > { %7650 = vmatpush3.bf16.msra.mxu0 %v8124_v8 }
0x11b3   : > { %7651 = vmatprep.subr.bf16.mxu0 %v8982_v0 }
0x11b6   : > { %7652 = vmatpush3.bf16.msra.mxu0 %v8125_v9 }
0x11b7   : > { %7653 = vmatprep.subr.bf16.mxu0 %v8982_v0 }
0x11ba   : > { %7654 = vmatpush3.bf16.msra.mxu0 %v8126_v10 }
0x11bb   : > { %7655 = vmatprep.subr.bf16.mxu0 %v8982_v0 }
0x11be   : > { %7656 = vmatpush3.bf16.msra.mxu0 %v8127_v11 }
0x11bf   : > { %7657 = vmatprep.subr.bf16.mxu0 %v8982_v0 }
0x11c2   : > { %7658 = vmatpush3.bf16.msra.mxu0 %v8128_v12 }
0x1265   : > { %v6080_v42 = vpop.f32.mrf.mxu0 }
0x1266   : > { %v6081_v63 = vadd.f32 %v7007_v62, %v6080_v42 }
0x1267   : > { %v7621_v45 = vpop.f32.mrf.mxu0 }
0x1268   : > { %v6086_v1 = vmul.f32 %v6081_v63, %v6081_v63 }
0x1269   : > { %v6083_v48 = vpop.f32.mrf.mxu0 }
0x126a   : > { %v6087_v2 = vmul.f32 %v6086_v1, %v6081_v63 }
0x126b   : > { %v7622_v51 = vpop.f32.mrf.mxu0 }
0x126c   : > { %v6088_v54 = vmul.f32 0.044715, %v6087_v2 }
0x126e   : > { %v6089_v57 = vadd.f32 %v6088_v54, %v6081_v63 }
0x1270   : > { %v6090_v3 = vmul.f32 0.7978846, %v6089_v57 }
0x1272   : > { %8147 = vtanh.f32 %v6090_v3 }
0x127f   : > { %v8148_v4 = vpop.eup %8147 }
0x1280   : > { %v6092_v59 = vadd.f32 1.0, %v8148_v4 }
0x1282   : > { %v6093_v5 = vmul.f32 0.5, %v6092_v59 }
0x1284   : > { %v6094_v6 = vmul.f32 %v6093_v5, %v6081_v63 }
0x1286   : > { %v6111_v7 = vpack.c.bf16 %v6094_v6, %v6094_v6 }
0x1288   : > { %7640 = vmatmul.mubr.bf16.vlgmr.msra.gmra.mxu1 %v6111_v7 }
0x1348   : > { %v6194_v13 = vpop.f32.mrf.mxu1 }
0x1349   : > { %v6200_v16 = vadd.f32 %v6194_v13, %v9956_v15  ;;  %v6235_v15 = vld [vmem:[#allocation40] sm:$0x1] }
0x134a   : > { %v7641_v17 = vpop.f32.mrf.mxu1 }
0x134b   : > { %v6208_v18 = vadd.f32 %v7024_v14, %v6200_v16 }
0x134c   : > { %v6197_v19 = vpop.f32.mrf.mxu1 }
0x134d   : > { %v6209_v20 = vsel %vm4328_vm2, %v6208_v18, 0.0 }
0x134e   : > { %v6210_v26 = vrot.slane %v6209_v20, 4  ;;  %v7642_v21 = vpop.f32.mrf.mxu1 }
0x1350   : > { %v6211_v22 = vadd.f32 %v6210_v26, %v6209_v20 }
0x1352   : > { %v6212_v23 = vrot.slane %v6211_v22, 2 }
0x1354   : > { %v6213_v24 = vadd.f32 %v6212_v23, %v6211_v22 }
0x1356   : > { %v6214_v25 = vrot.slane %v6213_v24, 1 }
0x1358   : > { %v6215_v0 = vadd.f32 %v6214_v25, %v6213_v24 }
0x135a   : > { %v6217_v27 = vmul.f32 0.5, %v6215_v0 }
0x135c   : > { %v6234_v28 = vpack.c.bf16 %v6217_v27, %v6217_v27 }
0x135e   : > { %7660 = vmatmul.mubr.bf16.vlgmr.msra.gmra.mxu0 %v6234_v28 }
0x141e   : > { %v6318_v29 = vpop.f32.mrf.mxu0 }
0x141f   : > { %v6319_v30 = vadd.f32 %v6318_v29, %v6235_v15 }
0x1420   : > { %v7661_v31 = vpop.f32.mrf.mxu0 }
0x1421   : > { %6324 = vst [vmem:[%s1571_s18] sm:$0x1] %v6319_v30 }
0x1422   : > { %v6321_v32 = vpop.f32.mrf.mxu0 }
0x1423   : > { %8812 = shalt.err (!%p8809_p0)
}
0x1424   : > { %s8813_s15 = scalar_lea.hbm %s10017_s2, 16  ;;  %s8817_s0 = scalar_lea.hbm %s9205_s13, 32 }
0x1425   : > { %p8814_p1 = scmp.ne.s32.totalorder %s10017_s2, %s8813_s15  ;;  %p8818_p9 = scmp.lt.s32.totalorder %s10017_s2, %s9205_s13 }
0x1426   : > { %p8819_p4 = scmp.lt.s32.totalorder %s8817_s0, %s8813_s15 }
0x1427   : > { %p8815_p2 = pnand %p8814_p1, %p10190_p10 }
0x1428   : > { %p8820_p5 = por %p8819_p4, %p8818_p9 }
0x1429   : > { %p8816_p3 = pneg %p8815_p2 }
0x142b   : > { %p8821_p6 = pnand %p8820_p5, %p8816_p3 }
0x142d   : > { %8824 = shalt.err (!%p8821_p6)
}
0x142e   : > { %7763 = dma.vmem_to_hbm [thread:$0]  (%p10190_p10), %s10019_s1, 16, %s10017_s2, %s6326_s3   ;;  %v7662_v34 = vpop.f32.mrf.mxu0 }
0x142f PF: > { %s10191_s5 = sld [smem:[#allocation89_spill]] }
0x1430   : > { %s10192_s6 = sld [smem:[#allocation87_spill]] }
0x1431   : > { %s10193_s4 = sld [smem:[#allocation92_spill]] }
0x1435   : > { %p7895_p7 = scmp.ge.s32.totalorder %s10191_s5, 2 }
0x1436   : > { %s6350_s18 = sand.u32 1, %s10192_s6  }
0x1437   : > { %p10194_p13 = scmp.ne.s32.totalorder %s10193_s4, 0  ;;  %s6351_s22 = scalar_lea.sflag [#allocation4], %s6350_s18 }
0x1439   : > { %p7842_p8 = pnand %p7895_p7, %p10194_p13 }
0x143b   : > { %p7843_p11 = pneg %p7842_p8 }
0x143d   : > { %8894 = dma.done.wait (%p7843_p11), %s6351_s22, 16  }
0x143e   : > { %8896 = vsyncadd (%p7843_p11), %s6351_s22, 4294967280  ;;  %s10195_s18 = sld [smem:[#allocation90_spill]]  ;;  %s10198_s15 = smov %s8903_s16 }
0x143f   : > { %s10196_s0 = sld [smem:[#allocation88_spill]] }
0x1440   : > { %s10197_s7 = sld [smem:[#allocation91_spill]] }
0x1444   : > { %p108_p12 = scmp.ge.s32.totalorder %s10195_s18, 4  }
0x1445   : > { %s10199_s16 = smov %s10196_s0 }
0x1446   : > { %s10200_s0 = smov %s10197_s7  ;;  %110 = sbr.rel (!%p108_p12) target bundleno = 94 (0x5e), region = 412 }
0x144b   :  { %6355 = vsyncpa [#allocation3], 1 }
0x144c   :  { %6357 = vsyncpa [#allocation3 + $0x1], 1 }
0x144d   :  { %6358 = vsyncpa [#allocation6], 1 }
0x144e   :  { %6359 = vsyncpa [#allocation9], 1 }
0x144f   :  { %6360 = vsyncpa [#allocation12], 1 }
0x1450   :  { %6361 = vsyncpa [#allocation15], 1 }
0x1451   :  { %6362 = vsyncpa [#allocation18], 1 }
0x1452   :  { %6363 = vsyncpa [#allocation21], 1 }
0x1453   :  { %6364 = vsyncpa [#allocation24], 1 }
0x1454   :  { %6365 = vsyncpa [#allocation27], 1 }
0x1455   :  { %6366 = vsyncpa [#allocation30], 1 }
0x1456   :  { %6367 = vsyncpa [#allocation33], 1 }
0x1457   :  { %6368 = vsyncpa [#allocation36], 1 }
0x1458   :  { %6369 = vsyncpa [#allocation39], 1 }
0x1459   :  { %6370 = vsyncpa [#allocation4], 1 }
0x145a   :  { %6372 = vsyncpa [#allocation4 + $0x1], 1 }

</bundles_post_ra>
